<compile_context>
chip_gen: v7x
topology: tpu7x:2x2x1
jax: 0.10.0
libtpu: 0.0.40
codegen_flags: <defaults>
</compile_context>

<pallas_src>
import functools

import jax
import jax.numpy as jnp
import numpy as np
from jax.experimental import pallas as pl
from jax.experimental.pallas import tpu as pltpu

_EPS = 1e-5
_LANE = 128


def _round_up(x, m):
    return (x + m - 1) // m * m


def _pad2d(a, rows, cols):
    r, c = a.shape
    return jnp.pad(a, ((0, rows - r), (0, cols - c)))


# ----------------------------- Pallas kernels ------------------------------ #

def _mm_stats_kernel(p_ref, w_ref, y_ref, sum_ref, ssq_ref):
    """y = P @ W (bf16 operands, f32 accum) + per-channel sum / sum-of-squares.

    Stats are computed from the f32 accumulator; y is stored bf16 (HBM traffic)."""
    @pl.when(pl.program_id(1) == 0)       # first M step for this channel tile
    def _():
        sum_ref[...] = jnp.zeros_like(sum_ref)
        ssq_ref[...] = jnp.zeros_like(ssq_ref)

    y = jnp.dot(p_ref[...], w_ref[...], preferred_element_type=jnp.float32)
    y_ref[...] = y.astype(y_ref.dtype)
    sum_ref[...] += jnp.sum(y, axis=0, keepdims=True)
    ssq_ref[...] += jnp.sum(y * y, axis=0, keepdims=True)


def _mm_stats_proj_kernel(p_ref, w_ref, xs_ref, wsc_ref,
                          y_ref, ys_ref, sum_ref, ssq_ref, ssum_ref, sssq_ref):
    """conv2 matmul + 1x1 projection-shortcut matmul, both with BN statistics."""
    @pl.when(pl.program_id(1) == 0)
    def _():
        sum_ref[...] = jnp.zeros_like(sum_ref)
        ssq_ref[...] = jnp.zeros_like(ssq_ref)
        ssum_ref[...] = jnp.zeros_like(ssum_ref)
        sssq_ref[...] = jnp.zeros_like(sssq_ref)

    y = jnp.dot(p_ref[...], w_ref[...], preferred_element_type=jnp.float32)
    ys = jnp.dot(xs_ref[...], wsc_ref[...], preferred_element_type=jnp.float32)
    y_ref[...] = y.astype(y_ref.dtype)
    ys_ref[...] = ys.astype(ys_ref.dtype)
    sum_ref[...] += jnp.sum(y, axis=0, keepdims=True)
    ssq_ref[...] += jnp.sum(y * y, axis=0, keepdims=True)
    ssum_ref[...] += jnp.sum(ys, axis=0, keepdims=True)
    sssq_ref[...] += jnp.sum(ys * ys, axis=0, keepdims=True)


def _bn_relu_kernel(y_ref, sc_ref, sh_ref, o_ref):
    v = y_ref[...].astype(jnp.float32) * sc_ref[...] + sh_ref[...]
    o_ref[...] = jnp.maximum(v, 0.0).astype(o_ref.dtype)


def _bn_add_relu_kernel(y_ref, sc_ref, sh_ref, s_ref, o_ref):
    v = y_ref[...].astype(jnp.float32) * sc_ref[...] + sh_ref[...] + s_ref[...]
    o_ref[...] = jnp.maximum(v, 0.0).astype(o_ref.dtype)


def _bn_proj_add_relu_kernel(y_ref, sc_ref, ys_ref, ssc_ref, shc_ref, o_ref):
    # Combined shift (bn2 shift + shortcut-BN shift) is folded in the wrapper.
    v = (y_ref[...].astype(jnp.float32) * sc_ref[...]
         + ys_ref[...].astype(jnp.float32) * ssc_ref[...] + shc_ref[...])
    o_ref[...] = jnp.maximum(v, 0.0).astype(o_ref.dtype)


# ------------------------- pallas_call wrappers ----------------------------- #

def _compiler_params(semantics, block_bytes):
    # Double-buffered blocks + headroom; stay below v7x's 64 MiB/TC physical VMEM.
    vmem = int(2 * block_bytes) + (8 << 20)
    vmem = max(vmem, 32 << 20)
    vmem = min(vmem, 56 << 20)
    return pltpu.CompilerParams(dimension_semantics=semantics,
                                vmem_limit_bytes=vmem)


def _row_spec(tm, kp):      # streaming im2col / shortcut rows
    return pl.BlockSpec((tm, kp), lambda c, m: (m, 0))


def _w_spec(kp, tc):        # weights: resident across the M sweep
    return pl.BlockSpec((kp, tc), lambda c, m: (0, c))


def _tile_spec(tm, tc):     # (M, C) tiles
    return pl.BlockSpec((tm, tc), lambda c, m: (m, c))


def _chan_spec(tc):         # per-channel (1, C) vectors / accumulators, resident
    return pl.BlockSpec((1, tc), lambda c, m: (0, c))


def _conv_matmul_stats(p, w, tm, tc):
    mp, kp = p.shape
    cp = w.shape[1]
    grid = (cp // tc, mp // tm)
    block_bytes = (tm * kp + kp * tc + tm * tc) * 2 + 2 * tc * 4
    return pl.pallas_call(
        _mm_stats_kernel,
        out_shape=(jax.ShapeDtypeStruct((mp, cp), jnp.bfloat16),
                   jax.ShapeDtypeStruct((1, cp), jnp.float32),
                   jax.ShapeDtypeStruct((1, cp), jnp.float32)),
        grid=grid,
        in_specs=[_row_spec(tm, kp), _w_spec(kp, tc)],
        out_specs=(_tile_spec(tm, tc), _chan_spec(tc), _chan_spec(tc)),
        compiler_params=_compiler_params(("parallel", "arbitrary"), block_bytes),
    )(p, w)


def _conv_matmul_stats_proj(p, w, xs, wsc, tm, tc):
    mp, kp = p.shape
    cp = w.shape[1]
    kcp = xs.shape[1]
    grid = (cp // tc, mp // tm)
    block_bytes = (tm * kp + kp * tc + tm * kcp + kcp * tc + 2 * tm * tc) * 2 \
        + 4 * tc * 4
    return pl.pallas_call(
        _mm_stats_proj_kernel,
        out_shape=(jax.ShapeDtypeStruct((mp, cp), jnp.bfloat16),
                   jax.ShapeDtypeStruct((mp, cp), jnp.bfloat16),
                   jax.ShapeDtypeStruct((1, cp), jnp.float32),
                   jax.ShapeDtypeStruct((1, cp), jnp.float32),
                   jax.ShapeDtypeStruct((1, cp), jnp.float32),
                   jax.ShapeDtypeStruct((1, cp), jnp.float32)),
        grid=grid,
        in_specs=[_row_spec(tm, kp), _w_spec(kp, tc),
                  _row_spec(tm, kcp), _w_spec(kcp, tc)],
        out_specs=(_tile_spec(tm, tc), _tile_spec(tm, tc),
                   _chan_spec(tc), _chan_spec(tc), _chan_spec(tc), _chan_spec(tc)),
        compiler_params=_compiler_params(("parallel", "arbitrary"), block_bytes),
    )(p, w, xs, wsc)


def _apply_elementwise(kernel, out_dtype, tm, tc, *args):
    mp, cp = args[0].shape
    grid = (cp // tc, mp // tm)
    in_specs = []
    block_bytes = tm * tc * np.dtype(out_dtype).itemsize
    for a in args:
        if a.shape[0] == 1:
            in_specs.append(_chan_spec(tc))
            block_bytes += tc * a.dtype.itemsize
        else:
            in_specs.append(_tile_spec(tm, tc))
            block_bytes += tm * tc * a.dtype.itemsize
    return pl.pallas_call(
        kernel,
        out_shape=jax.ShapeDtypeStruct((mp, cp), out_dtype),
        grid=grid,
        in_specs=in_specs,
        out_specs=_tile_spec(tm, tc),
        compiler_params=_compiler_params(("parallel", "parallel"), block_bytes),
    )(*args)


# ------------------------------ JAX glue ----------------------------------- #

def _im2col(x_nhwc, k, stride, padding):
    """(N,H,W,C) -> (N*Ho*Wo, k*k*C), patch layout (kh, kw, ci)."""
    n, h, w, c = x_nhwc.shape
    xp = jnp.pad(x_nhwc, ((0, 0), (padding, padding), (padding, padding), (0, 0)))
    ho = (h + 2 * padding - k) // stride + 1
    wo = (w + 2 * padding - k) // stride + 1
    cols = []
    for kh in range(k):
        for kw in range(k):
            cols.append(xp[:, kh:kh + stride * (ho - 1) + 1:stride,
                           kw:kw + stride * (wo - 1) + 1:stride, :])
    patches = jnp.concatenate(cols, axis=-1)
    return patches.reshape(n * ho * wo, k * k * c), (n, ho, wo)


def _fold_bn(s, q, g_pad, b_pad, m_true):
    """sum / sum-of-squares -> per-channel affine (scale, shift). Biased var."""
    mu = s / m_true
    var = jnp.maximum(q / m_true - mu * mu, 0.0)
    scale = g_pad * jax.lax.rsqrt(var + _EPS)
    shift = b_pad - mu * scale
    return scale, shift


def residual_block_forward(x_nchw, params, stride=1, tm=512):
    """Pallas implementation of ResidualBlock.forward. Input/output are NCHW."""
    w1 = params["conv1_w"]               # (planes, in_planes, 3, 3)
    w2 = params["conv2_w"]               # (planes, planes, 3, 3)
    planes, in_planes = w1.shape[0], w1.shape[1]

    x_nhwc = jnp.transpose(x_nchw, (0, 2, 3, 1)).astype(jnp.float32)

    cpad = _round_up(planes, _LANE)       # lane-dense output channels
    tc = _LANE

    # ---- stage 1: conv1 (3x3, stride, pad 1) + bn1 + relu ----
    p1, (n, ho, wo) = _im2col(x_nhwc, 3, stride, 1)
    m = n * ho * wo
    tm = min(tm, _round_up(m, 16))        # tm multiple of 16 (bf16 sublane pack)
    m_pad = _round_up(m, tm)
    k1p = _round_up(9 * in_planes, _LANE)

    p1p = _pad2d(p1, m_pad, k1p).astype(jnp.bfloat16)
    w1m = jnp.transpose(w1, (2, 3, 1, 0)).reshape(9 * in_planes, planes)
    w1p = _pad2d(w1m, k1p, cpad).astype(jnp.bfloat16)
    g1 = _pad2d(params["bn1_g"].reshape(1, planes), 1, cpad)
    b1 = _pad2d(params["bn1_b"].reshape(1, planes), 1, cpad)

    y1, s1, q1 = _conv_matmul_stats(p1p, w1p, tm, tc)
    sc1, sh1 = _fold_bn(s1, q1, g1, b1, float(m))
    o1 = _apply_elementwise(_bn_relu_kernel, jnp.bfloat16, tm, tc, y1, sc1, sh1)

    # ---- stage 2: conv2 (3x3, stride 1, pad 1) + bn2 + shortcut + add + relu ----
    o1_nhwc = o1[:m, :planes].reshape(n, ho, wo, planes)
    p2, _ = _im2col(o1_nhwc, 3, 1, 1)
    k2p = _round_up(9 * planes, _LANE)
    p2p = _pad2d(p2, m_pad, k2p).astype(jnp.bfloat16)
    w2m = jnp.transpose(w2, (2, 3, 1, 0)).reshape(9 * planes, planes)
    w2p = _pad2d(w2m, k2p, cpad).astype(jnp.bfloat16)
    g2 = _pad2d(params["bn2_g"].reshape(1, planes), 1, cpad)
    b2 = _pad2d(params["bn2_b"].reshape(1, planes), 1, cpad)

    if stride != 1 or in_planes != planes:
        # projection shortcut: 1x1 conv (stride) + BatchNorm
        cinp = _round_up(in_planes, _LANE)
        xs = x_nhwc[:, ::stride, ::stride, :].reshape(m, in_planes)
        xsp = _pad2d(xs, m_pad, cinp).astype(jnp.bfloat16)
        wsc = params["sc_w"].reshape(planes, in_planes).T
        wscp = _pad2d(wsc, cinp, cpad).astype(jnp.bfloat16)
        gsc = _pad2d(params["sc_g"].reshape(1, planes), 1, cpad)
        bsc = _pad2d(params["sc_b"].reshape(1, planes), 1, cpad)

        y2, ysc, s2, q2, ss, qs = _conv_matmul_stats_proj(p2p, w2p, xsp, wscp, tm, tc)
        sc2, sh2 = _fold_bn(s2, q2, g2, b2, float(m))
        scs, shs = _fold_bn(ss, qs, gsc, bsc, float(m))
        sh_comb = sh2 + shs                       # fold the two shifts (wrapper-side)
        out = _apply_elementwise(_bn_proj_add_relu_kernel, jnp.float32, tm, tc,
                                 y2, sc2, ysc, scs, sh_comb)
    else:
        # identity shortcut
        y2, s2, q2 = _conv_matmul_stats(p2p, w2p, tm, tc)
        sc2, sh2 = _fold_bn(s2, q2, g2, b2, float(m))
        xid = _pad2d(x_nhwc.reshape(m, planes), m_pad, cpad)
        out = _apply_elementwise(_bn_add_relu_kernel, jnp.float32, tm, tc,
                                 y2, sc2, sh2, xid)

    out_nhwc = out[:m, :planes].reshape(n, ho, wo, planes)
    return jnp.transpose(out_nhwc, (0, 3, 1, 2))


# --------------------------- pure-JAX reference ----------------------------- #

def _bn_train(y, g, b):
    mu = jnp.mean(y, axis=(0, 1, 2), keepdims=True)
    var = jnp.mean(jnp.square(y - mu), axis=(0, 1, 2), keepdims=True)
    return (y - mu) * jax.lax.rsqrt(var + _EPS) * g + b


def residual_block_reference(x_nchw, params, stride=1):
    dn = ("NHWC", "HWIO", "NHWC")
    x = jnp.transpose(x_nchw, (0, 2, 3, 1)).astype(jnp.float32)
    planes, in_planes = params["conv1_w"].shape[0], params["conv1_w"].shape[1]
    w1 = jnp.transpose(params["conv1_w"], (2, 3, 1, 0))
    w2 = jnp.transpose(params["conv2_w"], (2, 3, 1, 0))
    o = jax.lax.conv_general_dilated(x, w1, (stride, stride), ((1, 1), (1, 1)),
                                     dimension_numbers=dn)
    o = jax.nn.relu(_bn_train(o, params["bn1_g"], params["bn1_b"]))
    o = jax.lax.conv_general_dilated(o, w2, (1, 1), ((1, 1), (1, 1)),
                                     dimension_numbers=dn)
    o = _bn_train(o, params["bn2_g"], params["bn2_b"])
    if stride != 1 or in_planes != planes:
        wsc = jnp.transpose(params["sc_w"], (2, 3, 1, 0))
        s = jax.lax.conv_general_dilated(x, wsc, (stride, stride), ((0, 0), (0, 0)),
                                         dimension_numbers=dn)
        s = _bn_train(s, params["sc_g"], params["sc_b"])
    else:
        s = x
    return jnp.transpose(jax.nn.relu(o + s), (0, 3, 1, 2))


# --------------------------------- main ------------------------------------ #

def _make_params(key, in_planes, planes, with_proj):
    ks = jax.random.split(key, 10)
    params = {
        "conv1_w": 0.1 * jax.random.normal(ks[0], (planes, in_planes, 3, 3), jnp.float32),
        "bn1_g": 1.0 + 0.1 * jax.random.normal(ks[1], (planes,), jnp.float32),
        "bn1_b": 0.1 * jax.random.normal(ks[2], (planes,), jnp.float32),
        "conv2_w": 0.1 * jax.random.normal(ks[3], (planes, planes, 3, 3), jnp.float32),
        "bn2_g": 1.0 + 0.1 * jax.random.normal(ks[4], (planes,), jnp.float32),
        "bn2_b": 0.1 * jax.random.normal(ks[5], (planes,), jnp.float32),
    }
    if with_proj:
        params["sc_w"] = 0.1 * jax.random.normal(ks[6], (planes, in_planes, 1, 1), jnp.float32)
        params["sc_g"] = 1.0 + 0.1 * jax.random.normal(ks[7], (planes,), jnp.float32)
        params["sc_b"] = 0.1 * jax.random.normal(ks[8], (planes,), jnp.float32)
    return params, ks[9]


if __name__ == "__main__":
    N, H, W = 2, 16, 16

    # Case 1: projection shortcut (in_planes != planes), stride 1.
    in_planes, planes, stride = 4, 8, 1
    params, kx = _make_params(jax.random.PRNGKey(0), in_planes, planes, with_proj=True)
    x = jax.random.normal(kx, (N, in_planes, H, W), jnp.float32)
    fwd = jax.jit(functools.partial(residual_block_forward, stride=stride))
    out = jax.block_until_ready(fwd(x, params))
    ref = jax.block_until_ready(residual_block_reference(x, params, stride=stride))
    assert out.shape == (N, planes, H, W)
    np.testing.assert_allclose(np.asarray(out), np.asarray(ref), atol=3e-2, rtol=3e-2)

    # Case 2: identity shortcut (in_planes == planes, stride 1).
    params2, kx2 = _make_params(jax.random.PRNGKey(1), planes, planes, with_proj=False)
    x2 = jax.random.normal(kx2, (N, planes, H, W), jnp.float32)
    fwd2 = jax.jit(functools.partial(residual_block_forward, stride=1))
    out2 = jax.block_until_ready(fwd2(x2, params2))
    ref2 = jax.block_until_ready(residual_block_reference(x2, params2, stride=1))
    assert out2.shape == (N, planes, H, W)
    np.testing.assert_allclose(np.asarray(out2), np.asarray(ref2), atol=3e-2, rtol=3e-2)

    print("KERNEL_OK")
</pallas_src>

<mosaic_0001>
module attributes {stable_mosaic.version = 11 : i64} {
  func.func @_bn_relu_kernel(%arg0: i32, %arg1: i32, %arg2: memref<512x128xbf16, #tpu.memory_space<vmem>>, %arg3: memref<1x128xf32, #tpu.memory_space<vmem>>, %arg4: memref<1x128xf32, #tpu.memory_space<vmem>>, %arg5: memref<512x128xbf16, #tpu.memory_space<vmem>>) attributes {dimension_semantics = [#tpu.dimension_semantics<parallel>, #tpu.dimension_semantics<parallel>], iteration_bounds = array<i64: 1, 1>, scalar_prefetch = 0 : i64, scratch_operands = 0 : i64, tpu.core_type = #tpu.core_type<tc>, window_params = [{transform_indices = @transform_0, window_bounds = array<i64: 512, 128>}, {transform_indices = @transform_1, window_bounds = array<i64: 1, 128>}, {transform_indices = @transform_2, window_bounds = array<i64: 1, 128>}, {transform_indices = @transform_3, window_bounds = array<i64: 512, 128>}]} {
    %c0 = arith.constant 0 : index
    %c0_0 = arith.constant 0 : index
    %0 = vector.load %arg2[%c0, %c0_0] : memref<512x128xbf16, #tpu.memory_space<vmem>>, vector<512x128xbf16>
    %1 = arith.extf %0 : vector<512x128xbf16> to vector<512x128xf32>
    %c0_1 = arith.constant 0 : index
    %c0_2 = arith.constant 0 : index
    %2 = vector.load %arg3[%c0_1, %c0_2] : memref<1x128xf32, #tpu.memory_space<vmem>>, vector<1x128xf32>
    %3 = vector.broadcast %2 : vector<1x128xf32> to vector<512x128xf32>
    %4 = arith.mulf %1, %3 : vector<512x128xf32>
    %c0_3 = arith.constant 0 : index
    %c0_4 = arith.constant 0 : index
    %5 = vector.load %arg4[%c0_3, %c0_4] : memref<1x128xf32, #tpu.memory_space<vmem>>, vector<1x128xf32>
    %6 = vector.broadcast %5 : vector<1x128xf32> to vector<512x128xf32>
    %7 = arith.addf %4, %6 : vector<512x128xf32>
    %cst = arith.constant 0.000000e+00 : f32
    %8 = vector.broadcast %cst : f32 to vector<512x128xf32>
    %9 = arith.maximumf %7, %8 : vector<512x128xf32>
    %10 = arith.truncf %9 : vector<512x128xf32> to vector<512x128xbf16>
    %c0_5 = arith.constant 0 : index
    %c0_6 = arith.constant 0 : index
    %11 = vector.load %arg5[%c0_5, %c0_6] : memref<512x128xbf16, #tpu.memory_space<vmem>>, vector<512x128xbf16>
    tpu.vector_store %arg5[%c0_5, %c0_6], %10 {strides = array<i32>} : memref<512x128xbf16, #tpu.memory_space<vmem>>, vector<512x128xbf16>,
    return
  }
  func.func @transform_0(%arg0: i32, %arg1: i32) -> (i32, i32) {
    %c0_i32 = arith.constant 0 : i32
    return %arg1, %arg0 : i32, i32
  }
  func.func @transform_1(%arg0: i32, %arg1: i32) -> (i32, i32) {
    %c0_i32 = arith.constant 0 : i32
    %c0_i32_0 = arith.constant 0 : i32
    return %c0_i32, %arg0 : i32, i32
  }
  func.func @transform_2(%arg0: i32, %arg1: i32) -> (i32, i32) {
    %c0_i32 = arith.constant 0 : i32
    %c0_i32_0 = arith.constant 0 : i32
    return %c0_i32, %arg0 : i32, i32
  }
  func.func @transform_3(%arg0: i32, %arg1: i32) -> (i32, i32) {
    %c0_i32 = arith.constant 0 : i32
    return %arg1, %arg0 : i32, i32
  }
}

module attributes {stable_mosaic.version = 11 : i64} {
  func.func @_mm_stats_kernel(%arg0: i32, %arg1: i32, %arg2: memref<512x128xbf16, #tpu.memory_space<vmem>>, %arg3: memref<128x128xbf16, #tpu.memory_space<vmem>>, %arg4: memref<512x128xbf16, #tpu.memory_space<vmem>>, %arg5: memref<1x128xf32, #tpu.memory_space<vmem>>, %arg6: memref<1x128xf32, #tpu.memory_space<vmem>>) attributes {dimension_semantics = [#tpu.dimension_semantics<parallel>, #tpu.dimension_semantics<arbitrary>], iteration_bounds = array<i64: 1, 1>, scalar_prefetch = 0 : i64, scratch_operands = 0 : i64, tpu.core_type = #tpu.core_type<tc>, window_params = [{transform_indices = @transform_0, window_bounds = array<i64: 512, 128>}, {transform_indices = @transform_1, window_bounds = array<i64: 128, 128>}, {transform_indices = @transform_2, window_bounds = array<i64: 512, 128>}, {transform_indices = @transform_3, window_bounds = array<i64: 1, 128>}, {transform_indices = @transform_4, window_bounds = array<i64: 1, 128>}]} {
    %c0_i32 = arith.constant 0 : i32
    %0 = arith.cmpi eq, %arg1, %c0_i32 : i32
    %1 = arith.extui %0 : i1 to i32
    %c0_i32_0 = arith.constant 0 : i32
    %2 = arith.cmpi ne, %1, %c0_i32_0 : i32
    scf.if %2 {
      %cst_16 = arith.constant 0.000000e+00 : f32
      %19 = vector.broadcast %cst_16 : f32 to vector<1x128xf32>
      %c0_17 = arith.constant 0 : index
      %c0_18 = arith.constant 0 : index
      %20 = vector.load %arg5[%c0_17, %c0_18] : memref<1x128xf32, #tpu.memory_space<vmem>>, vector<1x128xf32>
      tpu.vector_store %arg5[%c0_17, %c0_18], %19 {strides = array<i32>} : memref<1x128xf32, #tpu.memory_space<vmem>>, vector<1x128xf32>,
      %cst_19 = arith.constant 0.000000e+00 : f32
      %21 = vector.broadcast %cst_19 : f32 to vector<1x128xf32>
      %c0_20 = arith.constant 0 : index
      %c0_21 = arith.constant 0 : index
      %22 = vector.load %arg6[%c0_20, %c0_21] : memref<1x128xf32, #tpu.memory_space<vmem>>, vector<1x128xf32>
      tpu.vector_store %arg6[%c0_20, %c0_21], %21 {strides = array<i32>} : memref<1x128xf32, #tpu.memory_space<vmem>>, vector<1x128xf32>,
    } else {
    }
    %c0 = arith.constant 0 : index
    %c0_1 = arith.constant 0 : index
    %3 = vector.load %arg2[%c0, %c0_1] : memref<512x128xbf16, #tpu.memory_space<vmem>>, vector<512x128xbf16>
    %c0_2 = arith.constant 0 : index
    %c0_3 = arith.constant 0 : index
    %4 = vector.load %arg3[%c0_2, %c0_3] : memref<128x128xbf16, #tpu.memory_space<vmem>>, vector<128x128xbf16>
    %cst = arith.constant dense<0.000000e+00> : vector<512x128xf32>
    %5 = tpu.matmul %3, %4, %cst {dimension_numbers = #tpu.dot_dimension_numbers<[1], [0], [0], [1], [0, 0, 1, 1], [], []>} : vector<512x128xbf16>, vector<128x128xbf16>, vector<512x128xf32> -> vector<512x128xf32>
    %6 = arith.truncf %5 : vector<512x128xf32> to vector<512x128xbf16>
    %c0_4 = arith.constant 0 : index
    %c0_5 = arith.constant 0 : index
    %7 = vector.load %arg4[%c0_4, %c0_5] : memref<512x128xbf16, #tpu.memory_space<vmem>>, vector<512x128xbf16>
    tpu.vector_store %arg4[%c0_4, %c0_5], %6 {strides = array<i32>} : memref<512x128xbf16, #tpu.memory_space<vmem>>, vector<512x128xbf16>,
    %c0_6 = arith.constant 0 : index
    %c0_7 = arith.constant 0 : index
    %8 = vector.load %arg5[%c0_6, %c0_7] : memref<1x128xf32, #tpu.memory_space<vmem>>, vector<1x128xf32>
    %cst_8 = arith.constant dense<0.000000e+00> : vector<128xf32>
    %9 = vector.multi_reduction <add>, %5, %cst_8 [0] : vector<512x128xf32> to vector<128xf32>
    %10 = vector.shape_cast %9 : vector<128xf32> to vector<1x128xf32>
    %11 = arith.addf %8, %10 : vector<1x128xf32>
    %c0_9 = arith.constant 0 : index
    %c0_10 = arith.constant 0 : index
    %12 = vector.load %arg5[%c0_9, %c0_10] : memref<1x128xf32, #tpu.memory_space<vmem>>, vector<1x128xf32>
    tpu.vector_store %arg5[%c0_9, %c0_10], %11 {strides = array<i32>} : memref<1x128xf32, #tpu.memory_space<vmem>>, vector<1x128xf32>,
    %c0_11 = arith.constant 0 : index
    %c0_12 = arith.constant 0 : index
    %13 = vector.load %arg6[%c0_11, %c0_12] : memref<1x128xf32, #tpu.memory_space<vmem>>, vector<1x128xf32>
    %14 = arith.mulf %5, %5 : vector<512x128xf32>
    %cst_13 = arith.constant dense<0.000000e+00> : vector<128xf32>
    %15 = vector.multi_reduction <add>, %14, %cst_13 [0] : vector<512x128xf32> to vector<128xf32>
    %16 = vector.shape_cast %15 : vector<128xf32> to vector<1x128xf32>
    %17 = arith.addf %13, %16 : vector<1x128xf32>
    %c0_14 = arith.constant 0 : index
    %c0_15 = arith.constant 0 : index
    %18 = vector.load %arg6[%c0_14, %c0_15] : memref<1x128xf32, #tpu.memory_space<vmem>>, vector<1x128xf32>
    tpu.vector_store %arg6[%c0_14, %c0_15], %17 {strides = array<i32>} : memref<1x128xf32, #tpu.memory_space<vmem>>, vector<1x128xf32>,
    return
  }
  func.func @transform_0(%arg0: i32, %arg1: i32) -> (i32, i32) {
    %c0_i32 = arith.constant 0 : i32
    %c0_i32_0 = arith.constant 0 : i32
    return %arg1, %c0_i32 : i32, i32
  }
  func.func @transform_1(%arg0: i32, %arg1: i32) -> (i32, i32) {
    %c0_i32 = arith.constant 0 : i32
    %c0_i32_0 = arith.constant 0 : i32
    return %c0_i32, %arg0 : i32, i32
  }
  func.func @transform_2(%arg0: i32, %arg1: i32) -> (i32, i32) {
    %c0_i32 = arith.constant 0 : i32
    return %arg1, %arg0 : i32, i32
  }
  func.func @transform_3(%arg0: i32, %arg1: i32) -> (i32, i32) {
    %c0_i32 = arith.constant 0 : i32
    %c0_i32_0 = arith.constant 0 : i32
    return %c0_i32, %arg0 : i32, i32
  }
  func.func @transform_4(%arg0: i32, %arg1: i32) -> (i32, i32) {
    %c0_i32 = arith.constant 0 : i32
    %c0_i32_0 = arith.constant 0 : i32
    return %c0_i32, %arg0 : i32, i32
  }
}

module attributes {stable_mosaic.version = 11 : i64} {
  func.func @_mm_stats_proj_kernel(%arg0: i32, %arg1: i32, %arg2: memref<512x128xbf16, #tpu.memory_space<vmem>>, %arg3: memref<128x128xbf16, #tpu.memory_space<vmem>>, %arg4: memref<512x128xbf16, #tpu.memory_space<vmem>>, %arg5: memref<128x128xbf16, #tpu.memory_space<vmem>>, %arg6: memref<512x128xbf16, #tpu.memory_space<vmem>>, %arg7: memref<512x128xbf16, #tpu.memory_space<vmem>>, %arg8: memref<1x128xf32, #tpu.memory_space<vmem>>, %arg9: memref<1x128xf32, #tpu.memory_space<vmem>>, %arg10: memref<1x128xf32, #tpu.memory_space<vmem>>, %arg11: memref<1x128xf32, #tpu.memory_space<vmem>>) attributes {dimension_semantics = [#tpu.dimension_semantics<parallel>, #tpu.dimension_semantics<arbitrary>], iteration_bounds = array<i64: 1, 1>, scalar_prefetch = 0 : i64, scratch_operands = 0 : i64, tpu.core_type = #tpu.core_type<tc>, window_params = [{transform_indices = @transform_0, window_bounds = array<i64: 512, 128>}, {transform_indices = @transform_1, window_bounds = array<i64: 128, 128>}, {transform_indices = @transform_2, window_bounds = array<i64: 512, 128>}, {transform_indices = @transform_3, window_bounds = array<i64: 128, 128>}, {transform_indices = @transform_4, window_bounds = array<i64: 512, 128>}, {transform_indices = @transform_5, window_bounds = array<i64: 512, 128>}, {transform_indices = @transform_6, window_bounds = array<i64: 1, 128>}, {transform_indices = @transform_7, window_bounds = array<i64: 1, 128>}, {transform_indices = @transform_8, window_bounds = array<i64: 1, 128>}, {transform_indices = @transform_9, window_bounds = array<i64: 1, 128>}]} {
    %c0_i32 = arith.constant 0 : i32
    %0 = arith.cmpi eq, %arg1, %c0_i32 : i32
    %1 = arith.extui %0 : i1 to i32
    %c0_i32_0 = arith.constant 0 : i32
    %2 = arith.cmpi ne, %1, %c0_i32_0 : i32
    scf.if %2 {
      %cst_33 = arith.constant 0.000000e+00 : f32
      %35 = vector.broadcast %cst_33 : f32 to vector<1x128xf32>
      %c0_34 = arith.constant 0 : index
      %c0_35 = arith.constant 0 : index
      %36 = vector.load %arg8[%c0_34, %c0_35] : memref<1x128xf32, #tpu.memory_space<vmem>>, vector<1x128xf32>
      tpu.vector_store %arg8[%c0_34, %c0_35], %35 {strides = array<i32>} : memref<1x128xf32, #tpu.memory_space<vmem>>, vector<1x128xf32>,
      %cst_36 = arith.constant 0.000000e+00 : f32
      %37 = vector.broadcast %cst_36 : f32 to vector<1x128xf32>
      %c0_37 = arith.constant 0 : index
      %c0_38 = arith.constant 0 : index
      %38 = vector.load %arg9[%c0_37, %c0_38] : memref<1x128xf32, #tpu.memory_space<vmem>>, vector<1x128xf32>
      tpu.vector_store %arg9[%c0_37, %c0_38], %37 {strides = array<i32>} : memref<1x128xf32, #tpu.memory_space<vmem>>, vector<1x128xf32>,
      %cst_39 = arith.constant 0.000000e+00 : f32
      %39 = vector.broadcast %cst_39 : f32 to vector<1x128xf32>
      %c0_40 = arith.constant 0 : index
      %c0_41 = arith.constant 0 : index
      %40 = vector.load %arg10[%c0_40, %c0_41] : memref<1x128xf32, #tpu.memory_space<vmem>>, vector<1x128xf32>
      tpu.vector_store %arg10[%c0_40, %c0_41], %39 {strides = array<i32>} : memref<1x128xf32, #tpu.memory_space<vmem>>, vector<1x128xf32>,
      %cst_42 = arith.constant 0.000000e+00 : f32
      %41 = vector.broadcast %cst_42 : f32 to vector<1x128xf32>
      %c0_43 = arith.constant 0 : index
      %c0_44 = arith.constant 0 : index
      %42 = vector.load %arg11[%c0_43, %c0_44] : memref<1x128xf32, #tpu.memory_space<vmem>>, vector<1x128xf32>
      tpu.vector_store %arg11[%c0_43, %c0_44], %41 {strides = array<i32>} : memref<1x128xf32, #tpu.memory_space<vmem>>, vector<1x128xf32>,
    } else {
    }
    %c0 = arith.constant 0 : index
    %c0_1 = arith.constant 0 : index
    %3 = vector.load %arg2[%c0, %c0_1] : memref<512x128xbf16, #tpu.memory_space<vmem>>, vector<512x128xbf16>
    %c0_2 = arith.constant 0 : index
    %c0_3 = arith.constant 0 : index
    %4 = vector.load %arg3[%c0_2, %c0_3] : memref<128x128xbf16, #tpu.memory_space<vmem>>, vector<128x128xbf16>
    %cst = arith.constant dense<0.000000e+00> : vector<512x128xf32>
    %5 = tpu.matmul %3, %4, %cst {dimension_numbers = #tpu.dot_dimension_numbers<[1], [0], [0], [1], [0, 0, 1, 1], [], []>} : vector<512x128xbf16>, vector<128x128xbf16>, vector<512x128xf32> -> vector<512x128xf32>
    %c0_4 = arith.constant 0 : index
    %c0_5 = arith.constant 0 : index
    %6 = vector.load %arg4[%c0_4, %c0_5] : memref<512x128xbf16, #tpu.memory_space<vmem>>, vector<512x128xbf16>
    %c0_6 = arith.constant 0 : index
    %c0_7 = arith.constant 0 : index
    %7 = vector.load %arg5[%c0_6, %c0_7] : memref<128x128xbf16, #tpu.memory_space<vmem>>, vector<128x128xbf16>
    %cst_8 = arith.constant dense<0.000000e+00> : vector<512x128xf32>
    %8 = tpu.matmul %6, %7, %cst_8 {dimension_numbers = #tpu.dot_dimension_numbers<[1], [0], [0], [1], [0, 0, 1, 1], [], []>} : vector<512x128xbf16>, vector<128x128xbf16>, vector<512x128xf32> -> vector<512x128xf32>
    %9 = arith.truncf %5 : vector<512x128xf32> to vector<512x128xbf16>
    %c0_9 = arith.constant 0 : index
    %c0_10 = arith.constant 0 : index
    %10 = vector.load %arg6[%c0_9, %c0_10] : memref<512x128xbf16, #tpu.memory_space<vmem>>, vector<512x128xbf16>
    tpu.vector_store %arg6[%c0_9, %c0_10], %9 {strides = array<i32>} : memref<512x128xbf16, #tpu.memory_space<vmem>>, vector<512x128xbf16>,
    %11 = arith.truncf %8 : vector<512x128xf32> to vector<512x128xbf16>
    %c0_11 = arith.constant 0 : index
    %c0_12 = arith.constant 0 : index
    %12 = vector.load %arg7[%c0_11, %c0_12] : memref<512x128xbf16, #tpu.memory_space<vmem>>, vector<512x128xbf16>
    tpu.vector_store %arg7[%c0_11, %c0_12], %11 {strides = array<i32>} : memref<512x128xbf16, #tpu.memory_space<vmem>>, vector<512x128xbf16>,
    %c0_13 = arith.constant 0 : index
    %c0_14 = arith.constant 0 : index
    %13 = vector.load %arg8[%c0_13, %c0_14] : memref<1x128xf32, #tpu.memory_space<vmem>>, vector<1x128xf32>
    %cst_15 = arith.constant dense<0.000000e+00> : vector<128xf32>
    %14 = vector.multi_reduction <add>, %5, %cst_15 [0] : vector<512x128xf32> to vector<128xf32>
    %15 = vector.shape_cast %14 : vector<128xf32> to vector<1x128xf32>
    %16 = arith.addf %13, %15 : vector<1x128xf32>
    %c0_16 = arith.constant 0 : index
    %c0_17 = arith.constant 0 : index
    %17 = vector.load %arg8[%c0_16, %c0_17] : memref<1x128xf32, #tpu.memory_space<vmem>>, vector<1x128xf32>
    tpu.vector_store %arg8[%c0_16, %c0_17], %16 {strides = array<i32>} : memref<1x128xf32, #tpu.memory_space<vmem>>, vector<1x128xf32>,
    %c0_18 = arith.constant 0 : index
    %c0_19 = arith.constant 0 : index
    %18 = vector.load %arg9[%c0_18, %c0_19] : memref<1x128xf32, #tpu.memory_space<vmem>>, vector<1x128xf32>
    %19 = arith.mulf %5, %5 : vector<512x128xf32>
    %cst_20 = arith.constant dense<0.000000e+00> : vector<128xf32>
    %20 = vector.multi_reduction <add>, %19, %cst_20 [0] : vector<512x128xf32> to vector<128xf32>
    %21 = vector.shape_cast %20 : vector<128xf32> to vector<1x128xf32>
    %22 = arith.addf %18, %21 : vector<1x128xf32>
    %c0_21 = arith.constant 0 : index
    %c0_22 = arith.constant 0 : index
    %23 = vector.load %arg9[%c0_21, %c0_22] : memref<1x128xf32, #tpu.memory_space<vmem>>, vector<1x128xf32>
    tpu.vector_store %arg9[%c0_21, %c0_22], %22 {strides = array<i32>} : memref<1x128xf32, #tpu.memory_space<vmem>>, vector<1x128xf32>,
    %c0_23 = arith.constant 0 : index
    %c0_24 = arith.constant 0 : index
    %24 = vector.load %arg10[%c0_23, %c0_24] : memref<1x128xf32, #tpu.memory_space<vmem>>, vector<1x128xf32>
    %cst_25 = arith.constant dense<0.000000e+00> : vector<128xf32>
    %25 = vector.multi_reduction <add>, %8, %cst_25 [0] : vector<512x128xf32> to vector<128xf32>
    %26 = vector.shape_cast %25 : vector<128xf32> to vector<1x128xf32>
    %27 = arith.addf %24, %26 : vector<1x128xf32>
    %c0_26 = arith.constant 0 : index
    %c0_27 = arith.constant 0 : index
    %28 = vector.load %arg10[%c0_26, %c0_27] : memref<1x128xf32, #tpu.memory_space<vmem>>, vector<1x128xf32>
    tpu.vector_store %arg10[%c0_26, %c0_27], %27 {strides = array<i32>} : memref<1x128xf32, #tpu.memory_space<vmem>>, vector<1x128xf32>,
    %c0_28 = arith.constant 0 : index
    %c0_29 = arith.constant 0 : index
    %29 = vector.load %arg11[%c0_28, %c0_29] : memref<1x128xf32, #tpu.memory_space<vmem>>, vector<1x128xf32>
    %30 = arith.mulf %8, %8 : vector<512x128xf32>
    %cst_30 = arith.constant dense<0.000000e+00> : vector<128xf32>
    %31 = vector.multi_reduction <add>, %30, %cst_30 [0] : vector<512x128xf32> to vector<128xf32>
    %32 = vector.shape_cast %31 : vector<128xf32> to vector<1x128xf32>
    %33 = arith.addf %29, %32 : vector<1x128xf32>
    %c0_31 = arith.constant 0 : index
    %c0_32 = arith.constant 0 : index
    %34 = vector.load %arg11[%c0_31, %c0_32] : memref<1x128xf32, #tpu.memory_space<vmem>>, vector<1x128xf32>
    tpu.vector_store %arg11[%c0_31, %c0_32], %33 {strides = array<i32>} : memref<1x128xf32, #tpu.memory_space<vmem>>, vector<1x128xf32>,
    return
  }
  func.func @transform_0(%arg0: i32, %arg1: i32) -> (i32, i32) {
    %c0_i32 = arith.constant 0 : i32
    %c0_i32_0 = arith.constant 0 : i32
    return %arg1, %c0_i32 : i32, i32
  }
  func.func @transform_1(%arg0: i32, %arg1: i32) -> (i32, i32) {
    %c0_i32 = arith.constant 0 : i32
    %c0_i32_0 = arith.constant 0 : i32
    return %c0_i32, %arg0 : i32, i32
  }
  func.func @transform_2(%arg0: i32, %arg1: i32) -> (i32, i32) {
    %c0_i32 = arith.constant 0 : i32
    %c0_i32_0 = arith.constant 0 : i32
    return %arg1, %c0_i32 : i32, i32
  }
  func.func @transform_3(%arg0: i32, %arg1: i32) -> (i32, i32) {
    %c0_i32 = arith.constant 0 : i32
    %c0_i32_0 = arith.constant 0 : i32
    return %c0_i32, %arg0 : i32, i32
  }
  func.func @transform_4(%arg0: i32, %arg1: i32) -> (i32, i32) {
    %c0_i32 = arith.constant 0 : i32
    return %arg1, %arg0 : i32, i32
  }
  func.func @transform_5(%arg0: i32, %arg1: i32) -> (i32, i32) {
    %c0_i32 = arith.constant 0 : i32
    return %arg1, %arg0 : i32, i32
  }
  func.func @transform_6(%arg0: i32, %arg1: i32) -> (i32, i32) {
    %c0_i32 = arith.constant 0 : i32
    %c0_i32_0 = arith.constant 0 : i32
    return %c0_i32, %arg0 : i32, i32
  }
  func.func @transform_7(%arg0: i32, %arg1: i32) -> (i32, i32) {
    %c0_i32 = arith.constant 0 : i32
    %c0_i32_0 = arith.constant 0 : i32
    return %c0_i32, %arg0 : i32, i32
  }
  func.func @transform_8(%arg0: i32, %arg1: i32) -> (i32, i32) {
    %c0_i32 = arith.constant 0 : i32
    %c0_i32_0 = arith.constant 0 : i32
    return %c0_i32, %arg0 : i32, i32
  }
  func.func @transform_9(%arg0: i32, %arg1: i32) -> (i32, i32) {
    %c0_i32 = arith.constant 0 : i32
    %c0_i32_0 = arith.constant 0 : i32
    return %c0_i32, %arg0 : i32, i32
  }
}

module attributes {stable_mosaic.version = 11 : i64} {
  func.func @_bn_proj_add_relu_kernel(%arg0: i32, %arg1: i32, %arg2: memref<512x128xbf16, #tpu.memory_space<vmem>>, %arg3: memref<1x128xf32, #tpu.memory_space<vmem>>, %arg4: memref<512x128xbf16, #tpu.memory_space<vmem>>, %arg5: memref<1x128xf32, #tpu.memory_space<vmem>>, %arg6: memref<1x128xf32, #tpu.memory_space<vmem>>, %arg7: memref<512x128xf32, #tpu.memory_space<vmem>>) attributes {dimension_semantics = [#tpu.dimension_semantics<parallel>, #tpu.dimension_semantics<parallel>], iteration_bounds = array<i64: 1, 1>, scalar_prefetch = 0 : i64, scratch_operands = 0 : i64, tpu.core_type = #tpu.core_type<tc>, window_params = [{transform_indices = @transform_0, window_bounds = array<i64: 512, 128>}, {transform_indices = @transform_1, window_bounds = array<i64: 1, 128>}, {transform_indices = @transform_2, window_bounds = array<i64: 512, 128>}, {transform_indices = @transform_3, window_bounds = array<i64: 1, 128>}, {transform_indices = @transform_4, window_bounds = array<i64: 1, 128>}, {transform_indices = @transform_5, window_bounds = array<i64: 512, 128>}]} {
    %c0 = arith.constant 0 : index
    %c0_0 = arith.constant 0 : index
    %0 = vector.load %arg2[%c0, %c0_0] : memref<512x128xbf16, #tpu.memory_space<vmem>>, vector<512x128xbf16>
    %1 = arith.extf %0 : vector<512x128xbf16> to vector<512x128xf32>
    %c0_1 = arith.constant 0 : index
    %c0_2 = arith.constant 0 : index
    %2 = vector.load %arg3[%c0_1, %c0_2] : memref<1x128xf32, #tpu.memory_space<vmem>>, vector<1x128xf32>
    %3 = vector.broadcast %2 : vector<1x128xf32> to vector<512x128xf32>
    %4 = arith.mulf %1, %3 : vector<512x128xf32>
    %c0_3 = arith.constant 0 : index
    %c0_4 = arith.constant 0 : index
    %5 = vector.load %arg4[%c0_3, %c0_4] : memref<512x128xbf16, #tpu.memory_space<vmem>>, vector<512x128xbf16>
    %6 = arith.extf %5 : vector<512x128xbf16> to vector<512x128xf32>
    %c0_5 = arith.constant 0 : index
    %c0_6 = arith.constant 0 : index
    %7 = vector.load %arg5[%c0_5, %c0_6] : memref<1x128xf32, #tpu.memory_space<vmem>>, vector<1x128xf32>
    %8 = vector.broadcast %7 : vector<1x128xf32> to vector<512x128xf32>
    %9 = arith.mulf %6, %8 : vector<512x128xf32>
    %10 = arith.addf %4, %9 : vector<512x128xf32>
    %c0_7 = arith.constant 0 : index
    %c0_8 = arith.constant 0 : index
    %11 = vector.load %arg6[%c0_7, %c0_8] : memref<1x128xf32, #tpu.memory_space<vmem>>, vector<1x128xf32>
    %12 = vector.broadcast %11 : vector<1x128xf32> to vector<512x128xf32>
    %13 = arith.addf %10, %12 : vector<512x128xf32>
    %cst = arith.constant 0.000000e+00 : f32
    %14 = vector.broadcast %cst : f32 to vector<512x128xf32>
    %15 = arith.maximumf %13, %14 : vector<512x128xf32>
    %c0_9 = arith.constant 0 : index
    %c0_10 = arith.constant 0 : index
    %16 = vector.load %arg7[%c0_9, %c0_10] : memref<512x128xf32, #tpu.memory_space<vmem>>, vector<512x128xf32>
    tpu.vector_store %arg7[%c0_9, %c0_10], %15 {strides = array<i32>} : memref<512x128xf32, #tpu.memory_space<vmem>>, vector<512x128xf32>,
    return
  }
  func.func @transform_0(%arg0: i32, %arg1: i32) -> (i32, i32) {
    %c0_i32 = arith.constant 0 : i32
    return %arg1, %arg0 : i32, i32
  }
  func.func @transform_1(%arg0: i32, %arg1: i32) -> (i32, i32) {
    %c0_i32 = arith.constant 0 : i32
    %c0_i32_0 = arith.constant 0 : i32
    return %c0_i32, %arg0 : i32, i32
  }
  func.func @transform_2(%arg0: i32, %arg1: i32) -> (i32, i32) {
    %c0_i32 = arith.constant 0 : i32
    return %arg1, %arg0 : i32, i32
  }
  func.func @transform_3(%arg0: i32, %arg1: i32) -> (i32, i32) {
    %c0_i32 = arith.constant 0 : i32
    %c0_i32_0 = arith.constant 0 : i32
    return %c0_i32, %arg0 : i32, i32
  }
  func.func @transform_4(%arg0: i32, %arg1: i32) -> (i32, i32) {
    %c0_i32 = arith.constant 0 : i32
    %c0_i32_0 = arith.constant 0 : i32
    return %c0_i32, %arg0 : i32, i32
  }
  func.func @transform_5(%arg0: i32, %arg1: i32) -> (i32, i32) {
    %c0_i32 = arith.constant 0 : i32
    return %arg1, %arg0 : i32, i32
  }
}

</mosaic_0001>

<bundles_post_ra>
// kernel: residual_block_forward.5
= control target key start
LH: loop header
LB: loop body
LE: loop exit
PB: predicated region body
PF: predicated region fallthrough
CT: control target
= control target key end

     0   :  { %s1502_s0 = inlined_call_operand.vmem [shape: bf16[512,128], index: 0, kind: input, shape index: {}]   ;;  %s1503_s1 = inlined_call_operand.vmem [shape: f32[1,128], index: 1, kind: input, shape index: {}]   ;;  %s1504_s2 = inlined_call_operand.vmem [shape: f32[1,128], index: 2, kind: input, shape index: {}]   ;;  %s1505_s3 = inlined_call_operand.vmem [shape: bf16[512,128], index: 3, kind: output, shape index: {}]  }
   0x1   :  { %v803_v0 = vld [vmem:[%s1502_s0] sm:$0xff]   ;;  %v1090_v4 = vld [vmem:[%s1502_s0 + $0x8] sm:$0xff]   ;;  %v1091_v5 = vld [vmem:[%s1502_s0 + $0x10] sm:$0xff]  }
   0x2   :  { %v1178_v1 = vld [vmem:[%s1503_s1] ss:$0 sm:$0xff]  ;;  %v804_v2 = vunpack.c.l.bf16 %v803_v0  ;;  %v805_v3 = vunpack.c.h.bf16 %v803_v0  ;;  %v1092_v6 = vld [vmem:[%s1502_s0 + $0x18] sm:$0xff]   ;;  %v808_v8 = vunpack.c.l.bf16 %v1090_v4  ;;  %v809_v9 = vunpack.c.h.bf16 %v1090_v4  ;;  %v1094_v33 = vld [vmem:[%s1502_s0 + $0x28] sm:$0xff]  }
   0x3   :  { %v1192_v7 = vld [vmem:[%s1504_s2] ss:$0 sm:$0xff]  ;;  %v812_v10 = vunpack.c.l.bf16 %v1091_v5  ;;  %v813_v11 = vunpack.c.h.bf16 %v1091_v5  ;;  %v816_v14 = vunpack.c.l.bf16 %v1092_v6  ;;  %v817_v15 = vunpack.c.h.bf16 %v1092_v6  ;;  %v1095_v38 = vld [vmem:[%s1502_s0 + $0x30] sm:$0xff]   ;;  %v1096_v43 = vld [vmem:[%s1502_s0 + $0x38] sm:$0xff]  }
   0x4   :  { %v149_v12 = vmul.f32 %v804_v2, %v1178_v1  ;;  %v150_v13 = vmul.f32 %v805_v3, %v1178_v1  ;;  %v151_v16 = vmul.f32 %v808_v8, %v1178_v1  ;;  %v152_v17 = vmul.f32 %v809_v9, %v1178_v1  ;;  %v1093_v28 = vld [vmem:[%s1502_s0 + $0x20] sm:$0xff]  }
   0x5   :  { %v153_v18 = vmul.f32 %v812_v10, %v1178_v1  ;;  %v154_v19 = vmul.f32 %v813_v11, %v1178_v1  ;;  %v155_v22 = vmul.f32 %v816_v14, %v1178_v1  ;;  %v156_v23 = vmul.f32 %v817_v15, %v1178_v1  ;;  %v1097_v0 = vld [vmem:[%s1502_s0 + $0x40] sm:$0xff]   ;;  %v1098_v11 = vld [vmem:[%s1502_s0 + $0x48] sm:$0xff]  }
   0x6   :  { %v220_v20 = vadd.f32 %v1192_v7, %v149_v12  ;;  %v221_v21 = vadd.f32 %v1192_v7, %v150_v13  ;;  %v222_v24 = vadd.f32 %v1192_v7, %v151_v16  ;;  %v223_v25 = vadd.f32 %v1192_v7, %v152_v17  ;;  %v1099_v16 = vld [vmem:[%s1502_s0 + $0x50] sm:$0xff]  }
   0x7   :  { %v224_v26 = vadd.f32 %v1192_v7, %v153_v18  ;;  %v225_v27 = vadd.f32 %v1192_v7, %v154_v19  ;;  %v226_v31 = vadd.f32 %v1192_v7, %v155_v22  ;;  %v227_v32 = vadd.f32 %v1192_v7, %v156_v23 }
   0x8   :  { %v284_v29 = vmax.f32 %v220_v20, 0.0  ;;  %v285_v30 = vmax.f32 %v221_v21, 0.0  ;;  %v286_v34 = vmax.f32 %v222_v24, 0.0  ;;  %v287_v35 = vmax.f32 %v223_v25, 0.0  ;;  %v1100_v25 = vld [vmem:[%s1502_s0 + $0x58] sm:$0xff]  }
   0x9   :  { %v288_v36 = vmax.f32 %v224_v26, 0.0  ;;  %v289_v37 = vmax.f32 %v225_v27, 0.0  ;;  %v290_v40 = vmax.f32 %v226_v31, 0.0  ;;  %v291_v41 = vmax.f32 %v227_v32, 0.0 }
   0xa   :  { %v933_v39 = vpack.c.bf16 %v285_v30, %v284_v29  ;;  %v820_v42 = vunpack.c.l.bf16 %v1093_v28  ;;  %v938_v44 = vpack.c.bf16 %v287_v35, %v286_v34  ;;  %v821_v46 = vunpack.c.h.bf16 %v1093_v28 }
   0xb   :  { %v943_v45 = vpack.c.bf16 %v289_v37, %v288_v36  ;;  %v824_v47 = vunpack.c.l.bf16 %v1094_v33  ;;  %v948_v48 = vpack.c.bf16 %v291_v41, %v290_v40  ;;  %v825_v50 = vunpack.c.h.bf16 %v1094_v33 }
   0xc   :  { %934 = vst [vmem:[%s1505_s3] sm:$0xff] %v933_v39   ;;  %v157_v49 = vmul.f32 %v820_v42, %v1178_v1  ;;  %v828_v51 = vunpack.c.l.bf16 %v1095_v38  ;;  %1121 = vst [vmem:[%s1505_s3 + $0x8] sm:$0xff] %v938_v44   ;;  %v158_v52 = vmul.f32 %v821_v46, %v1178_v1  ;;  %v829_v54 = vunpack.c.h.bf16 %v1095_v38  ;;  %v1101_v38 = vld [vmem:[%s1502_s0 + $0x60] sm:$0xff]  }
   0xd   :  { %1122 = vst [vmem:[%s1505_s3 + $0x10] sm:$0xff] %v943_v45   ;;  %v159_v53 = vmul.f32 %v824_v47, %v1178_v1  ;;  %v832_v55 = vunpack.c.l.bf16 %v1096_v43  ;;  %1123 = vst [vmem:[%s1505_s3 + $0x18] sm:$0xff] %v948_v48   ;;  %v160_v57 = vmul.f32 %v825_v50, %v1178_v1  ;;  %v833_v59 = vunpack.c.h.bf16 %v1096_v43 }
   0xe   :  { %v228_v56 = vadd.f32 %v1192_v7, %v157_v49  ;;  %v161_v58 = vmul.f32 %v828_v51, %v1178_v1  ;;  %v229_v60 = vadd.f32 %v1192_v7, %v158_v52  ;;  %v162_v62 = vmul.f32 %v829_v54, %v1178_v1  ;;  %v1102_v51 = vld [vmem:[%s1502_s0 + $0x68] sm:$0xff]  }
   0xf   :  { %v230_v61 = vadd.f32 %v1192_v7, %v159_v53  ;;  %v163_v63 = vmul.f32 %v832_v55, %v1178_v1  ;;  %v231_v3 = vadd.f32 %v1192_v7, %v160_v57  ;;  %v164_v5 = vmul.f32 %v833_v59, %v1178_v1 }
  0x10   :  { %v292_v2 = vmax.f32 %v228_v56, 0.0  ;;  %v232_v4 = vadd.f32 %v1192_v7, %v161_v58  ;;  %v293_v6 = vmax.f32 %v229_v60, 0.0  ;;  %v233_v9 = vadd.f32 %v1192_v7, %v162_v62  ;;  %v1103_v60 = vld [vmem:[%s1502_s0 + $0x70] sm:$0xff]  }
  0x11   :  { %v294_v8 = vmax.f32 %v230_v61, 0.0  ;;  %v234_v10 = vadd.f32 %v1192_v7, %v163_v63  ;;  %v295_v12 = vmax.f32 %v231_v3, 0.0  ;;  %v235_v14 = vadd.f32 %v1192_v7, %v164_v5 }
  0x12   :  { %v296_v13 = vmax.f32 %v232_v4, 0.0  ;;  %v836_v15 = vunpack.c.l.bf16 %v1097_v0  ;;  %v953_v17 = vpack.c.bf16 %v293_v6, %v292_v2  ;;  %v297_v18 = vmax.f32 %v233_v9, 0.0  ;;  %v1104_v2 = vld [vmem:[%s1502_s0 + $0x78] sm:$0xff]  }
  0x13   :  { %v298_v19 = vmax.f32 %v234_v10, 0.0  ;;  %v837_v20 = vunpack.c.h.bf16 %v1097_v0  ;;  %v958_v21 = vpack.c.bf16 %v295_v12, %v294_v8  ;;  %v299_v22 = vmax.f32 %v235_v14, 0.0  ;;  %v1105_v12 = vld [vmem:[%s1502_s0 + $0x80] sm:$0xff]  }
  0x14   :  { %v165_v23 = vmul.f32 %v836_v15, %v1178_v1  ;;  %v840_v24 = vunpack.c.l.bf16 %v1098_v11  ;;  %1124 = vst [vmem:[%s1505_s3 + $0x20] sm:$0xff] %v953_v17   ;;  %v963_v26 = vpack.c.bf16 %v297_v18, %v296_v13  ;;  %v841_v28 = vunpack.c.h.bf16 %v1098_v11 }
  0x15   :  { %v166_v27 = vmul.f32 %v837_v20, %v1178_v1  ;;  %v844_v29 = vunpack.c.l.bf16 %v1099_v16  ;;  %1125 = vst [vmem:[%s1505_s3 + $0x28] sm:$0xff] %v958_v21   ;;  %v968_v30 = vpack.c.bf16 %v299_v22, %v298_v19  ;;  %v845_v33 = vunpack.c.h.bf16 %v1099_v16 }
  0x16   :  { %v236_v31 = vadd.f32 %v1192_v7, %v165_v23  ;;  %v167_v32 = vmul.f32 %v840_v24, %v1178_v1  ;;  %1126 = vst [vmem:[%s1505_s3 + $0x30] sm:$0xff] %v963_v26   ;;  %v168_v35 = vmul.f32 %v841_v28, %v1178_v1  ;;  %v848_v37 = vunpack.c.l.bf16 %v1100_v25 }
  0x17   :  { %v237_v34 = vadd.f32 %v1192_v7, %v166_v27  ;;  %v169_v36 = vmul.f32 %v844_v29, %v1178_v1  ;;  %1127 = vst [vmem:[%s1505_s3 + $0x38] sm:$0xff] %v968_v30   ;;  %v170_v41 = vmul.f32 %v845_v33, %v1178_v1  ;;  %v849_v42 = vunpack.c.h.bf16 %v1100_v25  ;;  %v1106_v29 = vld [vmem:[%s1502_s0 + $0x88] sm:$0xff]  }
  0x18   :  { %v300_v39 = vmax.f32 %v236_v31, 0.0  ;;  %v238_v40 = vadd.f32 %v1192_v7, %v167_v32  ;;  %v239_v44 = vadd.f32 %v1192_v7, %v168_v35  ;;  %v171_v46 = vmul.f32 %v848_v37, %v1178_v1 }
  0x19   :  { %v301_v43 = vmax.f32 %v237_v34, 0.0  ;;  %v240_v45 = vadd.f32 %v1192_v7, %v169_v36  ;;  %v241_v48 = vadd.f32 %v1192_v7, %v170_v41  ;;  %v172_v49 = vmul.f32 %v849_v42, %v1178_v1  ;;  %v1107_v34 = vld [vmem:[%s1502_s0 + $0x90] sm:$0xff]  }
  0x1a   :  { %v302_v47 = vmax.f32 %v238_v40, 0.0  ;;  %v852_v50 = vunpack.c.l.bf16 %v1101_v38  ;;  %v303_v53 = vmax.f32 %v239_v44, 0.0  ;;  %v242_v55 = vadd.f32 %v1192_v7, %v171_v46 }
  0x1b   :  { %v973_v52 = vpack.c.bf16 %v301_v43, %v300_v39  ;;  %v304_v54 = vmax.f32 %v240_v45, 0.0  ;;  %v305_v56 = vmax.f32 %v241_v48, 0.0  ;;  %v243_v57 = vadd.f32 %v1192_v7, %v172_v49  ;;  %v1108_v43 = vld [vmem:[%s1502_s0 + $0x98] sm:$0xff]  }
  0x1c   :  { %v853_v58 = vunpack.c.h.bf16 %v1101_v38  ;;  %v173_v59 = vmul.f32 %v852_v50, %v1178_v1  ;;  %v978_v61 = vpack.c.bf16 %v303_v53, %v302_v47  ;;  %v306_v62 = vmax.f32 %v242_v55, 0.0 }
  0x1d   :  { %1128 = vst [vmem:[%s1505_s3 + $0x40] sm:$0xff] %v973_v52   ;;  %v856_v63 = vunpack.c.l.bf16 %v1102_v51  ;;  %v857_v0 = vunpack.c.h.bf16 %v1102_v51  ;;  %v983_v3 = vpack.c.bf16 %v305_v56, %v304_v54  ;;  %v307_v4 = vmax.f32 %v243_v57, 0.0  ;;  %v1109_v56 = vld [vmem:[%s1502_s0 + $0xa0] sm:$0xff]  }
  0x1e   :  { %v174_v5 = vmul.f32 %v853_v58, %v1178_v1  ;;  %v244_v6 = vadd.f32 %v1192_v7, %v173_v59  ;;  %1129 = vst [vmem:[%s1505_s3 + $0x48] sm:$0xff] %v978_v61   ;;  %v860_v10 = vunpack.c.l.bf16 %v1103_v60  ;;  %v861_v11 = vunpack.c.h.bf16 %v1103_v60 }
  0x1f   :  { %v175_v8 = vmul.f32 %v856_v63, %v1178_v1  ;;  %v176_v9 = vmul.f32 %v857_v0, %v1178_v1  ;;  %1130 = vst [vmem:[%s1505_s3 + $0x50] sm:$0xff] %v983_v3   ;;  %v988_v13 = vpack.c.bf16 %v307_v4, %v306_v62  ;;  %v864_v16 = vunpack.c.l.bf16 %v1104_v2 }
  0x20   :  { %v245_v14 = vadd.f32 %v1192_v7, %v174_v5  ;;  %v308_v15 = vmax.f32 %v244_v6, 0.0  ;;  %v177_v19 = vmul.f32 %v860_v10, %v1178_v1  ;;  %v178_v20 = vmul.f32 %v861_v11, %v1178_v1 }
  0x21   :  { %v246_v17 = vadd.f32 %v1192_v7, %v175_v8  ;;  %v247_v18 = vadd.f32 %v1192_v7, %v176_v9  ;;  %1131 = vst [vmem:[%s1505_s3 + $0x58] sm:$0xff] %v988_v13   ;;  %v865_v22 = vunpack.c.h.bf16 %v1104_v2  ;;  %v179_v23 = vmul.f32 %v864_v16, %v1178_v1  ;;  %v1110_v2 = vld [vmem:[%s1502_s0 + $0xa8] sm:$0xff]   ;;  %v1111_v16 = vld [vmem:[%s1502_s0 + $0xb0] sm:$0xff]  }
  0x22   :  { %v309_v21 = vmax.f32 %v245_v14, 0.0  ;;  %v868_v24 = vunpack.c.l.bf16 %v1105_v12  ;;  %v248_v27 = vadd.f32 %v1192_v7, %v177_v19  ;;  %v249_v28 = vadd.f32 %v1192_v7, %v178_v20 }
  0x23   :  { %v310_v25 = vmax.f32 %v246_v17, 0.0  ;;  %v311_v26 = vmax.f32 %v247_v18, 0.0  ;;  %v180_v31 = vmul.f32 %v865_v22, %v1178_v1  ;;  %v250_v32 = vadd.f32 %v1192_v7, %v179_v23 }
  0x24   :  { %v993_v30 = vpack.c.bf16 %v309_v21, %v308_v15  ;;  %v869_v33 = vunpack.c.h.bf16 %v1105_v12  ;;  %v312_v36 = vmax.f32 %v248_v27, 0.0  ;;  %v313_v37 = vmax.f32 %v249_v28, 0.0  ;;  %v1112_v21 = vld [vmem:[%s1502_s0 + $0xb8] sm:$0xff]  }
  0x25   :  { %v998_v35 = vpack.c.bf16 %v311_v26, %v310_v25  ;;  %v181_v38 = vmul.f32 %v868_v24, %v1178_v1  ;;  %v251_v39 = vadd.f32 %v1192_v7, %v180_v31  ;;  %v314_v40 = vmax.f32 %v250_v32, 0.0 }
  0x26   :  { %1132 = vst [vmem:[%s1505_s3 + $0x60] sm:$0xff] %v993_v30   ;;  %v182_v41 = vmul.f32 %v869_v33, %v1178_v1  ;;  %v872_v42 = vunpack.c.l.bf16 %v1106_v29  ;;  %v1003_v44 = vpack.c.bf16 %v313_v37, %v312_v36  ;;  %v873_v46 = vunpack.c.h.bf16 %v1106_v29 }
  0x27   :  { %1133 = vst [vmem:[%s1505_s3 + $0x68] sm:$0xff] %v998_v35   ;;  %v252_v45 = vadd.f32 %v1192_v7, %v181_v38  ;;  %v876_v47 = vunpack.c.l.bf16 %v1107_v34  ;;  %v315_v48 = vmax.f32 %v251_v39, 0.0  ;;  %v877_v51 = vunpack.c.h.bf16 %v1107_v34  ;;  %v1113_v34 = vld [vmem:[%s1502_s0 + $0xc0] sm:$0xff]  }
  0x28   :  { %v253_v49 = vadd.f32 %v1192_v7, %v182_v41  ;;  %v183_v50 = vmul.f32 %v872_v42, %v1178_v1  ;;  %1134 = vst [vmem:[%s1505_s3 + $0x70] sm:$0xff] %v1003_v44   ;;  %v184_v53 = vmul.f32 %v873_v46, %v1178_v1  ;;  %v880_v55 = vunpack.c.l.bf16 %v1108_v43 }
  0x29   :  { %v316_v52 = vmax.f32 %v252_v45, 0.0  ;;  %v185_v54 = vmul.f32 %v876_v47, %v1178_v1  ;;  %v1008_v57 = vpack.c.bf16 %v315_v48, %v314_v40  ;;  %v186_v60 = vmul.f32 %v877_v51, %v1178_v1  ;;  %v1114_v47 = vld [vmem:[%s1502_s0 + $0xc8] sm:$0xff]  }
  0x2a   :  { %v317_v58 = vmax.f32 %v253_v49, 0.0  ;;  %v254_v59 = vadd.f32 %v1192_v7, %v183_v50  ;;  %v255_v61 = vadd.f32 %v1192_v7, %v184_v53  ;;  %v881_v63 = vunpack.c.h.bf16 %v1108_v43 }
  0x2b   :  { %v256_v62 = vadd.f32 %v1192_v7, %v185_v54  ;;  %v187_v0 = vmul.f32 %v880_v55, %v1178_v1  ;;  %1135 = vst [vmem:[%s1505_s3 + $0x78] sm:$0xff] %v1008_v57   ;;  %v257_v5 = vadd.f32 %v1192_v7, %v186_v60  ;;  %v884_v6 = vunpack.c.l.bf16 %v1109_v56 }
  0x2c   :  { %v1013_v3 = vpack.c.bf16 %v317_v58, %v316_v52  ;;  %v318_v4 = vmax.f32 %v254_v59, 0.0  ;;  %v319_v8 = vmax.f32 %v255_v61, 0.0  ;;  %v188_v10 = vmul.f32 %v881_v63, %v1178_v1  ;;  %v1115_v52 = vld [vmem:[%s1502_s0 + $0xd0] sm:$0xff]   ;;  %v1116_v61 = vld [vmem:[%s1502_s0 + $0xd8] sm:$0xff]  }
  0x2d   :  { %v320_v9 = vmax.f32 %v256_v62, 0.0  ;;  %v258_v11 = vadd.f32 %v1192_v7, %v187_v0  ;;  %v321_v12 = vmax.f32 %v257_v5, 0.0  ;;  %v885_v13 = vunpack.c.h.bf16 %v1109_v56 }
  0x2e   :  { %1136 = vst [vmem:[%s1505_s3 + $0x80] sm:$0xff] %v1013_v3   ;;  %v189_v14 = vmul.f32 %v884_v6, %v1178_v1  ;;  %v888_v15 = vunpack.c.l.bf16 %v1110_v2  ;;  %v1018_v17 = vpack.c.bf16 %v319_v8, %v318_v4  ;;  %v259_v18 = vadd.f32 %v1192_v7, %v188_v10 }
  0x2f   :  { %v322_v19 = vmax.f32 %v258_v11, 0.0  ;;  %v889_v20 = vunpack.c.h.bf16 %v1110_v2  ;;  %v1023_v22 = vpack.c.bf16 %v321_v12, %v320_v9  ;;  %v190_v23 = vmul.f32 %v885_v13, %v1178_v1  ;;  %v1117_v12 = vld [vmem:[%s1502_s0 + $0xe0] sm:$0xff]  }
  0x30   :  { %v260_v24 = vadd.f32 %v1192_v7, %v189_v14  ;;  %v191_v25 = vmul.f32 %v888_v15, %v1178_v1  ;;  %1137 = vst [vmem:[%s1505_s3 + $0x88] sm:$0xff] %v1018_v17   ;;  %v323_v26 = vmax.f32 %v259_v18, 0.0  ;;  %v892_v28 = vunpack.c.l.bf16 %v1111_v16 }
  0x31   :  { %v192_v27 = vmul.f32 %v889_v20, %v1178_v1  ;;  %v893_v29 = vunpack.c.h.bf16 %v1111_v16  ;;  %1138 = vst [vmem:[%s1505_s3 + $0x90] sm:$0xff] %v1023_v22   ;;  %v261_v30 = vadd.f32 %v1192_v7, %v190_v23  ;;  %v896_v33 = vunpack.c.l.bf16 %v1112_v21 }
  0x32   :  { %v324_v31 = vmax.f32 %v260_v24, 0.0  ;;  %v262_v32 = vadd.f32 %v1192_v7, %v191_v25  ;;  %v1028_v35 = vpack.c.bf16 %v323_v26, %v322_v19  ;;  %v193_v37 = vmul.f32 %v892_v28, %v1178_v1 }
  0x33   :  { %v263_v36 = vadd.f32 %v1192_v7, %v192_v27  ;;  %v194_v38 = vmul.f32 %v893_v29, %v1178_v1  ;;  %v325_v39 = vmax.f32 %v261_v30, 0.0  ;;  %v897_v41 = vunpack.c.h.bf16 %v1112_v21  ;;  %v1118_v21 = vld [vmem:[%s1502_s0 + $0xe8] sm:$0xff]  }
  0x34   :  { %v326_v40 = vmax.f32 %v262_v32, 0.0  ;;  %v195_v42 = vmul.f32 %v896_v33, %v1178_v1  ;;  %1139 = vst [vmem:[%s1505_s3 + $0x98] sm:$0xff] %v1028_v35   ;;  %v264_v44 = vadd.f32 %v1192_v7, %v193_v37  ;;  %v900_v46 = vunpack.c.l.bf16 %v1113_v34 }
  0x35   :  { %v327_v43 = vmax.f32 %v263_v36, 0.0  ;;  %v265_v45 = vadd.f32 %v1192_v7, %v194_v38  ;;  %v1033_v48 = vpack.c.bf16 %v325_v39, %v324_v31  ;;  %v196_v49 = vmul.f32 %v897_v41, %v1178_v1  ;;  %v1120_v39 = vld [vmem:[%s1502_s0 + $0xf8] sm:$0xff]  }
  0x36   :  { %v266_v50 = vadd.f32 %v1192_v7, %v195_v42  ;;  %v901_v51 = vunpack.c.h.bf16 %v1113_v34  ;;  %v328_v54 = vmax.f32 %v264_v44, 0.0  ;;  %v197_v56 = vmul.f32 %v900_v46, %v1178_v1  ;;  %v1119_v34 = vld [vmem:[%s1502_s0 + $0xf0] sm:$0xff]  }
  0x37   :  { %v1038_v53 = vpack.c.bf16 %v327_v43, %v326_v40  ;;  %v329_v55 = vmax.f32 %v265_v45, 0.0  ;;  %1140 = vst [vmem:[%s1505_s3 + $0xa0] sm:$0xff] %v1033_v48   ;;  %v267_v57 = vadd.f32 %v1192_v7, %v196_v49  ;;  %v904_v60 = vunpack.c.l.bf16 %v1114_v47 }
  0x38   :  { %v330_v58 = vmax.f32 %v266_v50, 0.0  ;;  %v198_v59 = vmul.f32 %v901_v51, %v1178_v1  ;;  %v268_v63 = vadd.f32 %v1192_v7, %v197_v56  ;;  %v905_v0 = vunpack.c.h.bf16 %v1114_v47 }
  0x39   :  { %1141 = vst [vmem:[%s1505_s3 + $0xa8] sm:$0xff] %v1038_v53   ;;  %v1043_v62 = vpack.c.bf16 %v329_v55, %v328_v54  ;;  %v908_v2 = vunpack.c.l.bf16 %v1115_v52  ;;  %v331_v3 = vmax.f32 %v267_v57, 0.0  ;;  %v199_v5 = vmul.f32 %v904_v60, %v1178_v1 }
  0x3a   :  { %v269_v4 = vadd.f32 %v1192_v7, %v198_v59  ;;  %v909_v6 = vunpack.c.h.bf16 %v1115_v52  ;;  %v332_v8 = vmax.f32 %v268_v63, 0.0  ;;  %v200_v9 = vmul.f32 %v905_v0, %v1178_v1 }
  0x3b   :  { %1142 = vst [vmem:[%s1505_s3 + $0xb0] sm:$0xff] %v1043_v62   ;;  %v201_v10 = vmul.f32 %v908_v2, %v1178_v1  ;;  %v912_v11 = vunpack.c.l.bf16 %v1116_v61  ;;  %v1048_v13 = vpack.c.bf16 %v331_v3, %v330_v58  ;;  %v270_v15 = vadd.f32 %v1192_v7, %v199_v5 }
  0x3c   :  { %v333_v14 = vmax.f32 %v269_v4, 0.0  ;;  %v202_v16 = vmul.f32 %v909_v6, %v1178_v1  ;;  %v271_v17 = vadd.f32 %v1192_v7, %v200_v9  ;;  %v913_v19 = vunpack.c.h.bf16 %v1116_v61 }
  0x3d   :  { %v272_v18 = vadd.f32 %v1192_v7, %v201_v10  ;;  %v203_v20 = vmul.f32 %v912_v11, %v1178_v1  ;;  %1143 = vst [vmem:[%s1505_s3 + $0xb8] sm:$0xff] %v1048_v13   ;;  %v334_v23 = vmax.f32 %v270_v15, 0.0  ;;  %v916_v25 = vunpack.c.l.bf16 %v1117_v12 }
  0x3e   :  { %v1053_v22 = vpack.c.bf16 %v333_v14, %v332_v8  ;;  %v273_v24 = vadd.f32 %v1192_v7, %v202_v16  ;;  %v335_v26 = vmax.f32 %v271_v17, 0.0  ;;  %v204_v28 = vmul.f32 %v913_v19, %v1178_v1 }
  0x3f   :  { %v336_v27 = vmax.f32 %v272_v18, 0.0  ;;  %v274_v29 = vadd.f32 %v1192_v7, %v203_v20  ;;  %v917_v31 = vunpack.c.h.bf16 %v1117_v12  ;;  %v205_v32 = vmul.f32 %v916_v25, %v1178_v1 }
  0x40   :  { %1144 = vst [vmem:[%s1505_s3 + $0xc0] sm:$0xff] %v1053_v22   ;;  %v337_v30 = vmax.f32 %v273_v24, 0.0  ;;  %v920_v33 = vunpack.c.l.bf16 %v1118_v21  ;;  %v1058_v35 = vpack.c.bf16 %v335_v26, %v334_v23  ;;  %v275_v36 = vadd.f32 %v1192_v7, %v204_v28 }
  0x41   :  { %v338_v37 = vmax.f32 %v274_v29, 0.0  ;;  %v921_v38 = vunpack.c.h.bf16 %v1118_v21  ;;  %v206_v41 = vmul.f32 %v917_v31, %v1178_v1  ;;  %v276_v42 = vadd.f32 %v1192_v7, %v205_v32 }
  0x42   :  { %v1063_v40 = vpack.c.bf16 %v337_v30, %v336_v27  ;;  %v207_v43 = vmul.f32 %v920_v33, %v1178_v1  ;;  %1145 = vst [vmem:[%s1505_s3 + $0xc8] sm:$0xff] %v1058_v35   ;;  %v339_v44 = vmax.f32 %v275_v36, 0.0  ;;  %v924_v46 = vunpack.c.l.bf16 %v1119_v34 }
  0x43   :  { %v208_v45 = vmul.f32 %v921_v38, %v1178_v1  ;;  %v925_v47 = vunpack.c.h.bf16 %v1119_v34  ;;  %v277_v48 = vadd.f32 %v1192_v7, %v206_v41  ;;  %v340_v49 = vmax.f32 %v276_v42, 0.0 }
  0x44   :  { %1146 = vst [vmem:[%s1505_s3 + $0xd0] sm:$0xff] %v1063_v40   ;;  %v278_v50 = vadd.f32 %v1192_v7, %v207_v43  ;;  %v928_v51 = vunpack.c.l.bf16 %v1120_v39  ;;  %v1068_v52 = vpack.c.bf16 %v339_v44, %v338_v37  ;;  %v209_v54 = vmul.f32 %v924_v46, %v1178_v1 }
  0x45   :  { %v279_v53 = vadd.f32 %v1192_v7, %v208_v45  ;;  %v210_v55 = vmul.f32 %v925_v47, %v1178_v1  ;;  %v341_v56 = vmax.f32 %v277_v48, 0.0  ;;  %v929_v58 = vunpack.c.h.bf16 %v1120_v39 }
  0x46   :  { %v342_v57 = vmax.f32 %v278_v50, 0.0  ;;  %v211_v59 = vmul.f32 %v928_v51, %v1178_v1  ;;  %1147 = vst [vmem:[%s1505_s3 + $0xd8] sm:$0xff] %v1068_v52   ;;  %v280_v61 = vadd.f32 %v1192_v7, %v209_v54 }
  0x47   :  { %v343_v60 = vmax.f32 %v279_v53, 0.0  ;;  %v281_v62 = vadd.f32 %v1192_v7, %v210_v55  ;;  %v1073_v63 = vpack.c.bf16 %v341_v56, %v340_v49  ;;  %v212_v0 = vmul.f32 %v929_v58, %v1178_v1 }
  0x48   :  { %v282_v2 = vadd.f32 %v1192_v7, %v211_v59  ;;  %v344_v4 = vmax.f32 %v280_v61, 0.0 }
  0x49   :  { %v1078_v3 = vpack.c.bf16 %v343_v60, %v342_v57  ;;  %v345_v5 = vmax.f32 %v281_v62, 0.0  ;;  %1148 = vst [vmem:[%s1505_s3 + $0xe0] sm:$0xff] %v1073_v63   ;;  %v283_v6 = vadd.f32 %v1192_v7, %v212_v0 }
  0x4a   :  { %v346_v8 = vmax.f32 %v282_v2, 0.0 }
  0x4b   :  { %1149 = vst [vmem:[%s1505_s3 + $0xe8] sm:$0xff] %v1078_v3   ;;  %v1083_v9 = vpack.c.bf16 %v345_v5, %v344_v4  ;;  %v347_v10 = vmax.f32 %v283_v6, 0.0 }
  0x4d   :  { %1150 = vst [vmem:[%s1505_s3 + $0xf0] sm:$0xff] %v1083_v9   ;;  %v1088_v1 = vpack.c.bf16 %v347_v10, %v346_v8 }
  0x4f   :  { %1151 = vst [vmem:[%s1505_s3 + $0xf8] sm:$0xff] %v1088_v1  }

// kernel: residual_block_forward.4
= control target key start
LH: loop header
LB: loop body
LE: loop exit
PB: predicated region body
PF: predicated region fallthrough
CT: control target
= control target key end

     0   :  { %v1706_v40 = vmov 0.0   ;;  %s2158_s1 = inlined_call_operand.vmem [shape: bf16[128,128], index: 1, kind: input, shape index: {}]   ;;  %s2159_s0 = inlined_call_operand.vmem [shape: bf16[512,128], index: 0, kind: input, shape index: {}]   ;;  %s2160_s3 = inlined_call_operand.vmem [shape: f32[1,128], index: 3, kind: output, shape index: {1}]   ;;  %s2161_s4 = inlined_call_operand.vmem [shape: f32[1,128], index: 4, kind: output, shape index: {2}]   ;;  %s2162_s2 = inlined_call_operand.vmem [shape: bf16[512,128], index: 2, kind: output, shape index: {0}]  }
   0x1   :  { %v1666_v0 = vld [vmem:[%s2158_s1] sm:$0xff]   ;;  %v1667_v1 = vld [vmem:[%s2158_s1 + $0x8] sm:$0xff]   ;;  %v1668_v2 = vld [vmem:[%s2158_s1 + $0x10] sm:$0xff]   ;;  %19 = vst [vmem:[%s2160_s3] sm:$0x1] %v1706_v40 }
   0x2   :  { %1569 = vmatprep.subr.bf16.mxu0 %v1666_v0  ;;  %1649 = vmatprep.subr.bf16.mxu1 %v1666_v0  ;;  %v1669_v3 = vld [vmem:[%s2158_s1 + $0x18] sm:$0xff]   ;;  %v1674_v4 = vld [vmem:[%s2159_s0] sm:$0xff]   ;;  %v1671_v6 = vld [vmem:[%s2158_s1 + $0x28] sm:$0xff]   ;;  %20 = vst [vmem:[%s2161_s4] sm:$0x1] %v1706_v40 }
   0x3   :  { %1570 = vmatpush3.bf16.msra.mxu0 %v1666_v0  ;;  %1657 = vmatpush3.bf16.msra.mxu1 %v1666_v0  ;;  %v1670_v5 = vld [vmem:[%s2158_s1 + $0x20] sm:$0xff]   ;;  %v1672_v7 = vld [vmem:[%s2158_s1 + $0x30] sm:$0xff]   ;;  %v1673_v8 = vld [vmem:[%s2158_s1 + $0x38] sm:$0xff]  }
   0x4   :  { %1571 = vmatprep.subr.bf16.mxu0 %v1667_v1  ;;  %1650 = vmatprep.subr.bf16.mxu1 %v1667_v1  ;;  %v1690_v9 = vld [vmem:[%s2159_s0 + $0x80] sm:$0xff]   ;;  %v1675_v10 = vld [vmem:[%s2159_s0 + $0x8] sm:$0xff]   ;;  %v1676_v11 = vld [vmem:[%s2159_s0 + $0x10] sm:$0xff]  }
   0x5   :  { %1585 = vmatprep.mubr.bf16.mxu0 %v1674_v4  ;;  %1617 = vmatprep.mubr.bf16.mxu1 %v1690_v9  ;;  %v1691_v12 = vld [vmem:[%s2159_s0 + $0x88] sm:$0xff]   ;;  %v1692_v13 = vld [vmem:[%s2159_s0 + $0x90] sm:$0xff]   ;;  %v1677_v14 = vld [vmem:[%s2159_s0 + $0x18] sm:$0xff]  }
   0x6   :  { %v1678_v15 = vld [vmem:[%s2159_s0 + $0x20] sm:$0xff]   ;;  %v1693_v16 = vld [vmem:[%s2159_s0 + $0x98] sm:$0xff]   ;;  %v1679_v18 = vld [vmem:[%s2159_s0 + $0x28] sm:$0xff]  }
   0x7   :  { %1572 = vmatpush3.bf16.msra.mxu0 %v1667_v1  ;;  %1658 = vmatpush3.bf16.msra.mxu1 %v1667_v1  ;;  %v1694_v17 = vld [vmem:[%s2159_s0 + $0xa0] sm:$0xff]   ;;  %v1695_v19 = vld [vmem:[%s2159_s0 + $0xa8] sm:$0xff]   ;;  %v1680_v20 = vld [vmem:[%s2159_s0 + $0x30] sm:$0xff]  }
   0x8   :  { %1573 = vmatprep.subr.bf16.mxu0 %v1668_v2  ;;  %1651 = vmatprep.subr.bf16.mxu1 %v1668_v2  ;;  %v1696_v21 = vld [vmem:[%s2159_s0 + $0xb0] sm:$0xff]   ;;  %v1681_v22 = vld [vmem:[%s2159_s0 + $0x38] sm:$0xff]   ;;  %v1682_v24 = vld [vmem:[%s2159_s0 + $0x40] sm:$0xff]  }
   0x9   :  { %v1697_v23 = vld [vmem:[%s2159_s0 + $0xb8] sm:$0xff]   ;;  %v1698_v25 = vld [vmem:[%s2159_s0 + $0xc0] sm:$0xff]   ;;  %v1683_v26 = vld [vmem:[%s2159_s0 + $0x48] sm:$0xff]  }
   0xa   :  { %v1699_v27 = vld [vmem:[%s2159_s0 + $0xc8] sm:$0xff]   ;;  %v1684_v28 = vld [vmem:[%s2159_s0 + $0x50] sm:$0xff]   ;;  %v1685_v30 = vld [vmem:[%s2159_s0 + $0x58] sm:$0xff]  }
   0xb   :  { %1574 = vmatpush3.bf16.msra.mxu0 %v1668_v2  ;;  %1659 = vmatpush3.bf16.msra.mxu1 %v1668_v2  ;;  %v1700_v29 = vld [vmem:[%s2159_s0 + $0xd0] sm:$0xff]   ;;  %v1701_v31 = vld [vmem:[%s2159_s0 + $0xd8] sm:$0xff]   ;;  %v1686_v32 = vld [vmem:[%s2159_s0 + $0x60] sm:$0xff]  }
   0xc   :  { %1575 = vmatprep.subr.bf16.mxu0 %v1669_v3  ;;  %1652 = vmatprep.subr.bf16.mxu1 %v1669_v3  ;;  %v1702_v33 = vld [vmem:[%s2159_s0 + $0xe0] sm:$0xff]   ;;  %v1687_v34 = vld [vmem:[%s2159_s0 + $0x68] sm:$0xff]   ;;  %v1688_v36 = vld [vmem:[%s2159_s0 + $0x70] sm:$0xff]  }
   0xd   :  { %v1703_v35 = vld [vmem:[%s2159_s0 + $0xe8] sm:$0xff]   ;;  %v1704_v37 = vld [vmem:[%s2159_s0 + $0xf0] sm:$0xff]   ;;  %v1689_v38 = vld [vmem:[%s2159_s0 + $0x78] sm:$0xff]  }
   0xe   :  { %v1705_v39 = vld [vmem:[%s2159_s0 + $0xf8] sm:$0xff]  }
   0xf   :  { %1576 = vmatpush3.bf16.msra.mxu0 %v1669_v3  ;;  %1660 = vmatpush3.bf16.msra.mxu1 %v1669_v3 }
  0x10   :  { %1577 = vmatprep.subr.bf16.mxu0 %v1670_v5  ;;  %1653 = vmatprep.subr.bf16.mxu1 %v1670_v5 }
  0x13   :  { %1578 = vmatpush3.bf16.msra.mxu0 %v1670_v5  ;;  %1661 = vmatpush3.bf16.msra.mxu1 %v1670_v5 }
  0x14   :  { %1579 = vmatprep.subr.bf16.mxu0 %v1671_v6  ;;  %1654 = vmatprep.subr.bf16.mxu1 %v1671_v6 }
  0x17   :  { %1580 = vmatpush3.bf16.msra.mxu0 %v1671_v6  ;;  %1662 = vmatpush3.bf16.msra.mxu1 %v1671_v6 }
  0x18   :  { %1581 = vmatprep.subr.bf16.mxu0 %v1672_v7  ;;  %1655 = vmatprep.subr.bf16.mxu1 %v1672_v7 }
  0x1b   :  { %1582 = vmatpush3.bf16.msra.mxu0 %v1672_v7  ;;  %1663 = vmatpush3.bf16.msra.mxu1 %v1672_v7 }
  0x1c   :  { %1583 = vmatprep.subr.bf16.mxu0 %v1673_v8  ;;  %1656 = vmatprep.subr.bf16.mxu1 %v1673_v8 }
  0x1f   :  { %1584 = vmatpush3.bf16.msra.mxu0 %v1673_v8  ;;  %1664 = vmatpush3.bf16.msra.mxu1 %v1673_v8 }
  0x22   :  { %1586 = vmatmul.mubr.bf16.vlgmr.msra.gmra.mrb[0].mxu0 %v1675_v10  ;;  %1618 = vmatmul.mubr.bf16.vlgmr.msra.gmra.mrb[0].mxu1 %v1691_v12 }
  0x23   :  { %1589 = vmatprep.mubr.bf16.mxu0 %v1676_v11  ;;  %1621 = vmatprep.mubr.bf16.mxu1 %v1692_v13 }
  0x2a   :  { %1590 = vmatmul.mubr.bf16.gmra.mrb[4].mxu0 %v1677_v14  ;;  %1622 = vmatmul.mubr.bf16.gmra.mrb[4].mxu1 %v1693_v16 }
  0x2b   :  { %1593 = vmatprep.mubr.bf16.mxu0 %v1678_v15  ;;  %1625 = vmatprep.mubr.bf16.mxu1 %v1694_v17 }
  0x32   :  { %1594 = vmatmul.mubr.bf16.gmra.mrb[8].mxu0 %v1679_v18  ;;  %1626 = vmatmul.mubr.bf16.gmra.mrb[8].mxu1 %v1695_v19 }
  0x33   :  { %1597 = vmatprep.mubr.bf16.mxu0 %v1680_v20  ;;  %1629 = vmatprep.mubr.bf16.mxu1 %v1696_v21 }
  0x3a   :  { %1598 = vmatmul.mubr.bf16.gmra.mrb[12].mxu0 %v1681_v22  ;;  %1630 = vmatmul.mubr.bf16.gmra.mrb[12].mxu1 %v1697_v23 }
  0x3b   :  { %1601 = vmatprep.mubr.bf16.mxu0 %v1682_v24  ;;  %1633 = vmatprep.mubr.bf16.mxu1 %v1698_v25 }
  0x42   :  { %1602 = vmatmul.mubr.bf16.gmra.mrb[16].mxu0 %v1683_v26  ;;  %1634 = vmatmul.mubr.bf16.gmra.mrb[16].mxu1 %v1699_v27 }
  0x43   :  { %1605 = vmatprep.mubr.bf16.mxu0 %v1684_v28  ;;  %1637 = vmatprep.mubr.bf16.mxu1 %v1700_v29 }
  0x4a   :  { %1606 = vmatmul.mubr.bf16.gmra.mrb[20].mxu0 %v1685_v30  ;;  %1638 = vmatmul.mubr.bf16.gmra.mrb[20].mxu1 %v1701_v31 }
  0x4b   :  { %1609 = vmatprep.mubr.bf16.mxu0 %v1686_v32  ;;  %1641 = vmatprep.mubr.bf16.mxu1 %v1702_v33 }
  0x52   :  { %1610 = vmatmul.mubr.bf16.gmra.mrb[24].mxu0 %v1687_v34  ;;  %1642 = vmatmul.mubr.bf16.gmra.mrb[24].mxu1 %v1703_v35 }
  0x53   :  { %1613 = vmatprep.mubr.bf16.mxu0 %v1688_v36  ;;  %1645 = vmatprep.mubr.bf16.mxu1 %v1704_v37 }
  0x5a   :  { %1614 = vmatmul.mubr.bf16.gmra.mrb[28].mxu0 %v1689_v38  ;;  %1646 = vmatmul.mubr.bf16.gmra.mrb[28].mxu1 %v1705_v39 }
  0xf5   :  { %v1587_v41 = vpop.f32.mrb[0].mxu0  ;;  %v1858_v42 = vpop.f32.mrb[0].mxu1 }
  0xf6   :  { %v375_v43 = vpop.f32.mrb[1].mxu0  ;;  %v1860_v44 = vpop.f32.mrb[1].mxu1  ;;  %v1025_v56 = vmul.f32 %v1587_v41, %v1587_v41 }
  0xf7   :  { %v1588_v45 = vpop.f32.mrb[2].mxu0  ;;  %v1862_v46 = vpop.f32.mrb[2].mxu1  ;;  %v1023_v47 = vmul.f32 %v375_v43, %v375_v43 }
  0xf8   :  { %v1346_v48 = vpack.c.bf16 %v1588_v45, %v1587_v41  ;;  %v378_v49 = vpop.f32.mrb[3].mxu0  ;;  %v1426_v50 = vpack.c.bf16 %v1862_v46, %v1858_v42  ;;  %v1866_v51 = vpop.f32.mrb[3].mxu1  ;;  %v1026_v59 = vmul.f32 %v1588_v45, %v1588_v45 }
  0xf9   :  { %v1341_v52 = vpack.c.bf16 %v378_v49, %v375_v43  ;;  %v951_v53 = vadd.f32 %v378_v49, %v375_v43  ;;  %v1024_v54 = vmul.f32 %v378_v49, %v378_v49  ;;  %v1421_v55 = vpack.c.bf16 %v1866_v51, %v1860_v44 }
  0xfa   :  { %1498 = vst [vmem:[%s2162_s2 + $0x8] sm:$0xff] %v1346_v48   ;;  %1514 = vst [vmem:[%s2162_s2 + $0x88] sm:$0xff] %v1426_v50  }
  0xfb   :  { %1342 = vst [vmem:[%s2162_s2] sm:$0xff] %v1341_v52   ;;  %v952_v57 = vadd.f32 %v1587_v41, %v951_v53  ;;  %v1087_v58 = vadd.f32 %v1024_v54, %v1023_v47  ;;  %1513 = vst [vmem:[%s2162_s2 + $0x80] sm:$0xff] %v1421_v55  }
  0xfd   :  { %v1088_v60 = vadd.f32 %v1087_v58, %v1025_v56  ;;  %v1591_v61 = vpop.f32.mrb[4].mxu0  ;;  %v953_v62 = vadd.f32 %v1588_v45, %v952_v57  ;;  %v1882_v63 = vpop.f32.mrb[4].mxu1 }
  0xfe   :  { %v391_v0 = vpop.f32.mrb[5].mxu0  ;;  %v1884_v1 = vpop.f32.mrb[5].mxu1  ;;  %v1029_v16 = vmul.f32 %v1591_v61, %v1591_v61 }
  0xff   :  { %v954_v2 = vadd.f32 %v953_v62, %v391_v0  ;;  %v1027_v3 = vmul.f32 %v391_v0, %v391_v0  ;;  %v1089_v4 = vadd.f32 %v1088_v60, %v1026_v59  ;;  %v1592_v5 = vpop.f32.mrb[6].mxu0  ;;  %v1886_v6 = vpop.f32.mrb[6].mxu1 }
 0x100   :  { %v1356_v7 = vpack.c.bf16 %v1592_v5, %v1591_v61  ;;  %v394_v8 = vpop.f32.mrb[7].mxu0  ;;  %v1436_v9 = vpack.c.bf16 %v1886_v6, %v1882_v63  ;;  %v1890_v10 = vpop.f32.mrb[7].mxu1  ;;  %v1030_v19 = vmul.f32 %v1592_v5, %v1592_v5 }
 0x101   :  { %v1090_v11 = vadd.f32 %v1089_v4, %v1027_v3  ;;  %v1351_v12 = vpack.c.bf16 %v394_v8, %v391_v0  ;;  %v955_v13 = vadd.f32 %v954_v2, %v394_v8  ;;  %v1028_v14 = vmul.f32 %v394_v8, %v394_v8 }
 0x102   :  { %1500 = vst [vmem:[%s2162_s2 + $0x18] sm:$0xff] %v1356_v7   ;;  %1516 = vst [vmem:[%s2162_s2 + $0x98] sm:$0xff] %v1436_v9   ;;  %v1431_v15 = vpack.c.bf16 %v1890_v10, %v1884_v1 }
 0x103   :  { %1499 = vst [vmem:[%s2162_s2 + $0x10] sm:$0xff] %v1351_v12   ;;  %v956_v17 = vadd.f32 %v1591_v61, %v955_v13  ;;  %v1091_v18 = vadd.f32 %v1090_v11, %v1028_v14 }
 0x104   :  { %1515 = vst [vmem:[%s2162_s2 + $0x90] sm:$0xff] %v1431_v15  }
 0x105   :  { %v1092_v20 = vadd.f32 %v1091_v18, %v1029_v16  ;;  %v1595_v21 = vpop.f32.mrb[8].mxu0  ;;  %v957_v22 = vadd.f32 %v1592_v5, %v956_v17  ;;  %v1906_v23 = vpop.f32.mrb[8].mxu1 }
 0x106   :  { %v407_v24 = vpop.f32.mrb[9].mxu0  ;;  %v1908_v25 = vpop.f32.mrb[9].mxu1  ;;  %v1033_v40 = vmul.f32 %v1595_v21, %v1595_v21 }
 0x107   :  { %v958_v26 = vadd.f32 %v957_v22, %v407_v24  ;;  %v1031_v27 = vmul.f32 %v407_v24, %v407_v24  ;;  %v1093_v28 = vadd.f32 %v1092_v20, %v1030_v19  ;;  %v1596_v29 = vpop.f32.mrb[10].mxu0  ;;  %v1910_v30 = vpop.f32.mrb[10].mxu1 }
 0x108   :  { %v1366_v31 = vpack.c.bf16 %v1596_v29, %v1595_v21  ;;  %v410_v32 = vpop.f32.mrb[11].mxu0  ;;  %v1446_v33 = vpack.c.bf16 %v1910_v30, %v1906_v23  ;;  %v1914_v34 = vpop.f32.mrb[11].mxu1  ;;  %v1034_v45 = vmul.f32 %v1596_v29, %v1596_v29 }
 0x109   :  { %v1094_v35 = vadd.f32 %v1093_v28, %v1031_v27  ;;  %v1361_v36 = vpack.c.bf16 %v410_v32, %v407_v24  ;;  %v959_v37 = vadd.f32 %v958_v26, %v410_v32  ;;  %v1032_v38 = vmul.f32 %v410_v32, %v410_v32 }
 0x10a   :  { %1502 = vst [vmem:[%s2162_s2 + $0x28] sm:$0xff] %v1366_v31   ;;  %1518 = vst [vmem:[%s2162_s2 + $0xa8] sm:$0xff] %v1446_v33   ;;  %v1441_v39 = vpack.c.bf16 %v1914_v34, %v1908_v25 }
 0x10b   :  { %1501 = vst [vmem:[%s2162_s2 + $0x20] sm:$0xff] %v1361_v36   ;;  %v960_v41 = vadd.f32 %v1595_v21, %v959_v37  ;;  %v1095_v43 = vadd.f32 %v1094_v35, %v1032_v38 }
 0x10c   :  { %1517 = vst [vmem:[%s2162_s2 + $0xa0] sm:$0xff] %v1441_v39  }
 0x10d   :  { %v1096_v47 = vadd.f32 %v1095_v43, %v1033_v40  ;;  %v1599_v48 = vpop.f32.mrb[12].mxu0  ;;  %v961_v49 = vadd.f32 %v1596_v29, %v960_v41  ;;  %v1930_v50 = vpop.f32.mrb[12].mxu1 }
 0x10e   :  { %v423_v52 = vpop.f32.mrb[13].mxu0  ;;  %v1932_v53 = vpop.f32.mrb[13].mxu1  ;;  %v1037_v7 = vmul.f32 %v1599_v48, %v1599_v48 }
 0x10f   :  { %v962_v54 = vadd.f32 %v961_v49, %v423_v52  ;;  %v1035_v55 = vmul.f32 %v423_v52, %v423_v52  ;;  %v1097_v56 = vadd.f32 %v1096_v47, %v1034_v45  ;;  %v1600_v57 = vpop.f32.mrb[14].mxu0  ;;  %v1934_v58 = vpop.f32.mrb[14].mxu1 }
 0x110   :  { %v1376_v59 = vpack.c.bf16 %v1600_v57, %v1599_v48  ;;  %v426_v60 = vpop.f32.mrb[15].mxu0  ;;  %v1456_v61 = vpack.c.bf16 %v1934_v58, %v1930_v50  ;;  %v1938_v62 = vpop.f32.mrb[15].mxu1  ;;  %v1038_v11 = vmul.f32 %v1600_v57, %v1600_v57 }
 0x111   :  { %v1098_v0 = vadd.f32 %v1097_v56, %v1035_v55  ;;  %v1371_v2 = vpack.c.bf16 %v426_v60, %v423_v52  ;;  %v963_v3 = vadd.f32 %v962_v54, %v426_v60  ;;  %v1036_v4 = vmul.f32 %v426_v60, %v426_v60 }
 0x112   :  { %1504 = vst [vmem:[%s2162_s2 + $0x38] sm:$0xff] %v1376_v59   ;;  %1520 = vst [vmem:[%s2162_s2 + $0xb8] sm:$0xff] %v1456_v61   ;;  %v1451_v5 = vpack.c.bf16 %v1938_v62, %v1932_v53 }
 0x113   :  { %1503 = vst [vmem:[%s2162_s2 + $0x30] sm:$0xff] %v1371_v2   ;;  %v964_v8 = vadd.f32 %v1599_v48, %v963_v3  ;;  %v1099_v9 = vadd.f32 %v1098_v0, %v1036_v4 }
 0x114   :  { %1519 = vst [vmem:[%s2162_s2 + $0xb0] sm:$0xff] %v1451_v5  }
 0x115   :  { %v1100_v12 = vadd.f32 %v1099_v9, %v1037_v7  ;;  %v1603_v13 = vpop.f32.mrb[16].mxu0  ;;  %v965_v14 = vadd.f32 %v1600_v57, %v964_v8  ;;  %v1954_v15 = vpop.f32.mrb[16].mxu1 }
 0x116   :  { %v439_v16 = vpop.f32.mrb[17].mxu0  ;;  %v1956_v17 = vpop.f32.mrb[17].mxu1  ;;  %v1041_v36 = vmul.f32 %v1603_v13, %v1603_v13 }
 0x117   :  { %v966_v18 = vadd.f32 %v965_v14, %v439_v16  ;;  %v1039_v19 = vmul.f32 %v439_v16, %v439_v16  ;;  %v1101_v20 = vadd.f32 %v1100_v12, %v1038_v11  ;;  %v1604_v21 = vpop.f32.mrb[18].mxu0  ;;  %v1958_v22 = vpop.f32.mrb[18].mxu1 }
 0x118   :  { %v1386_v24 = vpack.c.bf16 %v1604_v21, %v1603_v13  ;;  %v442_v26 = vpop.f32.mrb[19].mxu0  ;;  %v1466_v27 = vpack.c.bf16 %v1958_v22, %v1954_v15  ;;  %v1962_v28 = vpop.f32.mrb[19].mxu1  ;;  %v1042_v39 = vmul.f32 %v1604_v21, %v1604_v21 }
 0x119   :  { %v1102_v29 = vadd.f32 %v1101_v20, %v1039_v19  ;;  %v1381_v31 = vpack.c.bf16 %v442_v26, %v439_v16  ;;  %v967_v32 = vadd.f32 %v966_v18, %v442_v26  ;;  %v1040_v33 = vmul.f32 %v442_v26, %v442_v26 }
 0x11a   :  { %1506 = vst [vmem:[%s2162_s2 + $0x48] sm:$0xff] %v1386_v24   ;;  %1522 = vst [vmem:[%s2162_s2 + $0xc8] sm:$0xff] %v1466_v27   ;;  %v1461_v35 = vpack.c.bf16 %v1962_v28, %v1956_v17 }
 0x11b   :  { %1505 = vst [vmem:[%s2162_s2 + $0x40] sm:$0xff] %v1381_v31   ;;  %v968_v37 = vadd.f32 %v1603_v13, %v967_v32  ;;  %v1103_v38 = vadd.f32 %v1102_v29, %v1040_v33 }
 0x11c   :  { %1521 = vst [vmem:[%s2162_s2 + $0xc0] sm:$0xff] %v1461_v35  }
 0x11d   :  { %v1104_v40 = vadd.f32 %v1103_v38, %v1041_v36  ;;  %v1607_v41 = vpop.f32.mrb[20].mxu0  ;;  %v969_v43 = vadd.f32 %v1604_v21, %v968_v37  ;;  %v1978_v45 = vpop.f32.mrb[20].mxu1 }
 0x11e   :  { %v455_v47 = vpop.f32.mrb[21].mxu0  ;;  %v1980_v48 = vpop.f32.mrb[21].mxu1  ;;  %v1045_v7 = vmul.f32 %v1607_v41, %v1607_v41 }
 0x11f   :  { %v970_v49 = vadd.f32 %v969_v43, %v455_v47  ;;  %v1043_v52 = vmul.f32 %v455_v47, %v455_v47  ;;  %v1105_v54 = vadd.f32 %v1104_v40, %v1042_v39  ;;  %v1608_v55 = vpop.f32.mrb[22].mxu0  ;;  %v1982_v56 = vpop.f32.mrb[22].mxu1 }
 0x120   :  { %v1396_v57 = vpack.c.bf16 %v1608_v55, %v1607_v41  ;;  %v458_v59 = vpop.f32.mrb[23].mxu0  ;;  %v1476_v60 = vpack.c.bf16 %v1982_v56, %v1978_v45  ;;  %v1986_v61 = vpop.f32.mrb[23].mxu1  ;;  %v1046_v11 = vmul.f32 %v1608_v55, %v1608_v55 }
 0x121   :  { %v1106_v0 = vadd.f32 %v1105_v54, %v1043_v52  ;;  %v1391_v2 = vpack.c.bf16 %v458_v59, %v455_v47  ;;  %v971_v3 = vadd.f32 %v970_v49, %v458_v59  ;;  %v1044_v4 = vmul.f32 %v458_v59, %v458_v59 }
 0x122   :  { %1508 = vst [vmem:[%s2162_s2 + $0x58] sm:$0xff] %v1396_v57   ;;  %1524 = vst [vmem:[%s2162_s2 + $0xd8] sm:$0xff] %v1476_v60   ;;  %v1471_v5 = vpack.c.bf16 %v1986_v61, %v1980_v48 }
 0x123   :  { %1507 = vst [vmem:[%s2162_s2 + $0x50] sm:$0xff] %v1391_v2   ;;  %v972_v8 = vadd.f32 %v1607_v41, %v971_v3  ;;  %v1107_v9 = vadd.f32 %v1106_v0, %v1044_v4 }
 0x124   :  { %1523 = vst [vmem:[%s2162_s2 + $0xd0] sm:$0xff] %v1471_v5  }
 0x125   :  { %v1108_v12 = vadd.f32 %v1107_v9, %v1045_v7  ;;  %v1611_v13 = vpop.f32.mrb[24].mxu0  ;;  %v973_v14 = vadd.f32 %v1608_v55, %v972_v8  ;;  %v2002_v16 = vpop.f32.mrb[24].mxu1 }
 0x126   :  { %v471_v18 = vpop.f32.mrb[25].mxu0  ;;  %v2004_v19 = vpop.f32.mrb[25].mxu1  ;;  %v1049_v40 = vmul.f32 %v1611_v13, %v1611_v13 }
 0x127   :  { %v974_v20 = vadd.f32 %v973_v14, %v471_v18  ;;  %v1047_v21 = vmul.f32 %v471_v18, %v471_v18  ;;  %v1109_v24 = vadd.f32 %v1108_v12, %v1046_v11  ;;  %v1612_v26 = vpop.f32.mrb[26].mxu0  ;;  %v2006_v27 = vpop.f32.mrb[26].mxu1 }
 0x128   :  { %v1406_v29 = vpack.c.bf16 %v1612_v26, %v1611_v13  ;;  %v474_v31 = vpop.f32.mrb[27].mxu0  ;;  %v1486_v32 = vpack.c.bf16 %v2006_v27, %v2002_v16  ;;  %v2010_v33 = vpop.f32.mrb[27].mxu1  ;;  %v1050_v47 = vmul.f32 %v1612_v26, %v1612_v26 }
 0x129   :  { %v1110_v35 = vadd.f32 %v1109_v24, %v1047_v21  ;;  %v1401_v36 = vpack.c.bf16 %v474_v31, %v471_v18  ;;  %v975_v37 = vadd.f32 %v974_v20, %v474_v31  ;;  %v1048_v38 = vmul.f32 %v474_v31, %v474_v31 }
 0x12a   :  { %1510 = vst [vmem:[%s2162_s2 + $0x68] sm:$0xff] %v1406_v29   ;;  %1526 = vst [vmem:[%s2162_s2 + $0xe8] sm:$0xff] %v1486_v32   ;;  %v1481_v39 = vpack.c.bf16 %v2010_v33, %v2004_v19  ;;  %v1055_v32 = vmul.f32 %v1860_v44, %v1860_v44 }
 0x12b   :  { %1509 = vst [vmem:[%s2162_s2 + $0x60] sm:$0xff] %v1401_v36   ;;  %v976_v41 = vadd.f32 %v1611_v13, %v975_v37  ;;  %v1111_v43 = vadd.f32 %v1110_v35, %v1048_v38 }
 0x12c   :  { %1525 = vst [vmem:[%s2162_s2 + $0xe0] sm:$0xff] %v1481_v39   ;;  %v1056_v39 = vmul.f32 %v1866_v51, %v1866_v51 }
 0x12d   :  { %v1112_v49 = vadd.f32 %v1111_v43, %v1049_v40  ;;  %v1615_v52 = vpop.f32.mrb[28].mxu0  ;;  %v977_v54 = vadd.f32 %v1612_v26, %v976_v41  ;;  %v2026_v55 = vpop.f32.mrb[28].mxu1  ;;  %v1057_v40 = vmul.f32 %v1858_v42, %v1858_v42 }
 0x12e   :  { %v487_v57 = vpop.f32.mrb[29].mxu0  ;;  %v2028_v59 = vpop.f32.mrb[29].mxu1  ;;  %v1053_v20 = vmul.f32 %v1615_v52, %v1615_v52 }
 0x12f   :  { %v978_v60 = vadd.f32 %v977_v54, %v487_v57  ;;  %v1051_v0 = vmul.f32 %v487_v57, %v487_v57  ;;  %v1113_v2 = vadd.f32 %v1112_v49, %v1050_v47  ;;  %v1616_v3 = vpop.f32.mrb[30].mxu0  ;;  %v2030_v4 = vpop.f32.mrb[30].mxu1  ;;  %v1058_v47 = vmul.f32 %v1862_v46, %v1862_v46 }
 0x130   :  { %v1416_v5 = vpack.c.bf16 %v1616_v3, %v1615_v52  ;;  %v490_v7 = vpop.f32.mrb[31].mxu0  ;;  %v1496_v8 = vpack.c.bf16 %v2030_v4, %v2026_v55  ;;  %v2034_v9 = vpop.f32.mrb[31].mxu1  ;;  %v1054_v26 = vmul.f32 %v1616_v3, %v1616_v3 }
 0x131   :  { %v1114_v11 = vadd.f32 %v1113_v2, %v1051_v0  ;;  %v1411_v12 = vpack.c.bf16 %v490_v7, %v487_v57  ;;  %v979_v13 = vadd.f32 %v978_v60, %v490_v7  ;;  %v1052_v14 = vmul.f32 %v490_v7, %v490_v7 }
 0x132   :  { %1512 = vst [vmem:[%s2162_s2 + $0x78] sm:$0xff] %v1416_v5   ;;  %1528 = vst [vmem:[%s2162_s2 + $0xf8] sm:$0xff] %v1496_v8   ;;  %v1491_v18 = vpack.c.bf16 %v2034_v9, %v2028_v59  ;;  %v1060_v0 = vmul.f32 %v1890_v10, %v1890_v10 }
 0x133   :  { %1511 = vst [vmem:[%s2162_s2 + $0x70] sm:$0xff] %v1411_v12   ;;  %v980_v21 = vadd.f32 %v1615_v52, %v979_v13  ;;  %v1115_v24 = vadd.f32 %v1114_v11, %v1052_v14  ;;  %v1064_v13 = vmul.f32 %v1914_v34, %v1914_v34 }
 0x134   :  { %1527 = vst [vmem:[%s2162_s2 + $0xf0] sm:$0xff] %v1491_v18  }
 0x135   :  { %v1116_v29 = vadd.f32 %v1115_v24, %v1053_v20  ;;  %v981_v31 = vadd.f32 %v1616_v3, %v980_v21 }
 0x137   :  { %v982_v35 = vadd.f32 %v981_v31, %v1860_v44  ;;  %v1117_v36 = vadd.f32 %v1116_v29, %v1054_v26  ;;  %v1059_v44 = vmul.f32 %v1884_v1, %v1884_v1  ;;  %v1068_v31 = vmul.f32 %v1938_v62, %v1938_v62 }
 0x139   :  { %v1118_v37 = vadd.f32 %v1117_v36, %v1055_v32  ;;  %v983_v38 = vadd.f32 %v982_v35, %v1866_v51 }
 0x13b   :  { %v984_v41 = vadd.f32 %v1858_v42, %v983_v38  ;;  %v1119_v43 = vadd.f32 %v1118_v37, %v1056_v39  ;;  %v1061_v42 = vmul.f32 %v1882_v63, %v1882_v63 }
 0x13d   :  { %v1120_v49 = vadd.f32 %v1119_v43, %v1057_v40  ;;  %v985_v52 = vadd.f32 %v1862_v46, %v984_v41  ;;  %v1062_v46 = vmul.f32 %v1886_v6, %v1886_v6  ;;  %v1072_v41 = vmul.f32 %v1962_v28, %v1962_v28 }
 0x13f   :  { %v986_v54 = vadd.f32 %v985_v52, %v1884_v1  ;;  %v1121_v57 = vadd.f32 %v1120_v49, %v1058_v47  ;;  %v1063_v1 = vmul.f32 %v1908_v25, %v1908_v25 }
 0x141   :  { %v1122_v60 = vadd.f32 %v1121_v57, %v1059_v44  ;;  %v987_v51 = vadd.f32 %v986_v54, %v1890_v10 }
 0x143   :  { %v988_v2 = vadd.f32 %v1882_v63, %v987_v51  ;;  %v1123_v3 = vadd.f32 %v1122_v60, %v1060_v0  ;;  %v1065_v63 = vmul.f32 %v1906_v23, %v1906_v23  ;;  %v1076_v60 = vmul.f32 %v1986_v61, %v1986_v61 }
 0x145   :  { %v1124_v5 = vadd.f32 %v1123_v3, %v1061_v42  ;;  %v989_v7 = vadd.f32 %v1886_v6, %v988_v2  ;;  %v1066_v6 = vmul.f32 %v1910_v30, %v1910_v30 }
 0x147   :  { %v990_v8 = vadd.f32 %v989_v7, %v1908_v25  ;;  %v1125_v11 = vadd.f32 %v1124_v5, %v1062_v46  ;;  %v1067_v25 = vmul.f32 %v1932_v53, %v1932_v53  ;;  %v1080_v7 = vmul.f32 %v2010_v33, %v2010_v33 }
 0x149   :  { %v1126_v12 = vadd.f32 %v1125_v11, %v1063_v1  ;;  %v991_v10 = vadd.f32 %v990_v8, %v1914_v34 }
 0x14b   :  { %v992_v14 = vadd.f32 %v1906_v23, %v991_v10  ;;  %v1127_v18 = vadd.f32 %v1126_v12, %v1064_v13  ;;  %v1069_v23 = vmul.f32 %v1930_v50, %v1930_v50 }
 0x14d   :  { %v1128_v20 = vadd.f32 %v1127_v18, %v1065_v63  ;;  %v993_v21 = vadd.f32 %v1910_v30, %v992_v14  ;;  %v1070_v30 = vmul.f32 %v1934_v58, %v1934_v58  ;;  %v1084_v14 = vmul.f32 %v2034_v9, %v2034_v9 }
 0x14f   :  { %v994_v24 = vadd.f32 %v993_v21, %v1932_v53  ;;  %v1129_v26 = vadd.f32 %v1128_v20, %v1066_v6  ;;  %v1071_v53 = vmul.f32 %v1956_v17, %v1956_v17 }
 0x151   :  { %v1130_v29 = vadd.f32 %v1129_v26, %v1067_v25  ;;  %v995_v34 = vadd.f32 %v994_v24, %v1938_v62 }
 0x153   :  { %v996_v32 = vadd.f32 %v1930_v50, %v995_v34  ;;  %v1131_v35 = vadd.f32 %v1130_v29, %v1068_v31  ;;  %v1073_v50 = vmul.f32 %v1954_v15, %v1954_v15 }
 0x155   :  { %v1132_v36 = vadd.f32 %v1131_v35, %v1069_v23  ;;  %v997_v37 = vadd.f32 %v1934_v58, %v996_v32  ;;  %v1074_v58 = vmul.f32 %v1958_v22, %v1958_v22 }
 0x157   :  { %v998_v38 = vadd.f32 %v997_v37, %v1956_v17  ;;  %v1133_v39 = vadd.f32 %v1132_v36, %v1070_v30  ;;  %v1075_v17 = vmul.f32 %v1980_v48, %v1980_v48 }
 0x159   :  { %v1134_v40 = vadd.f32 %v1133_v39, %v1071_v53  ;;  %v999_v62 = vadd.f32 %v998_v38, %v1962_v28 }
 0x15b   :  { %v1000_v43 = vadd.f32 %v1954_v15, %v999_v62  ;;  %v1135_v47 = vadd.f32 %v1134_v40, %v1072_v41  ;;  %v1077_v15 = vmul.f32 %v1978_v45, %v1978_v45 }
 0x15d   :  { %v1136_v49 = vadd.f32 %v1135_v47, %v1073_v50  ;;  %v1001_v52 = vadd.f32 %v1958_v22, %v1000_v43  ;;  %v1078_v22 = vmul.f32 %v1982_v56, %v1982_v56 }
 0x15f   :  { %v1002_v44 = vadd.f32 %v1001_v52, %v1980_v48  ;;  %v1137_v54 = vadd.f32 %v1136_v49, %v1074_v58  ;;  %v1079_v48 = vmul.f32 %v2004_v19, %v2004_v19 }
 0x161   :  { %v1138_v57 = vadd.f32 %v1137_v54, %v1075_v17  ;;  %v1003_v28 = vadd.f32 %v1002_v44, %v1986_v61 }
 0x163   :  { %v1004_v51 = vadd.f32 %v1978_v45, %v1003_v28  ;;  %v1139_v0 = vadd.f32 %v1138_v57, %v1076_v60  ;;  %v1081_v45 = vmul.f32 %v2002_v16, %v2002_v16 }
 0x165   :  { %v1140_v42 = vadd.f32 %v1139_v0, %v1077_v15  ;;  %v1005_v2 = vadd.f32 %v1982_v56, %v1004_v51  ;;  %v1082_v56 = vmul.f32 %v2006_v27, %v2006_v27 }
 0x167   :  { %v1006_v3 = vadd.f32 %v1005_v2, %v2004_v19  ;;  %v1141_v46 = vadd.f32 %v1140_v42, %v1078_v22  ;;  %v1083_v19 = vmul.f32 %v2028_v59, %v2028_v59 }
 0x169   :  { %v1142_v5 = vadd.f32 %v1141_v46, %v1079_v48  ;;  %v1007_v61 = vadd.f32 %v1006_v3, %v2010_v33 }
 0x16b   :  { %v1008_v1 = vadd.f32 %v2002_v16, %v1007_v61  ;;  %v1143_v8 = vadd.f32 %v1142_v5, %v1080_v7  ;;  %v1085_v16 = vmul.f32 %v2026_v55, %v2026_v55 }
 0x16d   :  { %v1144_v11 = vadd.f32 %v1143_v8, %v1081_v45  ;;  %v1009_v12 = vadd.f32 %v2006_v27, %v1008_v1  ;;  %v1086_v27 = vmul.f32 %v2030_v4, %v2030_v4 }
 0x16f   :  { %v1010_v10 = vadd.f32 %v1009_v12, %v2028_v59  ;;  %v1145_v13 = vadd.f32 %v1144_v11, %v1082_v56 }
 0x171   :  { %v1146_v63 = vadd.f32 %v1145_v13, %v1083_v19  ;;  %v1011_v33 = vadd.f32 %v1010_v10, %v2034_v9 }
 0x173   :  { %v1012_v18 = vadd.f32 %v2026_v55, %v1011_v33  ;;  %v1147_v6 = vadd.f32 %v1146_v63, %v1084_v14  ;;  %v950_v55 = vld [vmem:[%s2160_s3] sm:$0x1] }
 0x175   :  { %v1013_v20 = vadd.f32 %v2030_v4, %v1012_v18  ;;  %v1148_v21 = vadd.f32 %v1147_v6, %v1085_v16  ;;  %v1022_v4 = vld [vmem:[%s2161_s4] sm:$0x1] }
 0x177   :  { %v1014_v59 = vrot.slane %v1013_v20, 4  ;;  %v1149_v25 = vadd.f32 %v1148_v21, %v1086_v27 }
 0x179   :  { %v1015_v24 = vadd.f32 %v1014_v59, %v1013_v20  ;;  %v1150_v26 = vrot.slane %v1149_v25, 4 }
 0x17b   :  { %v1016_v29 = vrot.slane %v1015_v24, 2  ;;  %v1151_v34 = vadd.f32 %v1150_v26, %v1149_v25 }
 0x17d   :  { %v1017_v31 = vadd.f32 %v1016_v29, %v1015_v24  ;;  %v1152_v9 = vrot.slane %v1151_v34, 2 }
 0x17f   :  { %v1018_v23 = vrot.slane %v1017_v31, 1  ;;  %v1153_v32 = vadd.f32 %v1152_v9, %v1151_v34 }
 0x181   :  { %v1019_v35 = vadd.f32 %v1018_v23, %v1017_v31  ;;  %v1154_v30 = vrot.slane %v1153_v32, 1 }
 0x183   :  { %v1020_v36 = vadd.f32 %v1019_v35, %v950_v55  ;;  %v1155_v37 = vadd.f32 %v1154_v30, %v1153_v32 }
 0x185   :  { %1021 = vst [vmem:[%s2160_s3] sm:$0x1] %v1020_v36  ;;  %v1156_v53 = vadd.f32 %v1155_v37, %v1022_v4 }
 0x187   :  { %1157 = vst [vmem:[%s2161_s4] sm:$0x1] %v1156_v53 }

// kernel: residual_block_forward.7
= control target key start
LH: loop header
LB: loop body
LE: loop exit
PB: predicated region body
PF: predicated region fallthrough
CT: control target
= control target key end

     0   :  { %s1618_s0 = inlined_call_operand.vmem [shape: bf16[512,128], index: 0, kind: input, shape index: {}]   ;;  %s1619_s1 = inlined_call_operand.vmem [shape: f32[1,128], index: 1, kind: input, shape index: {}]   ;;  %s1620_s2 = inlined_call_operand.vmem [shape: bf16[512,128], index: 2, kind: input, shape index: {}]   ;;  %s1621_s3 = inlined_call_operand.vmem [shape: f32[1,128], index: 3, kind: input, shape index: {}]   ;;  %s1622_s4 = inlined_call_operand.vmem [shape: f32[1,128], index: 4, kind: input, shape index: {}]   ;;  %s1623_s5 = inlined_call_operand.vmem [shape: f32[512,128], index: 5, kind: output, shape index: {}]  }
   0x1   :  { %v689_v0 = vld [vmem:[%s1618_s0] sm:$0xff]   ;;  %v944_v8 = vld [vmem:[%s1618_s0 + $0x8] sm:$0xff]   ;;  %v945_v12 = vld [vmem:[%s1618_s0 + $0x10] sm:$0xff]  }
   0x2   :  { %v1045_v1 = vld [vmem:[%s1619_s1] ss:$0 sm:$0xff]  ;;  %v690_v3 = vunpack.c.l.bf16 %v689_v0  ;;  %v691_v6 = vunpack.c.h.bf16 %v689_v0  ;;  %v694_v9 = vunpack.c.l.bf16 %v944_v8  ;;  %v975_v10 = vld [vmem:[%s1620_s2 + $0x8] sm:$0xff]   ;;  %v695_v11 = vunpack.c.h.bf16 %v944_v8  ;;  %v976_v13 = vld [vmem:[%s1620_s2 + $0x10] sm:$0xff]  }
   0x3   :  { %v817_v2 = vld [vmem:[%s1620_s2] sm:$0xff]   ;;  %v822_v20 = vunpack.c.l.bf16 %v975_v10  ;;  %v823_v22 = vunpack.c.h.bf16 %v975_v10  ;;  %v698_v25 = vunpack.c.l.bf16 %v945_v12  ;;  %v826_v26 = vunpack.c.l.bf16 %v976_v13  ;;  %v946_v31 = vld [vmem:[%s1618_s0 + $0x18] sm:$0xff]   ;;  %v948_v59 = vld [vmem:[%s1618_s0 + $0x28] sm:$0xff]  }
   0x4   :  { %v818_v4 = vunpack.c.l.bf16 %v817_v2  ;;  %v1053_v5 = vld [vmem:[%s1621_s3] ss:$0 sm:$0xff]  ;;  %v819_v7 = vunpack.c.h.bf16 %v817_v2  ;;  %v155_v14 = vmul.f32 %v690_v3, %v1045_v1  ;;  %v156_v16 = vmul.f32 %v691_v6, %v1045_v1  ;;  %v977_v36 = vld [vmem:[%s1620_s2 + $0x18] sm:$0xff]   ;;  %v979_v0 = vld [vmem:[%s1620_s2 + $0x28] sm:$0xff]  }
   0x5   :  { %v1074_v18 = vld [vmem:[%s1622_s4] ss:$0 sm:$0xff]  ;;  %v157_v19 = vmul.f32 %v694_v9, %v1045_v1  ;;  %v158_v21 = vmul.f32 %v695_v11, %v1045_v1  ;;  %v356_v27 = vmul.f32 %v822_v20, %v1053_v5  ;;  %v357_v28 = vmul.f32 %v823_v22, %v1053_v5 }
   0x6   :  { %v354_v15 = vmul.f32 %v818_v4, %v1053_v5  ;;  %v355_v17 = vmul.f32 %v819_v7, %v1053_v5  ;;  %v699_v29 = vunpack.c.h.bf16 %v945_v12  ;;  %v827_v30 = vunpack.c.h.bf16 %v976_v13  ;;  %v947_v49 = vld [vmem:[%s1618_s0 + $0x20] sm:$0xff]  }
   0x7   :  { %v159_v34 = vmul.f32 %v698_v25, %v1045_v1  ;;  %v358_v35 = vmul.f32 %v826_v26, %v1053_v5  ;;  %v420_v37 = vadd.f32 %v356_v27, %v157_v19  ;;  %v421_v38 = vadd.f32 %v357_v28, %v158_v21  ;;  %v978_v54 = vld [vmem:[%s1620_s2 + $0x20] sm:$0xff]   ;;  %v980_v21 = vld [vmem:[%s1620_s2 + $0x30] sm:$0xff]  }
   0x8   :  { %v418_v23 = vadd.f32 %v354_v15, %v155_v14  ;;  %v419_v24 = vadd.f32 %v355_v17, %v156_v16  ;;  %v160_v39 = vmul.f32 %v699_v29, %v1045_v1  ;;  %v359_v40 = vmul.f32 %v827_v30, %v1053_v5  ;;  %v949_v15 = vld [vmem:[%s1618_s0 + $0x30] sm:$0xff]  }
   0x9   :  { %v422_v43 = vadd.f32 %v358_v35, %v159_v34  ;;  %v702_v44 = vunpack.c.l.bf16 %v946_v31  ;;  %v491_v45 = vadd.f32 %v1074_v18, %v420_v37  ;;  %v492_v46 = vadd.f32 %v1074_v18, %v421_v38  ;;  %v950_v34 = vld [vmem:[%s1618_s0 + $0x38] sm:$0xff]  }
   0xa   :  { %v489_v32 = vadd.f32 %v1074_v18, %v418_v23  ;;  %v490_v33 = vadd.f32 %v1074_v18, %v419_v24  ;;  %v423_v47 = vadd.f32 %v359_v40, %v160_v39  ;;  %v830_v48 = vunpack.c.l.bf16 %v977_v36  ;;  %v981_v39 = vld [vmem:[%s1620_s2 + $0x38] sm:$0xff]  }
   0xb   :  { %v493_v50 = vadd.f32 %v1074_v18, %v422_v43  ;;  %v161_v51 = vmul.f32 %v702_v44, %v1045_v1  ;;  %v703_v52 = vunpack.c.h.bf16 %v946_v31  ;;  %v831_v53 = vunpack.c.h.bf16 %v977_v36 }
   0xc   :  { %v553_v41 = vmax.f32 %v489_v32, 0.0  ;;  %v554_v42 = vmax.f32 %v490_v33, 0.0  ;;  %v555_v55 = vmax.f32 %v491_v45, 0.0  ;;  %v556_v56 = vmax.f32 %v492_v46, 0.0 }
   0xd   :  { %v494_v57 = vadd.f32 %v1074_v18, %v423_v47  ;;  %v360_v58 = vmul.f32 %v830_v48, %v1053_v5  ;;  %v557_v60 = vmax.f32 %v493_v50, 0.0  ;;  %v162_v61 = vmul.f32 %v703_v52, %v1045_v1  ;;  %v951_v48 = vld [vmem:[%s1618_s0 + $0x40] sm:$0xff]  }
   0xe   :  { %617 = vst [vmem:[%s1623_s5] sm:$0xff] %v553_v41  ;;  %618 = vst [vmem:[%s1623_s5 + $0x8] sm:$0xff] %v554_v42  ;;  %v361_v62 = vmul.f32 %v831_v53, %v1053_v5  ;;  %v706_v63 = vunpack.c.l.bf16 %v947_v49  ;;  %v834_v4 = vunpack.c.l.bf16 %v978_v54  ;;  %v707_v6 = vunpack.c.h.bf16 %v947_v49  ;;  %v982_v53 = vld [vmem:[%s1620_s2 + $0x40] sm:$0xff]  }
   0xf   :  { %619 = vst [vmem:[%s1623_s5 + $0x10] sm:$0xff] %v555_v55  ;;  %620 = vst [vmem:[%s1623_s5 + $0x18] sm:$0xff] %v556_v56  ;;  %v558_v2 = vmax.f32 %v494_v57, 0.0  ;;  %v424_v3 = vadd.f32 %v360_v58, %v161_v51  ;;  %v835_v9 = vunpack.c.h.bf16 %v978_v54  ;;  %v710_v10 = vunpack.c.l.bf16 %v948_v59 }
  0x10   :  { %621 = vst [vmem:[%s1623_s5 + $0x20] sm:$0xff] %v557_v60  ;;  %v425_v7 = vadd.f32 %v361_v62, %v162_v61  ;;  %v163_v8 = vmul.f32 %v706_v63, %v1045_v1  ;;  %v362_v12 = vmul.f32 %v834_v4, %v1053_v5  ;;  %v164_v13 = vmul.f32 %v707_v6, %v1045_v1  ;;  %v983_v4 = vld [vmem:[%s1620_s2 + $0x48] sm:$0xff]  }
  0x11   :  { %622 = vst [vmem:[%s1623_s5 + $0x28] sm:$0xff] %v558_v2  ;;  %v495_v11 = vadd.f32 %v1074_v18, %v424_v3  ;;  %v838_v14 = vunpack.c.l.bf16 %v979_v0  ;;  %v363_v17 = vmul.f32 %v835_v9, %v1053_v5  ;;  %v165_v19 = vmul.f32 %v710_v10, %v1045_v1  ;;  %v952_v3 = vld [vmem:[%s1618_s0 + $0x48] sm:$0xff]  }
  0x12   :  { %v496_v16 = vadd.f32 %v1074_v18, %v425_v7  ;;  %v711_v20 = vunpack.c.h.bf16 %v948_v59  ;;  %v426_v23 = vadd.f32 %v362_v12, %v163_v8  ;;  %v839_v25 = vunpack.c.h.bf16 %v979_v0 }
  0x13   :  { %v559_v22 = vmax.f32 %v495_v11, 0.0  ;;  %v364_v24 = vmul.f32 %v838_v14, %v1053_v5  ;;  %v427_v27 = vadd.f32 %v363_v17, %v164_v13  ;;  %v714_v29 = vunpack.c.l.bf16 %v949_v15 }
  0x14   :  { %v560_v26 = vmax.f32 %v496_v16, 0.0  ;;  %v166_v28 = vmul.f32 %v711_v20, %v1045_v1  ;;  %v497_v30 = vadd.f32 %v1074_v18, %v426_v23  ;;  %v365_v32 = vmul.f32 %v839_v25, %v1053_v5  ;;  %v953_v23 = vld [vmem:[%s1618_s0 + $0x50] sm:$0xff]  }
  0x15   :  { %623 = vst [vmem:[%s1623_s5 + $0x30] sm:$0xff] %v559_v22  ;;  %v428_v31 = vadd.f32 %v364_v24, %v165_v19  ;;  %v842_v33 = vunpack.c.l.bf16 %v980_v21  ;;  %v498_v35 = vadd.f32 %v1074_v18, %v427_v27  ;;  %v167_v36 = vmul.f32 %v714_v29, %v1045_v1  ;;  %v984_v24 = vld [vmem:[%s1620_s2 + $0x50] sm:$0xff]  }
  0x16   :  { %624 = vst [vmem:[%s1623_s5 + $0x38] sm:$0xff] %v560_v26  ;;  %v715_v37 = vunpack.c.h.bf16 %v949_v15  ;;  %v843_v38 = vunpack.c.h.bf16 %v980_v21  ;;  %v561_v40 = vmax.f32 %v497_v30, 0.0  ;;  %v429_v42 = vadd.f32 %v365_v32, %v166_v28 }
  0x17   :  { %v499_v41 = vadd.f32 %v1074_v18, %v428_v31  ;;  %v366_v43 = vmul.f32 %v842_v33, %v1053_v5  ;;  %v562_v44 = vmax.f32 %v498_v35, 0.0  ;;  %v718_v47 = vunpack.c.l.bf16 %v950_v34 }
  0x18   :  { %v168_v45 = vmul.f32 %v715_v37, %v1045_v1  ;;  %v367_v46 = vmul.f32 %v843_v38, %v1053_v5  ;;  %625 = vst [vmem:[%s1623_s5 + $0x40] sm:$0xff] %v561_v40  ;;  %v500_v50 = vadd.f32 %v1074_v18, %v429_v42  ;;  %v846_v52 = vunpack.c.l.bf16 %v981_v39  ;;  %v954_v37 = vld [vmem:[%s1618_s0 + $0x58] sm:$0xff]  }
  0x19   :  { %v563_v49 = vmax.f32 %v499_v41, 0.0  ;;  %v430_v51 = vadd.f32 %v366_v43, %v167_v36  ;;  %626 = vst [vmem:[%s1623_s5 + $0x48] sm:$0xff] %v562_v44  ;;  %v169_v55 = vmul.f32 %v718_v47, %v1045_v1  ;;  %v719_v56 = vunpack.c.h.bf16 %v950_v34  ;;  %v985_v42 = vld [vmem:[%s1620_s2 + $0x58] sm:$0xff]  }
  0x1a   :  { %v431_v54 = vadd.f32 %v367_v46, %v168_v45  ;;  %v847_v57 = vunpack.c.h.bf16 %v981_v39  ;;  %v564_v58 = vmax.f32 %v500_v50, 0.0  ;;  %v368_v60 = vmul.f32 %v846_v52, %v1053_v5 }
  0x1b   :  { %627 = vst [vmem:[%s1623_s5 + $0x50] sm:$0xff] %v563_v49  ;;  %v501_v59 = vadd.f32 %v1074_v18, %v430_v51  ;;  %v722_v61 = vunpack.c.l.bf16 %v951_v48  ;;  %v170_v63 = vmul.f32 %v719_v56, %v1045_v1  ;;  %v850_v2 = vunpack.c.l.bf16 %v982_v53  ;;  %v955_v51 = vld [vmem:[%s1618_s0 + $0x60] sm:$0xff]  }
  0x1c   :  { %v502_v62 = vadd.f32 %v1074_v18, %v431_v54  ;;  %v369_v0 = vmul.f32 %v847_v57, %v1053_v5  ;;  %628 = vst [vmem:[%s1623_s5 + $0x58] sm:$0xff] %v564_v58  ;;  %v432_v7 = vadd.f32 %v368_v60, %v169_v55  ;;  %v723_v9 = vunpack.c.h.bf16 %v951_v48  ;;  %v986_v56 = vld [vmem:[%s1620_s2 + $0x60] sm:$0xff]  }
  0x1d   :  { %v565_v6 = vmax.f32 %v501_v59, 0.0  ;;  %v171_v8 = vmul.f32 %v722_v61, %v1045_v1  ;;  %v370_v12 = vmul.f32 %v850_v2, %v1053_v5  ;;  %v851_v13 = vunpack.c.h.bf16 %v982_v53 }
  0x1e   :  { %v566_v10 = vmax.f32 %v502_v62, 0.0  ;;  %v433_v11 = vadd.f32 %v369_v0, %v170_v63  ;;  %v503_v14 = vadd.f32 %v1074_v18, %v432_v7  ;;  %v172_v15 = vmul.f32 %v723_v9, %v1045_v1  ;;  %v956_v7 = vld [vmem:[%s1618_s0 + $0x68] sm:$0xff]  }
  0x1f   :  { %629 = vst [vmem:[%s1623_s5 + $0x60] sm:$0xff] %v565_v6  ;;  %v726_v16 = vunpack.c.l.bf16 %v952_v3  ;;  %v854_v17 = vunpack.c.l.bf16 %v983_v4  ;;  %v434_v20 = vadd.f32 %v370_v12, %v171_v8  ;;  %v371_v21 = vmul.f32 %v851_v13, %v1053_v5  ;;  %v987_v8 = vld [vmem:[%s1620_s2 + $0x68] sm:$0xff]  }
  0x20   :  { %630 = vst [vmem:[%s1623_s5 + $0x68] sm:$0xff] %v566_v10  ;;  %v504_v19 = vadd.f32 %v1074_v18, %v433_v11  ;;  %v727_v22 = vunpack.c.h.bf16 %v952_v3  ;;  %v567_v25 = vmax.f32 %v503_v14, 0.0  ;;  %v855_v28 = vunpack.c.h.bf16 %v983_v4 }
  0x21   :  { %v173_v26 = vmul.f32 %v726_v16, %v1045_v1  ;;  %v372_v27 = vmul.f32 %v854_v17, %v1053_v5  ;;  %v505_v30 = vadd.f32 %v1074_v18, %v434_v20  ;;  %v435_v31 = vadd.f32 %v371_v21, %v172_v15 }
  0x22   :  { %v568_v29 = vmax.f32 %v504_v19, 0.0  ;;  %v174_v32 = vmul.f32 %v727_v22, %v1045_v1  ;;  %631 = vst [vmem:[%s1623_s5 + $0x70] sm:$0xff] %v567_v25  ;;  %v373_v34 = vmul.f32 %v855_v28, %v1053_v5  ;;  %v730_v35 = vunpack.c.l.bf16 %v953_v23 }
  0x23   :  { %v436_v33 = vadd.f32 %v372_v27, %v173_v26  ;;  %v858_v36 = vunpack.c.l.bf16 %v984_v24  ;;  %v569_v38 = vmax.f32 %v505_v30, 0.0  ;;  %v506_v39 = vadd.f32 %v1074_v18, %v435_v31  ;;  %v957_v26 = vld [vmem:[%s1618_s0 + $0x70] sm:$0xff]  }
  0x24   :  { %632 = vst [vmem:[%s1623_s5 + $0x78] sm:$0xff] %v568_v29  ;;  %v731_v40 = vunpack.c.h.bf16 %v953_v23  ;;  %v859_v41 = vunpack.c.h.bf16 %v984_v24  ;;  %v437_v44 = vadd.f32 %v373_v34, %v174_v32  ;;  %v175_v45 = vmul.f32 %v730_v35, %v1045_v1  ;;  %v988_v27 = vld [vmem:[%s1620_s2 + $0x70] sm:$0xff]  }
  0x25   :  { %v507_v43 = vadd.f32 %v1074_v18, %v436_v33  ;;  %v374_v46 = vmul.f32 %v858_v36, %v1053_v5  ;;  %633 = vst [vmem:[%s1623_s5 + $0x80] sm:$0xff] %v569_v38  ;;  %v570_v47 = vmax.f32 %v506_v39, 0.0  ;;  %v734_v50 = vunpack.c.l.bf16 %v954_v37 }
  0x26   :  { %v176_v48 = vmul.f32 %v731_v40, %v1045_v1  ;;  %v375_v49 = vmul.f32 %v859_v41, %v1053_v5  ;;  %v508_v53 = vadd.f32 %v1074_v18, %v437_v44  ;;  %v862_v55 = vunpack.c.l.bf16 %v985_v42  ;;  %v958_v40 = vld [vmem:[%s1618_s0 + $0x78] sm:$0xff]  }
  0x27   :  { %v571_v52 = vmax.f32 %v507_v43, 0.0  ;;  %v438_v54 = vadd.f32 %v374_v46, %v175_v45  ;;  %634 = vst [vmem:[%s1623_s5 + $0x88] sm:$0xff] %v570_v47  ;;  %v177_v58 = vmul.f32 %v734_v50, %v1045_v1  ;;  %v735_v59 = vunpack.c.h.bf16 %v954_v37  ;;  %v989_v45 = vld [vmem:[%s1620_s2 + $0x78] sm:$0xff]  }
  0x28   :  { %v439_v57 = vadd.f32 %v375_v49, %v176_v48  ;;  %v863_v60 = vunpack.c.h.bf16 %v985_v42  ;;  %v572_v61 = vmax.f32 %v508_v53, 0.0  ;;  %v376_v63 = vmul.f32 %v862_v55, %v1053_v5 }
  0x29   :  { %635 = vst [vmem:[%s1623_s5 + $0x90] sm:$0xff] %v571_v52  ;;  %v509_v62 = vadd.f32 %v1074_v18, %v438_v54  ;;  %v738_v0 = vunpack.c.l.bf16 %v955_v51  ;;  %v178_v3 = vmul.f32 %v735_v59, %v1045_v1  ;;  %v866_v6 = vunpack.c.l.bf16 %v986_v56  ;;  %v959_v54 = vld [vmem:[%s1618_s0 + $0x80] sm:$0xff]  }
  0x2a   :  { %v510_v2 = vadd.f32 %v1074_v18, %v439_v57  ;;  %v377_v4 = vmul.f32 %v863_v60, %v1053_v5  ;;  %636 = vst [vmem:[%s1623_s5 + $0x98] sm:$0xff] %v572_v61  ;;  %v440_v10 = vadd.f32 %v376_v63, %v177_v58  ;;  %v739_v12 = vunpack.c.h.bf16 %v955_v51  ;;  %v990_v59 = vld [vmem:[%s1620_s2 + $0x80] sm:$0xff]  }
  0x2b   :  { %v573_v9 = vmax.f32 %v509_v62, 0.0  ;;  %v179_v11 = vmul.f32 %v738_v0, %v1045_v1  ;;  %v378_v15 = vmul.f32 %v866_v6, %v1053_v5  ;;  %v867_v16 = vunpack.c.h.bf16 %v986_v56 }
  0x2c   :  { %v574_v13 = vmax.f32 %v510_v2, 0.0  ;;  %v441_v14 = vadd.f32 %v377_v4, %v178_v3  ;;  %v511_v17 = vadd.f32 %v1074_v18, %v440_v10  ;;  %v180_v19 = vmul.f32 %v739_v12, %v1045_v1  ;;  %v960_v10 = vld [vmem:[%s1618_s0 + $0x88] sm:$0xff]  }
  0x2d   :  { %637 = vst [vmem:[%s1623_s5 + $0xa0] sm:$0xff] %v573_v9  ;;  %v742_v20 = vunpack.c.l.bf16 %v956_v7  ;;  %v870_v21 = vunpack.c.l.bf16 %v987_v8  ;;  %v442_v23 = vadd.f32 %v378_v15, %v179_v11  ;;  %v379_v24 = vmul.f32 %v867_v16, %v1053_v5  ;;  %v991_v11 = vld [vmem:[%s1620_s2 + $0x88] sm:$0xff]  }
  0x2e   :  { %638 = vst [vmem:[%s1623_s5 + $0xa8] sm:$0xff] %v574_v13  ;;  %v512_v22 = vadd.f32 %v1074_v18, %v441_v14  ;;  %v743_v25 = vunpack.c.h.bf16 %v956_v7  ;;  %v575_v28 = vmax.f32 %v511_v17, 0.0  ;;  %v871_v31 = vunpack.c.h.bf16 %v987_v8 }
  0x2f   :  { %v181_v29 = vmul.f32 %v742_v20, %v1045_v1  ;;  %v380_v30 = vmul.f32 %v870_v21, %v1053_v5  ;;  %v513_v33 = vadd.f32 %v1074_v18, %v442_v23  ;;  %v443_v34 = vadd.f32 %v379_v24, %v180_v19 }
  0x30   :  { %v576_v32 = vmax.f32 %v512_v22, 0.0  ;;  %v182_v35 = vmul.f32 %v743_v25, %v1045_v1  ;;  %639 = vst [vmem:[%s1623_s5 + $0xb0] sm:$0xff] %v575_v28  ;;  %v381_v37 = vmul.f32 %v871_v31, %v1053_v5  ;;  %v746_v38 = vunpack.c.l.bf16 %v957_v26 }
  0x31   :  { %v444_v36 = vadd.f32 %v380_v30, %v181_v29  ;;  %v874_v39 = vunpack.c.l.bf16 %v988_v27  ;;  %v577_v41 = vmax.f32 %v513_v33, 0.0  ;;  %v514_v42 = vadd.f32 %v1074_v18, %v443_v34  ;;  %v961_v29 = vld [vmem:[%s1618_s0 + $0x90] sm:$0xff]  }
  0x32   :  { %640 = vst [vmem:[%s1623_s5 + $0xb8] sm:$0xff] %v576_v32  ;;  %v747_v43 = vunpack.c.h.bf16 %v957_v26  ;;  %v875_v44 = vunpack.c.h.bf16 %v988_v27  ;;  %v445_v47 = vadd.f32 %v381_v37, %v182_v35  ;;  %v183_v48 = vmul.f32 %v746_v38, %v1045_v1  ;;  %v992_v30 = vld [vmem:[%s1620_s2 + $0x90] sm:$0xff]  }
  0x33   :  { %v515_v46 = vadd.f32 %v1074_v18, %v444_v36  ;;  %v382_v49 = vmul.f32 %v874_v39, %v1053_v5  ;;  %641 = vst [vmem:[%s1623_s5 + $0xc0] sm:$0xff] %v577_v41  ;;  %v578_v50 = vmax.f32 %v514_v42, 0.0  ;;  %v750_v53 = vunpack.c.l.bf16 %v958_v40 }
  0x34   :  { %v184_v51 = vmul.f32 %v747_v43, %v1045_v1  ;;  %v383_v52 = vmul.f32 %v875_v44, %v1053_v5  ;;  %v516_v56 = vadd.f32 %v1074_v18, %v445_v47  ;;  %v878_v58 = vunpack.c.l.bf16 %v989_v45  ;;  %v962_v43 = vld [vmem:[%s1618_s0 + $0x98] sm:$0xff]  }
  0x35   :  { %v579_v55 = vmax.f32 %v515_v46, 0.0  ;;  %v446_v57 = vadd.f32 %v382_v49, %v183_v48  ;;  %642 = vst [vmem:[%s1623_s5 + $0xc8] sm:$0xff] %v578_v50  ;;  %v185_v61 = vmul.f32 %v750_v53, %v1045_v1  ;;  %v751_v62 = vunpack.c.h.bf16 %v958_v40  ;;  %v993_v48 = vld [vmem:[%s1620_s2 + $0x98] sm:$0xff]  }
  0x36   :  { %v447_v60 = vadd.f32 %v383_v52, %v184_v51  ;;  %v879_v63 = vunpack.c.h.bf16 %v989_v45  ;;  %v580_v0 = vmax.f32 %v516_v56, 0.0  ;;  %v384_v3 = vmul.f32 %v878_v58, %v1053_v5 }
  0x37   :  { %643 = vst [vmem:[%s1623_s5 + $0xd0] sm:$0xff] %v579_v55  ;;  %v517_v2 = vadd.f32 %v1074_v18, %v446_v57  ;;  %v754_v4 = vunpack.c.l.bf16 %v959_v54  ;;  %v186_v7 = vmul.f32 %v751_v62, %v1045_v1  ;;  %v882_v9 = vunpack.c.l.bf16 %v990_v59  ;;  %v963_v57 = vld [vmem:[%s1618_s0 + $0xa0] sm:$0xff]  }
  0x38   :  { %v518_v6 = vadd.f32 %v1074_v18, %v447_v60  ;;  %v385_v8 = vmul.f32 %v879_v63, %v1053_v5  ;;  %644 = vst [vmem:[%s1623_s5 + $0xd8] sm:$0xff] %v580_v0  ;;  %v448_v13 = vadd.f32 %v384_v3, %v185_v61  ;;  %v755_v15 = vunpack.c.h.bf16 %v959_v54  ;;  %v994_v62 = vld [vmem:[%s1620_s2 + $0xa0] sm:$0xff]  }
  0x39   :  { %v581_v12 = vmax.f32 %v517_v2, 0.0  ;;  %v187_v14 = vmul.f32 %v754_v4, %v1045_v1  ;;  %v386_v19 = vmul.f32 %v882_v9, %v1053_v5  ;;  %v883_v20 = vunpack.c.h.bf16 %v990_v59 }
  0x3a   :  { %v582_v16 = vmax.f32 %v518_v6, 0.0  ;;  %v449_v17 = vadd.f32 %v385_v8, %v186_v7  ;;  %v519_v21 = vadd.f32 %v1074_v18, %v448_v13  ;;  %v188_v22 = vmul.f32 %v755_v15, %v1045_v1  ;;  %v964_v13 = vld [vmem:[%s1618_s0 + $0xa8] sm:$0xff]  }
  0x3b   :  { %645 = vst [vmem:[%s1623_s5 + $0xe0] sm:$0xff] %v581_v12  ;;  %v758_v23 = vunpack.c.l.bf16 %v960_v10  ;;  %v886_v24 = vunpack.c.l.bf16 %v991_v11  ;;  %v450_v26 = vadd.f32 %v386_v19, %v187_v14  ;;  %v387_v27 = vmul.f32 %v883_v20, %v1053_v5  ;;  %v995_v14 = vld [vmem:[%s1620_s2 + $0xa8] sm:$0xff]  }
  0x3c   :  { %646 = vst [vmem:[%s1623_s5 + $0xe8] sm:$0xff] %v582_v16  ;;  %v520_v25 = vadd.f32 %v1074_v18, %v449_v17  ;;  %v759_v28 = vunpack.c.h.bf16 %v960_v10  ;;  %v583_v31 = vmax.f32 %v519_v21, 0.0  ;;  %v887_v34 = vunpack.c.h.bf16 %v991_v11 }
  0x3d   :  { %v189_v32 = vmul.f32 %v758_v23, %v1045_v1  ;;  %v388_v33 = vmul.f32 %v886_v24, %v1053_v5  ;;  %v521_v36 = vadd.f32 %v1074_v18, %v450_v26  ;;  %v451_v37 = vadd.f32 %v387_v27, %v188_v22 }
  0x3e   :  { %v584_v35 = vmax.f32 %v520_v25, 0.0  ;;  %v190_v38 = vmul.f32 %v759_v28, %v1045_v1  ;;  %647 = vst [vmem:[%s1623_s5 + $0xf0] sm:$0xff] %v583_v31  ;;  %v389_v40 = vmul.f32 %v887_v34, %v1053_v5  ;;  %v762_v41 = vunpack.c.l.bf16 %v961_v29 }
  0x3f   :  { %v452_v39 = vadd.f32 %v388_v33, %v189_v32  ;;  %v890_v42 = vunpack.c.l.bf16 %v992_v30  ;;  %v585_v44 = vmax.f32 %v521_v36, 0.0  ;;  %v522_v45 = vadd.f32 %v1074_v18, %v451_v37  ;;  %v965_v32 = vld [vmem:[%s1618_s0 + $0xb0] sm:$0xff]  }
  0x40   :  { %648 = vst [vmem:[%s1623_s5 + $0xf8] sm:$0xff] %v584_v35  ;;  %v763_v46 = vunpack.c.h.bf16 %v961_v29  ;;  %v891_v47 = vunpack.c.h.bf16 %v992_v30  ;;  %v453_v50 = vadd.f32 %v389_v40, %v190_v38  ;;  %v191_v51 = vmul.f32 %v762_v41, %v1045_v1  ;;  %v996_v33 = vld [vmem:[%s1620_s2 + $0xb0] sm:$0xff]  }
  0x41   :  { %v523_v49 = vadd.f32 %v1074_v18, %v452_v39  ;;  %v390_v52 = vmul.f32 %v890_v42, %v1053_v5  ;;  %649 = vst [vmem:[%s1623_s5 + $0x100] sm:$0xff] %v585_v44  ;;  %v586_v53 = vmax.f32 %v522_v45, 0.0  ;;  %v766_v56 = vunpack.c.l.bf16 %v962_v43 }
  0x42   :  { %v192_v54 = vmul.f32 %v763_v46, %v1045_v1  ;;  %v391_v55 = vmul.f32 %v891_v47, %v1053_v5  ;;  %v524_v59 = vadd.f32 %v1074_v18, %v453_v50  ;;  %v894_v61 = vunpack.c.l.bf16 %v993_v48  ;;  %v966_v46 = vld [vmem:[%s1618_s0 + $0xb8] sm:$0xff]  }
  0x43   :  { %v587_v58 = vmax.f32 %v523_v49, 0.0  ;;  %v454_v60 = vadd.f32 %v390_v52, %v191_v51  ;;  %650 = vst [vmem:[%s1623_s5 + $0x108] sm:$0xff] %v586_v53  ;;  %v193_v0 = vmul.f32 %v766_v56, %v1045_v1  ;;  %v767_v2 = vunpack.c.h.bf16 %v962_v43  ;;  %v997_v51 = vld [vmem:[%s1620_s2 + $0xb8] sm:$0xff]  }
  0x44   :  { %v455_v63 = vadd.f32 %v391_v55, %v192_v54  ;;  %v895_v3 = vunpack.c.h.bf16 %v993_v48  ;;  %v588_v4 = vmax.f32 %v524_v59, 0.0  ;;  %v392_v7 = vmul.f32 %v894_v61, %v1053_v5 }
  0x45   :  { %651 = vst [vmem:[%s1623_s5 + $0x110] sm:$0xff] %v587_v58  ;;  %v525_v6 = vadd.f32 %v1074_v18, %v454_v60  ;;  %v770_v8 = vunpack.c.l.bf16 %v963_v57  ;;  %v194_v10 = vmul.f32 %v767_v2, %v1045_v1  ;;  %v898_v12 = vunpack.c.l.bf16 %v994_v62  ;;  %v967_v60 = vld [vmem:[%s1618_s0 + $0xc0] sm:$0xff]  }
  0x46   :  { %v526_v9 = vadd.f32 %v1074_v18, %v455_v63  ;;  %v393_v11 = vmul.f32 %v895_v3, %v1053_v5  ;;  %652 = vst [vmem:[%s1623_s5 + $0x118] sm:$0xff] %v588_v4  ;;  %v456_v16 = vadd.f32 %v392_v7, %v193_v0  ;;  %v771_v19 = vunpack.c.h.bf16 %v963_v57  ;;  %v998_v2 = vld [vmem:[%s1620_s2 + $0xc0] sm:$0xff]  }
  0x47   :  { %v589_v15 = vmax.f32 %v525_v6, 0.0  ;;  %v195_v17 = vmul.f32 %v770_v8, %v1045_v1  ;;  %v394_v22 = vmul.f32 %v898_v12, %v1053_v5  ;;  %v899_v23 = vunpack.c.h.bf16 %v994_v62 }
  0x48   :  { %v590_v20 = vmax.f32 %v526_v9, 0.0  ;;  %v457_v21 = vadd.f32 %v393_v11, %v194_v10  ;;  %v527_v24 = vadd.f32 %v1074_v18, %v456_v16  ;;  %v196_v25 = vmul.f32 %v771_v19, %v1045_v1  ;;  %v968_v16 = vld [vmem:[%s1618_s0 + $0xc8] sm:$0xff]  }
  0x49   :  { %653 = vst [vmem:[%s1623_s5 + $0x120] sm:$0xff] %v589_v15  ;;  %v774_v26 = vunpack.c.l.bf16 %v964_v13  ;;  %v902_v27 = vunpack.c.l.bf16 %v995_v14  ;;  %v458_v29 = vadd.f32 %v394_v22, %v195_v17  ;;  %v395_v30 = vmul.f32 %v899_v23, %v1053_v5  ;;  %v999_v17 = vld [vmem:[%s1620_s2 + $0xc8] sm:$0xff]  }
  0x4a   :  { %654 = vst [vmem:[%s1623_s5 + $0x128] sm:$0xff] %v590_v20  ;;  %v528_v28 = vadd.f32 %v1074_v18, %v457_v21  ;;  %v775_v31 = vunpack.c.h.bf16 %v964_v13  ;;  %v591_v34 = vmax.f32 %v527_v24, 0.0  ;;  %v903_v37 = vunpack.c.h.bf16 %v995_v14 }
  0x4b   :  { %v197_v35 = vmul.f32 %v774_v26, %v1045_v1  ;;  %v396_v36 = vmul.f32 %v902_v27, %v1053_v5  ;;  %v529_v39 = vadd.f32 %v1074_v18, %v458_v29  ;;  %v459_v40 = vadd.f32 %v395_v30, %v196_v25 }
  0x4c   :  { %v592_v38 = vmax.f32 %v528_v28, 0.0  ;;  %v198_v41 = vmul.f32 %v775_v31, %v1045_v1  ;;  %655 = vst [vmem:[%s1623_s5 + $0x130] sm:$0xff] %v591_v34  ;;  %v397_v43 = vmul.f32 %v903_v37, %v1053_v5  ;;  %v778_v44 = vunpack.c.l.bf16 %v965_v32 }
  0x4d   :  { %v460_v42 = vadd.f32 %v396_v36, %v197_v35  ;;  %v906_v45 = vunpack.c.l.bf16 %v996_v33  ;;  %v593_v47 = vmax.f32 %v529_v39, 0.0  ;;  %v530_v48 = vadd.f32 %v1074_v18, %v459_v40  ;;  %v969_v35 = vld [vmem:[%s1618_s0 + $0xd0] sm:$0xff]  }
  0x4e   :  { %656 = vst [vmem:[%s1623_s5 + $0x138] sm:$0xff] %v592_v38  ;;  %v779_v49 = vunpack.c.h.bf16 %v965_v32  ;;  %v907_v50 = vunpack.c.h.bf16 %v996_v33  ;;  %v461_v53 = vadd.f32 %v397_v43, %v198_v41  ;;  %v199_v54 = vmul.f32 %v778_v44, %v1045_v1  ;;  %v1000_v36 = vld [vmem:[%s1620_s2 + $0xd0] sm:$0xff]  }
  0x4f   :  { %v531_v52 = vadd.f32 %v1074_v18, %v460_v42  ;;  %v398_v55 = vmul.f32 %v906_v45, %v1053_v5  ;;  %657 = vst [vmem:[%s1623_s5 + $0x140] sm:$0xff] %v593_v47  ;;  %v594_v56 = vmax.f32 %v530_v48, 0.0  ;;  %v782_v59 = vunpack.c.l.bf16 %v966_v46 }
  0x50   :  { %v200_v57 = vmul.f32 %v779_v49, %v1045_v1  ;;  %v399_v58 = vmul.f32 %v907_v50, %v1053_v5  ;;  %v532_v62 = vadd.f32 %v1074_v18, %v461_v53  ;;  %v910_v0 = vunpack.c.l.bf16 %v997_v51  ;;  %v970_v49 = vld [vmem:[%s1618_s0 + $0xd8] sm:$0xff]  }
  0x51   :  { %v595_v61 = vmax.f32 %v531_v52, 0.0  ;;  %v462_v63 = vadd.f32 %v398_v55, %v199_v54  ;;  %658 = vst [vmem:[%s1623_s5 + $0x148] sm:$0xff] %v594_v56  ;;  %v201_v4 = vmul.f32 %v782_v59, %v1045_v1  ;;  %v783_v6 = vunpack.c.h.bf16 %v966_v46  ;;  %v1001_v54 = vld [vmem:[%s1620_s2 + $0xd8] sm:$0xff]  }
  0x52   :  { %v463_v3 = vadd.f32 %v399_v58, %v200_v57  ;;  %v911_v7 = vunpack.c.h.bf16 %v997_v51  ;;  %v596_v8 = vmax.f32 %v532_v62, 0.0  ;;  %v400_v10 = vmul.f32 %v910_v0, %v1053_v5 }
  0x53   :  { %659 = vst [vmem:[%s1623_s5 + $0x150] sm:$0xff] %v595_v61  ;;  %v533_v9 = vadd.f32 %v1074_v18, %v462_v63  ;;  %v786_v11 = vunpack.c.l.bf16 %v967_v60  ;;  %v202_v13 = vmul.f32 %v783_v6, %v1045_v1  ;;  %v914_v15 = vunpack.c.l.bf16 %v998_v2  ;;  %v971_v63 = vld [vmem:[%s1618_s0 + $0xe0] sm:$0xff]  }
  0x54   :  { %v534_v12 = vadd.f32 %v1074_v18, %v463_v3  ;;  %v401_v14 = vmul.f32 %v911_v7, %v1053_v5  ;;  %660 = vst [vmem:[%s1623_s5 + $0x158] sm:$0xff] %v596_v8  ;;  %v464_v20 = vadd.f32 %v400_v10, %v201_v4  ;;  %v787_v22 = vunpack.c.h.bf16 %v967_v60  ;;  %v1002_v6 = vld [vmem:[%s1620_s2 + $0xe0] sm:$0xff]  }
  0x55   :  { %v597_v19 = vmax.f32 %v533_v9, 0.0  ;;  %v203_v21 = vmul.f32 %v786_v11, %v1045_v1  ;;  %v402_v25 = vmul.f32 %v914_v15, %v1053_v5  ;;  %v915_v26 = vunpack.c.h.bf16 %v998_v2 }
  0x56   :  { %v598_v23 = vmax.f32 %v534_v12, 0.0  ;;  %v465_v24 = vadd.f32 %v401_v14, %v202_v13  ;;  %v535_v27 = vadd.f32 %v1074_v18, %v464_v20  ;;  %v204_v28 = vmul.f32 %v787_v22, %v1045_v1  ;;  %v972_v20 = vld [vmem:[%s1618_s0 + $0xe8] sm:$0xff]  }
  0x57   :  { %661 = vst [vmem:[%s1623_s5 + $0x160] sm:$0xff] %v597_v19  ;;  %v790_v29 = vunpack.c.l.bf16 %v968_v16  ;;  %v918_v30 = vunpack.c.l.bf16 %v999_v17  ;;  %v466_v32 = vadd.f32 %v402_v25, %v203_v21  ;;  %v403_v33 = vmul.f32 %v915_v26, %v1053_v5  ;;  %v1003_v21 = vld [vmem:[%s1620_s2 + $0xe8] sm:$0xff]  }
  0x58   :  { %662 = vst [vmem:[%s1623_s5 + $0x168] sm:$0xff] %v598_v23  ;;  %v536_v31 = vadd.f32 %v1074_v18, %v465_v24  ;;  %v791_v34 = vunpack.c.h.bf16 %v968_v16  ;;  %v599_v37 = vmax.f32 %v535_v27, 0.0  ;;  %v919_v40 = vunpack.c.h.bf16 %v999_v17 }
  0x59   :  { %v205_v38 = vmul.f32 %v790_v29, %v1045_v1  ;;  %v404_v39 = vmul.f32 %v918_v30, %v1053_v5  ;;  %v537_v42 = vadd.f32 %v1074_v18, %v466_v32  ;;  %v467_v43 = vadd.f32 %v403_v33, %v204_v28 }
  0x5a   :  { %v600_v41 = vmax.f32 %v536_v31, 0.0  ;;  %v206_v44 = vmul.f32 %v791_v34, %v1045_v1  ;;  %663 = vst [vmem:[%s1623_s5 + $0x170] sm:$0xff] %v599_v37  ;;  %v405_v46 = vmul.f32 %v919_v40, %v1053_v5  ;;  %v794_v47 = vunpack.c.l.bf16 %v969_v35  ;;  %v1006_v31 = vld [vmem:[%s1619_s1] ss:$0 sm:$0xff] }
  0x5b   :  { %v468_v45 = vadd.f32 %v404_v39, %v205_v38  ;;  %v922_v48 = vunpack.c.l.bf16 %v1000_v36  ;;  %v601_v50 = vmax.f32 %v537_v42, 0.0  ;;  %v538_v51 = vadd.f32 %v1074_v18, %v467_v43  ;;  %v973_v38 = vld [vmem:[%s1618_s0 + $0xf0] sm:$0xff]  }
  0x5c   :  { %664 = vst [vmem:[%s1623_s5 + $0x178] sm:$0xff] %v600_v41  ;;  %v795_v52 = vunpack.c.h.bf16 %v969_v35  ;;  %v923_v53 = vunpack.c.h.bf16 %v1000_v36  ;;  %v469_v56 = vadd.f32 %v405_v46, %v206_v44  ;;  %v207_v57 = vmul.f32 %v794_v47, %v1045_v1  ;;  %v1007_v35 = vld [vmem:[%s1621_s3] ss:$0 sm:$0xff]  ;;  %v1004_v39 = vld [vmem:[%s1620_s2 + $0xf0] sm:$0xff]  }
  0x5d   :  { %v539_v55 = vadd.f32 %v1074_v18, %v468_v45  ;;  %v406_v58 = vmul.f32 %v922_v48, %v1053_v5  ;;  %665 = vst [vmem:[%s1623_s5 + $0x180] sm:$0xff] %v601_v50  ;;  %v602_v59 = vmax.f32 %v538_v51, 0.0  ;;  %v798_v62 = vunpack.c.l.bf16 %v970_v49 }
  0x5e   :  { %v208_v60 = vmul.f32 %v795_v52, %v1045_v1  ;;  %v407_v61 = vmul.f32 %v923_v53, %v1053_v5  ;;  %v540_v2 = vadd.f32 %v1074_v18, %v469_v56  ;;  %v926_v4 = vunpack.c.l.bf16 %v1001_v54  ;;  %v974_v52 = vld [vmem:[%s1618_s0 + $0xf8] sm:$0xff]  }
  0x5f   :  { %v603_v0 = vmax.f32 %v539_v55, 0.0  ;;  %v470_v3 = vadd.f32 %v406_v58, %v207_v57  ;;  %666 = vst [vmem:[%s1623_s5 + $0x188] sm:$0xff] %v602_v59  ;;  %v209_v8 = vmul.f32 %v798_v62, %v1045_v1  ;;  %v799_v9 = vunpack.c.h.bf16 %v970_v49  ;;  %v1005_v57 = vld [vmem:[%s1620_s2 + $0xf8] sm:$0xff]  }
  0x60   :  { %v471_v7 = vadd.f32 %v407_v61, %v208_v60  ;;  %v927_v10 = vunpack.c.h.bf16 %v1001_v54  ;;  %v604_v11 = vmax.f32 %v540_v2, 0.0  ;;  %v408_v13 = vmul.f32 %v926_v4, %v1053_v5 }
  0x61   :  { %667 = vst [vmem:[%s1623_s5 + $0x190] sm:$0xff] %v603_v0  ;;  %v541_v12 = vadd.f32 %v1074_v18, %v470_v3  ;;  %v802_v14 = vunpack.c.l.bf16 %v971_v63  ;;  %v210_v16 = vmul.f32 %v799_v9, %v1045_v1  ;;  %v930_v19 = vunpack.c.l.bf16 %v1002_v6 }
  0x62   :  { %v542_v15 = vadd.f32 %v1074_v18, %v471_v7  ;;  %v409_v17 = vmul.f32 %v927_v10, %v1053_v5  ;;  %668 = vst [vmem:[%s1623_s5 + $0x198] sm:$0xff] %v604_v11  ;;  %v472_v23 = vadd.f32 %v408_v13, %v209_v8  ;;  %v803_v25 = vunpack.c.h.bf16 %v971_v63 }
  0x63   :  { %v605_v22 = vmax.f32 %v541_v12, 0.0  ;;  %v211_v24 = vmul.f32 %v802_v14, %v1045_v1  ;;  %v410_v28 = vmul.f32 %v930_v19, %v1053_v5  ;;  %v931_v29 = vunpack.c.h.bf16 %v1002_v6 }
  0x64   :  { %v606_v26 = vmax.f32 %v542_v15, 0.0  ;;  %v473_v27 = vadd.f32 %v409_v17, %v210_v16  ;;  %v543_v30 = vadd.f32 %v1074_v18, %v472_v23  ;;  %v212_v32 = vmul.f32 %v1006_v31, %v803_v25 }
  0x65   :  { %669 = vst [vmem:[%s1623_s5 + $0x1a0] sm:$0xff] %v605_v22  ;;  %v806_v33 = vunpack.c.l.bf16 %v972_v20  ;;  %v934_v34 = vunpack.c.l.bf16 %v1003_v21  ;;  %v474_v5 = vadd.f32 %v410_v28, %v211_v24  ;;  %v411_v36 = vmul.f32 %v1007_v35, %v931_v29 }
  0x66   :  { %670 = vst [vmem:[%s1623_s5 + $0x1a8] sm:$0xff] %v606_v26  ;;  %v544_v1 = vadd.f32 %v1074_v18, %v473_v27  ;;  %v807_v37 = vunpack.c.h.bf16 %v972_v20  ;;  %v607_v40 = vmax.f32 %v543_v30, 0.0  ;;  %v935_v43 = vunpack.c.h.bf16 %v1003_v21 }
  0x67   :  { %v213_v41 = vmul.f32 %v1006_v31, %v806_v33  ;;  %v412_v42 = vmul.f32 %v1007_v35, %v934_v34  ;;  %v545_v45 = vadd.f32 %v1074_v18, %v474_v5  ;;  %v475_v46 = vadd.f32 %v411_v36, %v212_v32  ;;  %v1008_v18 = vld [vmem:[%s1622_s4] ss:$0 sm:$0xff] }
  0x68   :  { %v608_v44 = vmax.f32 %v544_v1, 0.0  ;;  %v214_v47 = vmul.f32 %v1006_v31, %v807_v37  ;;  %671 = vst [vmem:[%s1623_s5 + $0x1b0] sm:$0xff] %v607_v40  ;;  %v413_v49 = vmul.f32 %v1007_v35, %v935_v43  ;;  %v810_v50 = vunpack.c.l.bf16 %v973_v38 }
  0x69   :  { %v476_v48 = vadd.f32 %v412_v42, %v213_v41  ;;  %v938_v51 = vunpack.c.l.bf16 %v1004_v39  ;;  %v609_v53 = vmax.f32 %v545_v45, 0.0  ;;  %v546_v54 = vadd.f32 %v1008_v18, %v475_v46 }
  0x6a   :  { %672 = vst [vmem:[%s1623_s5 + $0x1b8] sm:$0xff] %v608_v44  ;;  %v811_v55 = vunpack.c.h.bf16 %v973_v38  ;;  %v939_v56 = vunpack.c.h.bf16 %v1004_v39  ;;  %v477_v59 = vadd.f32 %v413_v49, %v214_v47  ;;  %v215_v60 = vmul.f32 %v1006_v31, %v810_v50 }
  0x6b   :  { %v547_v58 = vadd.f32 %v1008_v18, %v476_v48  ;;  %v414_v61 = vmul.f32 %v1007_v35, %v938_v51  ;;  %673 = vst [vmem:[%s1623_s5 + $0x1c0] sm:$0xff] %v609_v53  ;;  %v610_v62 = vmax.f32 %v546_v54, 0.0  ;;  %v814_v2 = vunpack.c.l.bf16 %v974_v52 }
  0x6c   :  { %v216_v63 = vmul.f32 %v1006_v31, %v811_v55  ;;  %v415_v0 = vmul.f32 %v1007_v35, %v939_v56  ;;  %v548_v4 = vadd.f32 %v1008_v18, %v477_v59  ;;  %v942_v7 = vunpack.c.l.bf16 %v1005_v57 }
  0x6d   :  { %v611_v3 = vmax.f32 %v547_v58, 0.0  ;;  %v478_v6 = vadd.f32 %v414_v61, %v215_v60  ;;  %674 = vst [vmem:[%s1623_s5 + $0x1c8] sm:$0xff] %v610_v62  ;;  %v217_v9 = vmul.f32 %v1006_v31, %v814_v2  ;;  %v815_v10 = vunpack.c.h.bf16 %v974_v52 }
  0x6e   :  { %v479_v8 = vadd.f32 %v415_v0, %v216_v63  ;;  %v943_v11 = vunpack.c.h.bf16 %v1005_v57  ;;  %v612_v12 = vmax.f32 %v548_v4, 0.0  ;;  %v416_v14 = vmul.f32 %v1007_v35, %v942_v7 }
  0x6f   :  { %675 = vst [vmem:[%s1623_s5 + $0x1d0] sm:$0xff] %v611_v3  ;;  %v549_v13 = vadd.f32 %v1008_v18, %v478_v6  ;;  %v218_v16 = vmul.f32 %v1006_v31, %v815_v10 }
  0x70   :  { %v550_v15 = vadd.f32 %v1008_v18, %v479_v8  ;;  %v417_v17 = vmul.f32 %v1007_v35, %v943_v11  ;;  %676 = vst [vmem:[%s1623_s5 + $0x1d8] sm:$0xff] %v612_v12  ;;  %v480_v20 = vadd.f32 %v416_v14, %v217_v9 }
  0x71   :  { %v613_v19 = vmax.f32 %v549_v13, 0.0 }
  0x72   :  { %v614_v21 = vmax.f32 %v550_v15, 0.0  ;;  %v481_v22 = vadd.f32 %v417_v17, %v218_v16  ;;  %v551_v23 = vadd.f32 %v1008_v18, %v480_v20 }
  0x73   :  { %677 = vst [vmem:[%s1623_s5 + $0x1e0] sm:$0xff] %v613_v19 }
  0x74   :  { %678 = vst [vmem:[%s1623_s5 + $0x1e8] sm:$0xff] %v614_v21  ;;  %v552_v24 = vadd.f32 %v1008_v18, %v481_v22  ;;  %v615_v25 = vmax.f32 %v551_v23, 0.0 }
  0x76   :  { %v616_v26 = vmax.f32 %v552_v24, 0.0  ;;  %679 = vst [vmem:[%s1623_s5 + $0x1f0] sm:$0xff] %v615_v25 }
  0x78   :  { %680 = vst [vmem:[%s1623_s5 + $0x1f8] sm:$0xff] %v616_v26 }

// kernel: residual_block_forward.6
= control target key start
LH: loop header
LB: loop body
LE: loop exit
PB: predicated region body
PF: predicated region fallthrough
CT: control target
= control target key end

     0   :  { %s3888_s1 = inlined_call_operand.vmem [shape: bf16[128,128], index: 1, kind: input, shape index: {}]   ;;  %s3889_s3 = inlined_call_operand.vmem [shape: bf16[128,128], index: 3, kind: input, shape index: {}]   ;;  %s3890_s0 = inlined_call_operand.vmem [shape: bf16[512,128], index: 0, kind: input, shape index: {}]   ;;  %s3891_s2 = inlined_call_operand.vmem [shape: bf16[512,128], index: 2, kind: input, shape index: {}]   ;;  %s3892_s6 = inlined_call_operand.vmem [shape: f32[1,128], index: 6, kind: output, shape index: {2}]   ;;  %s3893_s7 = inlined_call_operand.vmem [shape: f32[1,128], index: 7, kind: output, shape index: {3}]   ;;  %s3894_s4 = inlined_call_operand.vmem [shape: bf16[512,128], index: 4, kind: output, shape index: {0}]   ;;  %s3895_s5 = inlined_call_operand.vmem [shape: bf16[512,128], index: 5, kind: output, shape index: {1}]   ;;  %s3896_s8 = inlined_call_operand.vmem [shape: f32[1,128], index: 8, kind: output, shape index: {4}]   ;;  %s3897_s9 = inlined_call_operand.vmem [shape: f32[1,128], index: 9, kind: output, shape index: {5}]  }
   0x1   :  { %v3289_v0 = vld [vmem:[%s3888_s1] sm:$0xff]   ;;  %v3291_v2 = vld [vmem:[%s3888_s1 + $0x8] sm:$0xff]   ;;  %v3293_v4 = vld [vmem:[%s3888_s1 + $0x10] sm:$0xff]  }
   0x2   :  { %v3290_v1 = vld [vmem:[%s3889_s3] sm:$0xff]   ;;  %3128 = vmatprep.subr.bf16.mxu0 %v3289_v0  ;;  %v3292_v3 = vld [vmem:[%s3889_s3 + $0x8] sm:$0xff]   ;;  %v3294_v5 = vld [vmem:[%s3889_s3 + $0x10] sm:$0xff]  }
   0x3   :  { %3208 = vmatprep.subr.bf16.mxu1 %v3290_v1  ;;  %3129 = vmatpush3.bf16.msra.mxu0 %v3289_v0  ;;  %v3295_v6 = vld [vmem:[%s3888_s1 + $0x18] sm:$0xff]   ;;  %v3297_v8 = vld [vmem:[%s3888_s1 + $0x20] sm:$0xff]   ;;  %v3299_v10 = vld [vmem:[%s3888_s1 + $0x28] sm:$0xff]  }
   0x4   :  { %3209 = vmatpush3.bf16.msra.mxu1 %v3290_v1  ;;  %3130 = vmatprep.subr.bf16.mxu0 %v3291_v2  ;;  %v3296_v7 = vld [vmem:[%s3889_s3 + $0x18] sm:$0xff]   ;;  %v3298_v9 = vld [vmem:[%s3889_s3 + $0x20] sm:$0xff]   ;;  %v3300_v11 = vld [vmem:[%s3889_s3 + $0x28] sm:$0xff]  }
   0x5   :  { %3210 = vmatprep.subr.bf16.mxu1 %v3292_v3  ;;  %v3305_v12 = vld [vmem:[%s3890_s0] sm:$0xff]   ;;  %v3301_v14 = vld [vmem:[%s3888_s1 + $0x30] sm:$0xff]   ;;  %v3303_v16 = vld [vmem:[%s3888_s1 + $0x38] sm:$0xff]  }
   0x6   :  { %v3306_v13 = vld [vmem:[%s3891_s2] sm:$0xff]   ;;  %3144 = vmatprep.mubr.bf16.mxu0 %v3305_v12  ;;  %v3302_v15 = vld [vmem:[%s3889_s3 + $0x30] sm:$0xff]   ;;  %v3304_v17 = vld [vmem:[%s3889_s3 + $0x38] sm:$0xff]  }
   0x7   :  { %3131 = vmatpush3.bf16.msra.mxu0 %v3291_v2  ;;  %3224 = vmatprep.mubr.bf16.mxu1 %v3306_v13  ;;  %v3307_v18 = vld [vmem:[%s3890_s0 + $0x8] sm:$0xff]   ;;  %v3309_v20 = vld [vmem:[%s3890_s0 + $0x10] sm:$0xff]   ;;  %v3311_v22 = vld [vmem:[%s3890_s0 + $0x18] sm:$0xff]  }
   0x8   :  { %3211 = vmatpush3.bf16.msra.mxu1 %v3292_v3  ;;  %3132 = vmatprep.subr.bf16.mxu0 %v3293_v4  ;;  %v3308_v19 = vld [vmem:[%s3891_s2 + $0x8] sm:$0xff]   ;;  %v3310_v21 = vld [vmem:[%s3891_s2 + $0x10] sm:$0xff]   ;;  %v3312_v23 = vld [vmem:[%s3891_s2 + $0x18] sm:$0xff]  }
   0x9   :  { %3212 = vmatprep.subr.bf16.mxu1 %v3294_v5  ;;  %v3313_v24 = vld [vmem:[%s3890_s0 + $0x20] sm:$0xff]   ;;  %v3315_v26 = vld [vmem:[%s3890_s0 + $0x28] sm:$0xff]   ;;  %v3317_v28 = vld [vmem:[%s3890_s0 + $0x30] sm:$0xff]  }
   0xa   :  { %v3314_v25 = vld [vmem:[%s3891_s2 + $0x20] sm:$0xff]   ;;  %v3316_v27 = vld [vmem:[%s3891_s2 + $0x28] sm:$0xff]   ;;  %v3318_v29 = vld [vmem:[%s3891_s2 + $0x30] sm:$0xff]  }
   0xb   :  { %3133 = vmatpush3.bf16.msra.mxu0 %v3293_v4  ;;  %v3319_v30 = vld [vmem:[%s3890_s0 + $0x38] sm:$0xff]   ;;  %v3321_v32 = vld [vmem:[%s3890_s0 + $0x40] sm:$0xff]   ;;  %v3323_v34 = vld [vmem:[%s3890_s0 + $0x48] sm:$0xff]  }
   0xc   :  { %3213 = vmatpush3.bf16.msra.mxu1 %v3294_v5  ;;  %3134 = vmatprep.subr.bf16.mxu0 %v3295_v6  ;;  %v3320_v31 = vld [vmem:[%s3891_s2 + $0x38] sm:$0xff]   ;;  %v3322_v33 = vld [vmem:[%s3891_s2 + $0x40] sm:$0xff]   ;;  %v3324_v35 = vld [vmem:[%s3891_s2 + $0x48] sm:$0xff]  }
   0xd   :  { %3214 = vmatprep.subr.bf16.mxu1 %v3296_v7  ;;  %v3325_v36 = vld [vmem:[%s3890_s0 + $0x50] sm:$0xff]   ;;  %v3327_v38 = vld [vmem:[%s3890_s0 + $0x58] sm:$0xff]   ;;  %v3329_v40 = vld [vmem:[%s3890_s0 + $0x60] sm:$0xff]  }
   0xe   :  { %v3326_v37 = vld [vmem:[%s3891_s2 + $0x50] sm:$0xff]   ;;  %v3328_v39 = vld [vmem:[%s3891_s2 + $0x58] sm:$0xff]   ;;  %v3330_v41 = vld [vmem:[%s3891_s2 + $0x60] sm:$0xff]  }
   0xf   :  { %3135 = vmatpush3.bf16.msra.mxu0 %v3295_v6  ;;  %v3331_v42 = vld [vmem:[%s3890_s0 + $0x68] sm:$0xff]   ;;  %v3333_v44 = vld [vmem:[%s3890_s0 + $0x70] sm:$0xff]   ;;  %v3335_v46 = vld [vmem:[%s3890_s0 + $0x78] sm:$0xff]  }
  0x10   :  { %3215 = vmatpush3.bf16.msra.mxu1 %v3296_v7  ;;  %3136 = vmatprep.subr.bf16.mxu0 %v3297_v8  ;;  %v3332_v43 = vld [vmem:[%s3891_s2 + $0x68] sm:$0xff]   ;;  %v3334_v45 = vld [vmem:[%s3891_s2 + $0x70] sm:$0xff]   ;;  %v3336_v47 = vld [vmem:[%s3891_s2 + $0x78] sm:$0xff]  }
  0x11   :  { %3216 = vmatprep.subr.bf16.mxu1 %v3298_v9  ;;  %v3337_v48 = vld [vmem:[%s3890_s0 + $0x80] sm:$0xff]   ;;  %v3339_v50 = vld [vmem:[%s3890_s0 + $0x88] sm:$0xff]   ;;  %v3341_v52 = vld [vmem:[%s3890_s0 + $0x90] sm:$0xff]  }
  0x12   :  { %v3338_v49 = vld [vmem:[%s3891_s2 + $0x80] sm:$0xff]   ;;  %v3340_v51 = vld [vmem:[%s3891_s2 + $0x88] sm:$0xff]   ;;  %v3342_v53 = vld [vmem:[%s3891_s2 + $0x90] sm:$0xff]  }
  0x13   :  { %3137 = vmatpush3.bf16.msra.mxu0 %v3297_v8  ;;  %v3343_v54 = vld [vmem:[%s3890_s0 + $0x98] sm:$0xff]   ;;  %v3345_v56 = vld [vmem:[%s3890_s0 + $0xa0] sm:$0xff]   ;;  %v3347_v58 = vld [vmem:[%s3890_s0 + $0xa8] sm:$0xff]  }
  0x14   :  { %3217 = vmatpush3.bf16.msra.mxu1 %v3298_v9  ;;  %3138 = vmatprep.subr.bf16.mxu0 %v3299_v10  ;;  %v3344_v55 = vld [vmem:[%s3891_s2 + $0x98] sm:$0xff]   ;;  %v3346_v57 = vld [vmem:[%s3891_s2 + $0xa0] sm:$0xff]   ;;  %v3348_v59 = vld [vmem:[%s3891_s2 + $0xa8] sm:$0xff]  }
  0x15   :  { %3218 = vmatprep.subr.bf16.mxu1 %v3300_v11  ;;  %v3349_v60 = vld [vmem:[%s3890_s0 + $0xb0] sm:$0xff]   ;;  %v3351_v62 = vld [vmem:[%s3890_s0 + $0xb8] sm:$0xff]   ;;  %v3353_v0 = vld [vmem:[%s3890_s0 + $0xc0] sm:$0xff]  }
  0x16   :  { %v3350_v61 = vld [vmem:[%s3891_s2 + $0xb0] sm:$0xff]   ;;  %v3352_v63 = vld [vmem:[%s3891_s2 + $0xb8] sm:$0xff]   ;;  %v3354_v1 = vld [vmem:[%s3891_s2 + $0xc0] sm:$0xff]  }
  0x17   :  { %3139 = vmatpush3.bf16.msra.mxu0 %v3299_v10  ;;  %v3355_v2 = vld [vmem:[%s3890_s0 + $0xc8] sm:$0xff]   ;;  %v3357_v4 = vld [vmem:[%s3890_s0 + $0xd0] sm:$0xff]   ;;  %v3359_v6 = vld [vmem:[%s3890_s0 + $0xd8] sm:$0xff]  }
  0x18   :  { %3219 = vmatpush3.bf16.msra.mxu1 %v3300_v11  ;;  %3140 = vmatprep.subr.bf16.mxu0 %v3301_v14  ;;  %v3356_v3 = vld [vmem:[%s3891_s2 + $0xc8] sm:$0xff]   ;;  %v3358_v5 = vld [vmem:[%s3891_s2 + $0xd0] sm:$0xff]   ;;  %v3360_v7 = vld [vmem:[%s3891_s2 + $0xd8] sm:$0xff]  }
  0x19   :  { %3220 = vmatprep.subr.bf16.mxu1 %v3302_v15  ;;  %v3361_v8 = vld [vmem:[%s3890_s0 + $0xe0] sm:$0xff]   ;;  %v3363_v10 = vld [vmem:[%s3890_s0 + $0xe8] sm:$0xff]   ;;  %v3365_v12 = vld [vmem:[%s3890_s0 + $0xf0] sm:$0xff]  }
  0x1a   :  { %v3362_v9 = vld [vmem:[%s3891_s2 + $0xe0] sm:$0xff]   ;;  %v3364_v11 = vld [vmem:[%s3891_s2 + $0xe8] sm:$0xff]   ;;  %v3366_v13 = vld [vmem:[%s3891_s2 + $0xf0] sm:$0xff]  }
  0x1b   :  { %3141 = vmatpush3.bf16.msra.mxu0 %v3301_v14  ;;  %v3367_v14 = vld [vmem:[%s3890_s0 + $0xf8] sm:$0xff]  }
  0x1c   :  { %3221 = vmatpush3.bf16.msra.mxu1 %v3302_v15  ;;  %3142 = vmatprep.subr.bf16.mxu0 %v3303_v16  ;;  %v3368_v15 = vld [vmem:[%s3891_s2 + $0xf8] sm:$0xff]  }
  0x1d   :  { %3222 = vmatprep.subr.bf16.mxu1 %v3304_v17 }
  0x1f   :  { %3143 = vmatpush3.bf16.msra.mxu0 %v3303_v16 }
  0x20   :  { %3223 = vmatpush3.bf16.msra.mxu1 %v3304_v17  ;;  %v3369_v17 = vmov 0.0  }
  0x21   :  { %28 = vst [vmem:[%s3892_s6] sm:$0x1] %v3369_v17  ;;  %29 = vst [vmem:[%s3893_s7] sm:$0x1] %v3369_v17 }
  0x22   :  { %3145 = vmatmul.mubr.bf16.vlgmr.msra.gmra.mrb[0].mxu0 %v3307_v18  ;;  %30 = vst [vmem:[%s3896_s8] sm:$0x1] %v3369_v17  ;;  %31 = vst [vmem:[%s3897_s9] sm:$0x1] %v3369_v17 }
  0x23   :  { %3225 = vmatmul.mubr.bf16.vlgmr.msra.gmra.mrb[0].mxu1 %v3308_v19  ;;  %3148 = vmatprep.mubr.bf16.mxu0 %v3309_v20 }
  0x24   :  { %3228 = vmatprep.mubr.bf16.mxu1 %v3310_v21 }
  0x2a   :  { %3149 = vmatmul.mubr.bf16.gmra.mrb[4].mxu0 %v3311_v22 }
  0x2b   :  { %3229 = vmatmul.mubr.bf16.gmra.mrb[4].mxu1 %v3312_v23  ;;  %3152 = vmatprep.mubr.bf16.mxu0 %v3313_v24 }
  0x2c   :  { %3232 = vmatprep.mubr.bf16.mxu1 %v3314_v25 }
  0x32   :  { %3153 = vmatmul.mubr.bf16.gmra.mrb[8].mxu0 %v3315_v26 }
  0x33   :  { %3233 = vmatmul.mubr.bf16.gmra.mrb[8].mxu1 %v3316_v27  ;;  %3156 = vmatprep.mubr.bf16.mxu0 %v3317_v28 }
  0x34   :  { %3236 = vmatprep.mubr.bf16.mxu1 %v3318_v29 }
  0x3a   :  { %3157 = vmatmul.mubr.bf16.gmra.mrb[12].mxu0 %v3319_v30 }
  0x3b   :  { %3237 = vmatmul.mubr.bf16.gmra.mrb[12].mxu1 %v3320_v31  ;;  %3160 = vmatprep.mubr.bf16.mxu0 %v3321_v32 }
  0x3c   :  { %3240 = vmatprep.mubr.bf16.mxu1 %v3322_v33 }
  0x42   :  { %3161 = vmatmul.mubr.bf16.gmra.mrb[16].mxu0 %v3323_v34 }
  0x43   :  { %3241 = vmatmul.mubr.bf16.gmra.mrb[16].mxu1 %v3324_v35  ;;  %3164 = vmatprep.mubr.bf16.mxu0 %v3325_v36 }
  0x44   :  { %3244 = vmatprep.mubr.bf16.mxu1 %v3326_v37 }
  0x4a   :  { %3165 = vmatmul.mubr.bf16.gmra.mrb[20].mxu0 %v3327_v38 }
  0x4b   :  { %3245 = vmatmul.mubr.bf16.gmra.mrb[20].mxu1 %v3328_v39  ;;  %3168 = vmatprep.mubr.bf16.mxu0 %v3329_v40 }
  0x4c   :  { %3248 = vmatprep.mubr.bf16.mxu1 %v3330_v41 }
  0x52   :  { %3169 = vmatmul.mubr.bf16.gmra.mrb[24].mxu0 %v3331_v42 }
  0x53   :  { %3249 = vmatmul.mubr.bf16.gmra.mrb[24].mxu1 %v3332_v43  ;;  %3172 = vmatprep.mubr.bf16.mxu0 %v3333_v44 }
  0x54   :  { %3252 = vmatprep.mubr.bf16.mxu1 %v3334_v45 }
  0x5a   :  { %3173 = vmatmul.mubr.bf16.gmra.mrb[28].mxu0 %v3335_v46 }
  0x5b   :  { %3253 = vmatmul.mubr.bf16.gmra.mrb[28].mxu1 %v3336_v47  ;;  %3176 = vmatprep.mubr.bf16.mxu0 %v3337_v48 }
  0x5c   :  { %3256 = vmatprep.mubr.bf16.mxu1 %v3338_v49 }
  0x62   :  { %3177 = vmatmul.mubr.bf16.gmra.mrb[32].mxu0 %v3339_v50 }
  0x63   :  { %3257 = vmatmul.mubr.bf16.gmra.mrb[32].mxu1 %v3340_v51  ;;  %3180 = vmatprep.mubr.bf16.mxu0 %v3341_v52 }
  0x64   :  { %3260 = vmatprep.mubr.bf16.mxu1 %v3342_v53 }
  0x6a   :  { %3181 = vmatmul.mubr.bf16.gmra.mrb[36].mxu0 %v3343_v54 }
  0x6b   :  { %3261 = vmatmul.mubr.bf16.gmra.mrb[36].mxu1 %v3344_v55  ;;  %3184 = vmatprep.mubr.bf16.mxu0 %v3345_v56 }
  0x6c   :  { %3264 = vmatprep.mubr.bf16.mxu1 %v3346_v57 }
  0x72   :  { %3185 = vmatmul.mubr.bf16.gmra.mrb[40].mxu0 %v3347_v58 }
  0x73   :  { %3265 = vmatmul.mubr.bf16.gmra.mrb[40].mxu1 %v3348_v59  ;;  %3188 = vmatprep.mubr.bf16.mxu0 %v3349_v60 }
  0x74   :  { %3268 = vmatprep.mubr.bf16.mxu1 %v3350_v61 }
  0x7a   :  { %3189 = vmatmul.mubr.bf16.gmra.mrb[44].mxu0 %v3351_v62 }
  0x7b   :  { %3269 = vmatmul.mubr.bf16.gmra.mrb[44].mxu1 %v3352_v63  ;;  %3192 = vmatprep.mubr.bf16.mxu0 %v3353_v0 }
  0x7c   :  { %3272 = vmatprep.mubr.bf16.mxu1 %v3354_v1 }
  0x82   :  { %3193 = vmatmul.mubr.bf16.gmra.mrb[48].mxu0 %v3355_v2 }
  0x83   :  { %3273 = vmatmul.mubr.bf16.gmra.mrb[48].mxu1 %v3356_v3  ;;  %3196 = vmatprep.mubr.bf16.mxu0 %v3357_v4 }
  0x84   :  { %3276 = vmatprep.mubr.bf16.mxu1 %v3358_v5 }
  0x8a   :  { %3197 = vmatmul.mubr.bf16.gmra.mrb[52].mxu0 %v3359_v6 }
  0x8b   :  { %3277 = vmatmul.mubr.bf16.gmra.mrb[52].mxu1 %v3360_v7  ;;  %3200 = vmatprep.mubr.bf16.mxu0 %v3361_v8 }
  0x8c   :  { %3280 = vmatprep.mubr.bf16.mxu1 %v3362_v9 }
  0x92   :  { %3201 = vmatmul.mubr.bf16.gmra.mrb[56].mxu0 %v3363_v10 }
  0x93   :  { %3281 = vmatmul.mubr.bf16.gmra.mrb[56].mxu1 %v3364_v11  ;;  %3204 = vmatprep.mubr.bf16.mxu0 %v3365_v12 }
  0x94   :  { %3284 = vmatprep.mubr.bf16.mxu1 %v3366_v13 }
  0x9a   :  { %3205 = vmatmul.mubr.bf16.gmra.mrb[60].mxu0 %v3367_v14 }
  0x9b   :  { %3285 = vmatmul.mubr.bf16.gmra.mrb[60].mxu1 %v3368_v15 }
  0xf5   :  { %v3146_v16 = vpop.f32.mrb[0].mxu0 }
  0xf6   :  { %v3226_v18 = vpop.f32.mrb[0].mxu1  ;;  %v386_v19 = vpop.f32.mrb[1].mxu0  ;;  %v1965_v35 = vmul.f32 %v3146_v16, %v3146_v16 }
  0xf7   :  { %v995_v20 = vpop.f32.mrb[1].mxu1  ;;  %v3147_v21 = vpop.f32.mrb[2].mxu0  ;;  %v1963_v22 = vmul.f32 %v386_v19, %v386_v19  ;;  %v2173_v37 = vmul.f32 %v3226_v18, %v3226_v18 }
  0xf8   :  { %v2674_v23 = vpack.c.bf16 %v3147_v21, %v3146_v16  ;;  %v3227_v24 = vpop.f32.mrb[2].mxu1  ;;  %v389_v25 = vpop.f32.mrb[3].mxu0  ;;  %v2171_v26 = vmul.f32 %v995_v20, %v995_v20  ;;  %v1966_v41 = vmul.f32 %v3147_v21, %v3147_v21 }
  0xf9   :  { %v2834_v27 = vpack.c.bf16 %v3227_v24, %v3226_v18  ;;  %v2669_v28 = vpack.c.bf16 %v389_v25, %v386_v19  ;;  %v1891_v29 = vadd.f32 %v389_v25, %v386_v19  ;;  %v998_v30 = vpop.f32.mrb[3].mxu1  ;;  %v1964_v31 = vmul.f32 %v389_v25, %v389_v25 }
  0xfa   :  { %2986 = vst [vmem:[%s3894_s4 + $0x8] sm:$0xff] %v2674_v23   ;;  %v2829_v32 = vpack.c.bf16 %v998_v30, %v995_v20  ;;  %v2099_v33 = vadd.f32 %v998_v30, %v995_v20  ;;  %v2172_v34 = vmul.f32 %v998_v30, %v998_v30  ;;  %v2174_v44 = vmul.f32 %v3227_v24, %v3227_v24 }
  0xfb   :  { %3017 = vst [vmem:[%s3895_s5 + $0x8] sm:$0xff] %v2834_v27   ;;  %2670 = vst [vmem:[%s3894_s4] sm:$0xff] %v2669_v28   ;;  %v1892_v36 = vadd.f32 %v3146_v16, %v1891_v29  ;;  %v2027_v38 = vadd.f32 %v1964_v31, %v1963_v22 }
  0xfc   :  { %2830 = vst [vmem:[%s3895_s5] sm:$0xff] %v2829_v32   ;;  %v2100_v39 = vadd.f32 %v3226_v18, %v2099_v33  ;;  %v2235_v40 = vadd.f32 %v2172_v34, %v2171_v26 }
  0xfd   :  { %v3150_v42 = vpop.f32.mrb[4].mxu0  ;;  %v1893_v43 = vadd.f32 %v3147_v21, %v1892_v36  ;;  %v2028_v45 = vadd.f32 %v2027_v38, %v1965_v35 }
  0xfe   :  { %v2236_v46 = vadd.f32 %v2235_v40, %v2173_v37  ;;  %v3230_v47 = vpop.f32.mrb[4].mxu1  ;;  %v402_v48 = vpop.f32.mrb[5].mxu0  ;;  %v2101_v49 = vadd.f32 %v3227_v24, %v2100_v39  ;;  %v1969_v7 = vmul.f32 %v3150_v42, %v3150_v42 }
  0xff   :  { %v1894_v50 = vadd.f32 %v1893_v43, %v402_v48  ;;  %v1967_v51 = vmul.f32 %v402_v48, %v402_v48  ;;  %v1011_v52 = vpop.f32.mrb[5].mxu1  ;;  %v3151_v53 = vpop.f32.mrb[6].mxu0  ;;  %v2029_v54 = vadd.f32 %v2028_v45, %v1966_v41  ;;  %v2177_v9 = vmul.f32 %v3230_v47, %v3230_v47 }
 0x100   :  { %v2102_v55 = vadd.f32 %v2101_v49, %v1011_v52  ;;  %v2175_v56 = vmul.f32 %v1011_v52, %v1011_v52  ;;  %v2237_v57 = vadd.f32 %v2236_v46, %v2174_v44  ;;  %v3231_v58 = vpop.f32.mrb[6].mxu1  ;;  %v405_v59 = vpop.f32.mrb[7].mxu0  ;;  %v2684_v60 = vpack.c.bf16 %v3151_v53, %v3150_v42 }
 0x101   :  { %v2844_v61 = vpack.c.bf16 %v3231_v58, %v3230_v47  ;;  %v1014_v62 = vpop.f32.mrb[7].mxu1  ;;  %v2030_v63 = vadd.f32 %v2029_v54, %v1967_v51  ;;  %v2679_v1 = vpack.c.bf16 %v405_v59, %v402_v48  ;;  %v1895_v2 = vadd.f32 %v1894_v50, %v405_v59 }
 0x102   :  { %v2238_v0 = vadd.f32 %v2237_v57, %v2175_v56  ;;  %2988 = vst [vmem:[%s3894_s4 + $0x18] sm:$0xff] %v2684_v60   ;;  %v1968_v3 = vmul.f32 %v405_v59, %v405_v59  ;;  %v2839_v4 = vpack.c.bf16 %v1014_v62, %v1011_v52  ;;  %v2103_v5 = vadd.f32 %v2102_v55, %v1014_v62 }
 0x103   :  { %3019 = vst [vmem:[%s3895_s5 + $0x18] sm:$0xff] %v2844_v61   ;;  %v2176_v6 = vmul.f32 %v1014_v62, %v1014_v62  ;;  %2987 = vst [vmem:[%s3894_s4 + $0x10] sm:$0xff] %v2679_v1   ;;  %v1896_v8 = vadd.f32 %v3150_v42, %v1895_v2  ;;  %v1970_v14 = vmul.f32 %v3151_v53, %v3151_v53 }
 0x104   :  { %v2031_v10 = vadd.f32 %v2030_v63, %v1968_v3  ;;  %3018 = vst [vmem:[%s3895_s5 + $0x10] sm:$0xff] %v2839_v4   ;;  %v2104_v11 = vadd.f32 %v3230_v47, %v2103_v5  ;;  %v2178_v18 = vmul.f32 %v3231_v58, %v3231_v58 }
 0x105   :  { %v2239_v12 = vadd.f32 %v2238_v0, %v2176_v6  ;;  %v3154_v13 = vpop.f32.mrb[8].mxu0  ;;  %v1897_v17 = vadd.f32 %v3151_v53, %v1896_v8 }
 0x106   :  { %v3234_v15 = vpop.f32.mrb[8].mxu1  ;;  %v418_v16 = vpop.f32.mrb[9].mxu0  ;;  %v2032_v19 = vadd.f32 %v2031_v10, %v1969_v7  ;;  %v2105_v25 = vadd.f32 %v3231_v58, %v2104_v11  ;;  %v1973_v44 = vmul.f32 %v3154_v13, %v3154_v13 }
 0x107   :  { %v2240_v20 = vadd.f32 %v2239_v12, %v2177_v9  ;;  %v1971_v21 = vmul.f32 %v418_v16, %v418_v16  ;;  %v1027_v22 = vpop.f32.mrb[9].mxu1  ;;  %v3155_v23 = vpop.f32.mrb[10].mxu0  ;;  %v1898_v24 = vadd.f32 %v1897_v17, %v418_v16  ;;  %v2181_v47 = vmul.f32 %v3234_v15, %v3234_v15 }
 0x108   :  { %v2179_v26 = vmul.f32 %v1027_v22, %v1027_v22  ;;  %v2694_v27 = vpack.c.bf16 %v3155_v23, %v3154_v13  ;;  %v3235_v28 = vpop.f32.mrb[10].mxu1  ;;  %v421_v29 = vpop.f32.mrb[11].mxu0  ;;  %v2033_v30 = vadd.f32 %v2032_v19, %v1970_v14  ;;  %v2106_v34 = vadd.f32 %v2105_v25, %v1027_v22 }
 0x109   :  { %v2241_v31 = vadd.f32 %v2240_v20, %v2178_v18  ;;  %v2854_v32 = vpack.c.bf16 %v3235_v28, %v3234_v15  ;;  %v1030_v33 = vpop.f32.mrb[11].mxu1  ;;  %v2689_v35 = vpack.c.bf16 %v421_v29, %v418_v16  ;;  %v1899_v36 = vadd.f32 %v1898_v24, %v421_v29 }
 0x10a   :  { %2990 = vst [vmem:[%s3894_s4 + $0x28] sm:$0xff] %v2694_v27   ;;  %v2034_v37 = vadd.f32 %v2033_v30, %v1971_v21  ;;  %v1972_v39 = vmul.f32 %v421_v29, %v421_v29  ;;  %v2849_v40 = vpack.c.bf16 %v1030_v33, %v1027_v22  ;;  %v2107_v42 = vadd.f32 %v2106_v34, %v1030_v33 }
 0x10b   :  { %v2242_v38 = vadd.f32 %v2241_v31, %v2179_v26  ;;  %3021 = vst [vmem:[%s3895_s5 + $0x28] sm:$0xff] %v2854_v32   ;;  %2989 = vst [vmem:[%s3894_s4 + $0x20] sm:$0xff] %v2689_v35   ;;  %v1900_v41 = vadd.f32 %v3154_v13, %v1899_v36  ;;  %v2180_v43 = vmul.f32 %v1030_v33, %v1030_v33 }
 0x10c   :  { %v2035_v45 = vadd.f32 %v2034_v37, %v1972_v39  ;;  %3020 = vst [vmem:[%s3895_s5 + $0x20] sm:$0xff] %v2849_v40   ;;  %v2108_v48 = vadd.f32 %v3234_v15, %v2107_v42  ;;  %v1974_v53 = vmul.f32 %v3155_v23, %v3155_v23  ;;  %v2182_v54 = vmul.f32 %v3235_v28, %v3235_v28 }
 0x10d   :  { %v3158_v46 = vpop.f32.mrb[12].mxu0  ;;  %v2243_v49 = vadd.f32 %v2242_v38, %v2180_v43  ;;  %v1901_v52 = vadd.f32 %v3155_v23, %v1900_v41 }
 0x10e   :  { %v3238_v50 = vpop.f32.mrb[12].mxu1  ;;  %v434_v51 = vpop.f32.mrb[13].mxu0  ;;  %v2036_v55 = vadd.f32 %v2035_v45, %v1973_v44  ;;  %v2109_v61 = vadd.f32 %v3235_v28, %v2108_v48  ;;  %v1977_v15 = vmul.f32 %v3158_v46, %v3158_v46 }
 0x10f   :  { %v1975_v56 = vmul.f32 %v434_v51, %v434_v51  ;;  %v1043_v57 = vpop.f32.mrb[13].mxu1  ;;  %v3159_v58 = vpop.f32.mrb[14].mxu0  ;;  %v2244_v59 = vadd.f32 %v2243_v49, %v2181_v47  ;;  %v1902_v60 = vadd.f32 %v1901_v52, %v434_v51  ;;  %v2185_v19 = vmul.f32 %v3238_v50, %v3238_v50 }
 0x110   :  { %v2183_v62 = vmul.f32 %v1043_v57, %v1043_v57  ;;  %v3239_v63 = vpop.f32.mrb[14].mxu1  ;;  %v437_v0 = vpop.f32.mrb[15].mxu0  ;;  %v2037_v1 = vadd.f32 %v2036_v55, %v1974_v53  ;;  %v2704_v2 = vpack.c.bf16 %v3159_v58, %v3158_v46  ;;  %v2110_v5 = vadd.f32 %v2109_v61, %v1043_v57 }
 0x111   :  { %v2864_v3 = vpack.c.bf16 %v3239_v63, %v3238_v50  ;;  %v1046_v4 = vpop.f32.mrb[15].mxu1  ;;  %v2245_v6 = vadd.f32 %v2244_v59, %v2182_v54  ;;  %v2699_v7 = vpack.c.bf16 %v437_v0, %v434_v51  ;;  %v1903_v9 = vadd.f32 %v1902_v60, %v437_v0 }
 0x112   :  { %v2038_v8 = vadd.f32 %v2037_v1, %v1975_v56  ;;  %2992 = vst [vmem:[%s3894_s4 + $0x38] sm:$0xff] %v2704_v2   ;;  %v1976_v10 = vmul.f32 %v437_v0, %v437_v0  ;;  %v2859_v11 = vpack.c.bf16 %v1046_v4, %v1043_v57  ;;  %v2111_v13 = vadd.f32 %v2110_v5, %v1046_v4 }
 0x113   :  { %3023 = vst [vmem:[%s3895_s5 + $0x38] sm:$0xff] %v2864_v3   ;;  %v2246_v12 = vadd.f32 %v2245_v6, %v2183_v62  ;;  %2991 = vst [vmem:[%s3894_s4 + $0x30] sm:$0xff] %v2699_v7   ;;  %v2184_v14 = vmul.f32 %v1046_v4, %v1046_v4  ;;  %v1904_v16 = vadd.f32 %v3158_v46, %v1903_v9 }
 0x114   :  { %v2039_v17 = vadd.f32 %v2038_v8, %v1976_v10  ;;  %3022 = vst [vmem:[%s3895_s5 + $0x30] sm:$0xff] %v2859_v11   ;;  %v1978_v20 = vmul.f32 %v3159_v58, %v3159_v58  ;;  %v2112_v21 = vadd.f32 %v3238_v50, %v2111_v13  ;;  %v2186_v25 = vmul.f32 %v3239_v63, %v3239_v63 }
 0x115   :  { %v3162_v18 = vpop.f32.mrb[16].mxu0  ;;  %v2247_v22 = vadd.f32 %v2246_v12, %v2184_v14  ;;  %v1905_v27 = vadd.f32 %v3159_v58, %v1904_v16 }
 0x116   :  { %v3242_v23 = vpop.f32.mrb[16].mxu1  ;;  %v450_v24 = vpop.f32.mrb[17].mxu0  ;;  %v2040_v26 = vadd.f32 %v2039_v17, %v1977_v15  ;;  %v2113_v32 = vadd.f32 %v3239_v63, %v2112_v21  ;;  %v1981_v51 = vmul.f32 %v3162_v18, %v3162_v18 }
 0x117   :  { %v1979_v28 = vmul.f32 %v450_v24, %v450_v24  ;;  %v1059_v29 = vpop.f32.mrb[17].mxu1  ;;  %v3163_v30 = vpop.f32.mrb[18].mxu0  ;;  %v2248_v31 = vadd.f32 %v2247_v22, %v2185_v19  ;;  %v1906_v37 = vadd.f32 %v1905_v27, %v450_v24  ;;  %v2189_v55 = vmul.f32 %v3242_v23, %v3242_v23 }
 0x118   :  { %v2187_v33 = vmul.f32 %v1059_v29, %v1059_v29  ;;  %v2714_v34 = vpack.c.bf16 %v3163_v30, %v3162_v18  ;;  %v3243_v35 = vpop.f32.mrb[18].mxu1  ;;  %v453_v36 = vpop.f32.mrb[19].mxu0  ;;  %v2041_v38 = vadd.f32 %v2040_v26, %v1978_v20  ;;  %v2114_v41 = vadd.f32 %v2113_v32, %v1059_v29 }
 0x119   :  { %v2874_v39 = vpack.c.bf16 %v3243_v35, %v3242_v23  ;;  %v1062_v40 = vpop.f32.mrb[19].mxu1  ;;  %v2249_v42 = vadd.f32 %v2248_v31, %v2186_v25  ;;  %v2709_v43 = vpack.c.bf16 %v453_v36, %v450_v24  ;;  %v1907_v45 = vadd.f32 %v1906_v37, %v453_v36 }
 0x11a   :  { %2994 = vst [vmem:[%s3894_s4 + $0x48] sm:$0xff] %v2714_v34   ;;  %v2042_v44 = vadd.f32 %v2041_v38, %v1979_v28  ;;  %v1980_v46 = vmul.f32 %v453_v36, %v453_v36  ;;  %v2869_v47 = vpack.c.bf16 %v1062_v40, %v1059_v29  ;;  %v2115_v49 = vadd.f32 %v2114_v41, %v1062_v40 }
 0x11b   :  { %3025 = vst [vmem:[%s3895_s5 + $0x48] sm:$0xff] %v2874_v39   ;;  %v2250_v48 = vadd.f32 %v2249_v42, %v2187_v33  ;;  %2993 = vst [vmem:[%s3894_s4 + $0x40] sm:$0xff] %v2709_v43   ;;  %v2188_v50 = vmul.f32 %v1062_v40, %v1062_v40  ;;  %v1908_v52 = vadd.f32 %v3162_v18, %v1907_v45 }
 0x11c   :  { %v2043_v53 = vadd.f32 %v2042_v44, %v1980_v46  ;;  %3024 = vst [vmem:[%s3895_s5 + $0x40] sm:$0xff] %v2869_v47   ;;  %v1982_v56 = vmul.f32 %v3163_v30, %v3163_v30  ;;  %v2116_v57 = vadd.f32 %v3242_v23, %v2115_v49  ;;  %v2190_v61 = vmul.f32 %v3243_v35, %v3243_v35 }
 0x11d   :  { %v3166_v54 = vpop.f32.mrb[20].mxu0  ;;  %v2251_v58 = vadd.f32 %v2250_v48, %v2188_v50  ;;  %v1909_v63 = vadd.f32 %v3163_v30, %v1908_v52 }
 0x11e   :  { %v3246_v59 = vpop.f32.mrb[20].mxu1  ;;  %v466_v60 = vpop.f32.mrb[21].mxu0  ;;  %v2044_v62 = vadd.f32 %v2043_v53, %v1981_v51  ;;  %v2117_v4 = vadd.f32 %v3243_v35, %v2116_v57  ;;  %v1985_v23 = vmul.f32 %v3166_v54, %v3166_v54 }
 0x11f   :  { %v1983_v0 = vmul.f32 %v466_v60, %v466_v60  ;;  %v1075_v1 = vpop.f32.mrb[21].mxu1  ;;  %v3167_v2 = vpop.f32.mrb[22].mxu0  ;;  %v2252_v3 = vadd.f32 %v2251_v58, %v2189_v55  ;;  %v1910_v9 = vadd.f32 %v1909_v63, %v466_v60  ;;  %v2193_v27 = vmul.f32 %v3246_v59, %v3246_v59 }
 0x120   :  { %v2191_v5 = vmul.f32 %v1075_v1, %v1075_v1  ;;  %v2724_v6 = vpack.c.bf16 %v3167_v2, %v3166_v54  ;;  %v3247_v7 = vpop.f32.mrb[22].mxu1  ;;  %v469_v8 = vpop.f32.mrb[23].mxu0  ;;  %v2045_v10 = vadd.f32 %v2044_v62, %v1982_v56  ;;  %v2118_v13 = vadd.f32 %v2117_v4, %v1075_v1 }
 0x121   :  { %v2884_v11 = vpack.c.bf16 %v3247_v7, %v3246_v59  ;;  %v1078_v12 = vpop.f32.mrb[23].mxu1  ;;  %v2253_v14 = vadd.f32 %v2252_v3, %v2190_v61  ;;  %v2719_v15 = vpack.c.bf16 %v469_v8, %v466_v60  ;;  %v1911_v17 = vadd.f32 %v1910_v9, %v469_v8 }
 0x122   :  { %2996 = vst [vmem:[%s3894_s4 + $0x58] sm:$0xff] %v2724_v6   ;;  %v2046_v16 = vadd.f32 %v2045_v10, %v1983_v0  ;;  %v1984_v18 = vmul.f32 %v469_v8, %v469_v8  ;;  %v2879_v19 = vpack.c.bf16 %v1078_v12, %v1075_v1  ;;  %v2119_v21 = vadd.f32 %v2118_v13, %v1078_v12 }
 0x123   :  { %3027 = vst [vmem:[%s3895_s5 + $0x58] sm:$0xff] %v2884_v11   ;;  %v2254_v20 = vadd.f32 %v2253_v14, %v2191_v5  ;;  %2995 = vst [vmem:[%s3894_s4 + $0x50] sm:$0xff] %v2719_v15   ;;  %v2192_v22 = vmul.f32 %v1078_v12, %v1078_v12  ;;  %v1912_v24 = vadd.f32 %v3166_v54, %v1911_v17 }
 0x124   :  { %v2047_v25 = vadd.f32 %v2046_v16, %v1984_v18  ;;  %3026 = vst [vmem:[%s3895_s5 + $0x50] sm:$0xff] %v2879_v19   ;;  %v1986_v28 = vmul.f32 %v3167_v2, %v3167_v2  ;;  %v2120_v29 = vadd.f32 %v3246_v59, %v2119_v21  ;;  %v2194_v33 = vmul.f32 %v3247_v7, %v3247_v7 }
 0x125   :  { %v3170_v26 = vpop.f32.mrb[24].mxu0  ;;  %v2255_v30 = vadd.f32 %v2254_v20, %v2192_v22  ;;  %v1913_v35 = vadd.f32 %v3167_v2, %v1912_v24 }
 0x126   :  { %v3250_v31 = vpop.f32.mrb[24].mxu1  ;;  %v482_v32 = vpop.f32.mrb[25].mxu0  ;;  %v2048_v34 = vadd.f32 %v2047_v25, %v1985_v23  ;;  %v2121_v40 = vadd.f32 %v3247_v7, %v2120_v29  ;;  %v1989_v59 = vmul.f32 %v3170_v26, %v3170_v26 }
 0x127   :  { %v1987_v36 = vmul.f32 %v482_v32, %v482_v32  ;;  %v1091_v37 = vpop.f32.mrb[25].mxu1  ;;  %v3171_v38 = vpop.f32.mrb[26].mxu0  ;;  %v2256_v39 = vadd.f32 %v2255_v30, %v2193_v27  ;;  %v1914_v45 = vadd.f32 %v1913_v35, %v482_v32  ;;  %v2197_v63 = vmul.f32 %v3250_v31, %v3250_v31 }
 0x128   :  { %v2195_v41 = vmul.f32 %v1091_v37, %v1091_v37  ;;  %v2734_v42 = vpack.c.bf16 %v3171_v38, %v3170_v26  ;;  %v3251_v43 = vpop.f32.mrb[26].mxu1  ;;  %v485_v44 = vpop.f32.mrb[27].mxu0  ;;  %v2049_v46 = vadd.f32 %v2048_v34, %v1986_v28  ;;  %v2122_v49 = vadd.f32 %v2121_v40, %v1091_v37 }
 0x129   :  { %v2894_v47 = vpack.c.bf16 %v3251_v43, %v3250_v31  ;;  %v1094_v48 = vpop.f32.mrb[27].mxu1  ;;  %v2257_v50 = vadd.f32 %v2256_v39, %v2194_v33  ;;  %v2729_v51 = vpack.c.bf16 %v485_v44, %v482_v32  ;;  %v1915_v53 = vadd.f32 %v1914_v45, %v485_v44 }
 0x12a   :  { %2998 = vst [vmem:[%s3894_s4 + $0x68] sm:$0xff] %v2734_v42   ;;  %v2050_v52 = vadd.f32 %v2049_v46, %v1987_v36  ;;  %v1988_v54 = vmul.f32 %v485_v44, %v485_v44  ;;  %v2889_v55 = vpack.c.bf16 %v1094_v48, %v1091_v37  ;;  %v2123_v57 = vadd.f32 %v2122_v49, %v1094_v48 }
 0x12b   :  { %3029 = vst [vmem:[%s3895_s5 + $0x68] sm:$0xff] %v2894_v47   ;;  %v2258_v56 = vadd.f32 %v2257_v50, %v2195_v41  ;;  %2997 = vst [vmem:[%s3894_s4 + $0x60] sm:$0xff] %v2729_v51   ;;  %v2196_v58 = vmul.f32 %v1094_v48, %v1094_v48  ;;  %v1916_v60 = vadd.f32 %v3170_v26, %v1915_v53 }
 0x12c   :  { %v2051_v61 = vadd.f32 %v2050_v52, %v1988_v54  ;;  %3028 = vst [vmem:[%s3895_s5 + $0x60] sm:$0xff] %v2889_v55   ;;  %v1990_v0 = vmul.f32 %v3171_v38, %v3171_v38  ;;  %v2124_v1 = vadd.f32 %v3250_v31, %v2123_v57  ;;  %v2198_v5 = vmul.f32 %v3251_v43, %v3251_v43 }
 0x12d   :  { %v3174_v62 = vpop.f32.mrb[28].mxu0  ;;  %v2259_v2 = vadd.f32 %v2258_v56, %v2196_v58  ;;  %v1917_v7 = vadd.f32 %v3171_v38, %v1916_v60 }
 0x12e   :  { %v3254_v3 = vpop.f32.mrb[28].mxu1  ;;  %v498_v4 = vpop.f32.mrb[29].mxu0  ;;  %v2052_v6 = vadd.f32 %v2051_v61, %v1989_v59  ;;  %v2125_v12 = vadd.f32 %v3251_v43, %v2124_v1  ;;  %v1993_v31 = vmul.f32 %v3174_v62, %v3174_v62 }
 0x12f   :  { %v1991_v8 = vmul.f32 %v498_v4, %v498_v4  ;;  %v1107_v9 = vpop.f32.mrb[29].mxu1  ;;  %v3175_v10 = vpop.f32.mrb[30].mxu0  ;;  %v2260_v11 = vadd.f32 %v2259_v2, %v2197_v63  ;;  %v1918_v17 = vadd.f32 %v1917_v7, %v498_v4  ;;  %v2201_v35 = vmul.f32 %v3254_v3, %v3254_v3 }
 0x130   :  { %v2199_v13 = vmul.f32 %v1107_v9, %v1107_v9  ;;  %v2744_v14 = vpack.c.bf16 %v3175_v10, %v3174_v62  ;;  %v3255_v15 = vpop.f32.mrb[30].mxu1  ;;  %v501_v16 = vpop.f32.mrb[31].mxu0  ;;  %v2053_v18 = vadd.f32 %v2052_v6, %v1990_v0  ;;  %v2126_v21 = vadd.f32 %v2125_v12, %v1107_v9 }
 0x131   :  { %v2904_v19 = vpack.c.bf16 %v3255_v15, %v3254_v3  ;;  %v1110_v20 = vpop.f32.mrb[31].mxu1  ;;  %v2261_v22 = vadd.f32 %v2260_v11, %v2198_v5  ;;  %v2739_v23 = vpack.c.bf16 %v501_v16, %v498_v4  ;;  %v1919_v25 = vadd.f32 %v1918_v17, %v501_v16 }
 0x132   :  { %3000 = vst [vmem:[%s3894_s4 + $0x78] sm:$0xff] %v2744_v14   ;;  %v2054_v24 = vadd.f32 %v2053_v18, %v1991_v8  ;;  %v1992_v26 = vmul.f32 %v501_v16, %v501_v16  ;;  %v2899_v27 = vpack.c.bf16 %v1110_v20, %v1107_v9  ;;  %v2127_v29 = vadd.f32 %v2126_v21, %v1110_v20 }
 0x133   :  { %3031 = vst [vmem:[%s3895_s5 + $0x78] sm:$0xff] %v2904_v19   ;;  %v2262_v28 = vadd.f32 %v2261_v22, %v2199_v13  ;;  %2999 = vst [vmem:[%s3894_s4 + $0x70] sm:$0xff] %v2739_v23   ;;  %v2200_v30 = vmul.f32 %v1110_v20, %v1110_v20  ;;  %v1920_v32 = vadd.f32 %v3174_v62, %v1919_v25 }
 0x134   :  { %v2055_v33 = vadd.f32 %v2054_v24, %v1992_v26  ;;  %3030 = vst [vmem:[%s3895_s5 + $0x70] sm:$0xff] %v2899_v27   ;;  %v1994_v36 = vmul.f32 %v3175_v10, %v3175_v10  ;;  %v2128_v37 = vadd.f32 %v3254_v3, %v2127_v29  ;;  %v2202_v41 = vmul.f32 %v3255_v15, %v3255_v15 }
 0x135   :  { %v3178_v34 = vpop.f32.mrb[32].mxu0  ;;  %v2263_v38 = vadd.f32 %v2262_v28, %v2200_v30  ;;  %v1921_v43 = vadd.f32 %v3175_v10, %v1920_v32 }
 0x136   :  { %v3258_v39 = vpop.f32.mrb[32].mxu1  ;;  %v514_v40 = vpop.f32.mrb[33].mxu0  ;;  %v2056_v42 = vadd.f32 %v2055_v33, %v1993_v31  ;;  %v2129_v48 = vadd.f32 %v3255_v15, %v2128_v37  ;;  %v1997_v3 = vmul.f32 %v3178_v34, %v3178_v34 }
 0x137   :  { %v1995_v44 = vmul.f32 %v514_v40, %v514_v40  ;;  %v1123_v45 = vpop.f32.mrb[33].mxu1  ;;  %v3179_v46 = vpop.f32.mrb[34].mxu0  ;;  %v2264_v47 = vadd.f32 %v2263_v38, %v2201_v35  ;;  %v1922_v53 = vadd.f32 %v1921_v43, %v514_v40  ;;  %v2205_v7 = vmul.f32 %v3258_v39, %v3258_v39 }
 0x138   :  { %v2203_v49 = vmul.f32 %v1123_v45, %v1123_v45  ;;  %v2754_v50 = vpack.c.bf16 %v3179_v46, %v3178_v34  ;;  %v3259_v51 = vpop.f32.mrb[34].mxu1  ;;  %v517_v52 = vpop.f32.mrb[35].mxu0  ;;  %v2057_v54 = vadd.f32 %v2056_v42, %v1994_v36  ;;  %v2130_v57 = vadd.f32 %v2129_v48, %v1123_v45 }
 0x139   :  { %v2914_v55 = vpack.c.bf16 %v3259_v51, %v3258_v39  ;;  %v1126_v56 = vpop.f32.mrb[35].mxu1  ;;  %v2265_v58 = vadd.f32 %v2264_v47, %v2202_v41  ;;  %v2749_v59 = vpack.c.bf16 %v517_v52, %v514_v40  ;;  %v1923_v61 = vadd.f32 %v1922_v53, %v517_v52 }
 0x13a   :  { %3002 = vst [vmem:[%s3894_s4 + $0x88] sm:$0xff] %v2754_v50   ;;  %v2058_v60 = vadd.f32 %v2057_v54, %v1995_v44  ;;  %v1996_v62 = vmul.f32 %v517_v52, %v517_v52  ;;  %v2909_v63 = vpack.c.bf16 %v1126_v56, %v1123_v45  ;;  %v2131_v1 = vadd.f32 %v2130_v57, %v1126_v56 }
 0x13b   :  { %3033 = vst [vmem:[%s3895_s5 + $0x88] sm:$0xff] %v2914_v55   ;;  %v2266_v0 = vadd.f32 %v2265_v58, %v2203_v49  ;;  %3001 = vst [vmem:[%s3894_s4 + $0x80] sm:$0xff] %v2749_v59   ;;  %v2204_v2 = vmul.f32 %v1126_v56, %v1126_v56  ;;  %v1924_v4 = vadd.f32 %v3178_v34, %v1923_v61 }
 0x13c   :  { %v2059_v5 = vadd.f32 %v2058_v60, %v1996_v62  ;;  %3032 = vst [vmem:[%s3895_s5 + $0x80] sm:$0xff] %v2909_v63   ;;  %v1998_v8 = vmul.f32 %v3179_v46, %v3179_v46  ;;  %v2132_v9 = vadd.f32 %v3258_v39, %v2131_v1  ;;  %v2206_v13 = vmul.f32 %v3259_v51, %v3259_v51 }
 0x13d   :  { %v3182_v6 = vpop.f32.mrb[36].mxu0  ;;  %v2267_v10 = vadd.f32 %v2266_v0, %v2204_v2  ;;  %v1925_v15 = vadd.f32 %v3179_v46, %v1924_v4 }
 0x13e   :  { %v3262_v11 = vpop.f32.mrb[36].mxu1  ;;  %v530_v12 = vpop.f32.mrb[37].mxu0  ;;  %v2060_v14 = vadd.f32 %v2059_v5, %v1997_v3  ;;  %v2133_v20 = vadd.f32 %v3259_v51, %v2132_v9  ;;  %v2001_v39 = vmul.f32 %v3182_v6, %v3182_v6 }
 0x13f   :  { %v1999_v16 = vmul.f32 %v530_v12, %v530_v12  ;;  %v1139_v17 = vpop.f32.mrb[37].mxu1  ;;  %v3183_v18 = vpop.f32.mrb[38].mxu0  ;;  %v2268_v19 = vadd.f32 %v2267_v10, %v2205_v7  ;;  %v1926_v25 = vadd.f32 %v1925_v15, %v530_v12  ;;  %v2209_v43 = vmul.f32 %v3262_v11, %v3262_v11 }
 0x140   :  { %v2207_v21 = vmul.f32 %v1139_v17, %v1139_v17  ;;  %v2764_v22 = vpack.c.bf16 %v3183_v18, %v3182_v6  ;;  %v3263_v23 = vpop.f32.mrb[38].mxu1  ;;  %v533_v24 = vpop.f32.mrb[39].mxu0  ;;  %v2061_v26 = vadd.f32 %v2060_v14, %v1998_v8  ;;  %v2134_v29 = vadd.f32 %v2133_v20, %v1139_v17 }
 0x141   :  { %v2924_v27 = vpack.c.bf16 %v3263_v23, %v3262_v11  ;;  %v1142_v28 = vpop.f32.mrb[39].mxu1  ;;  %v2269_v30 = vadd.f32 %v2268_v19, %v2206_v13  ;;  %v2759_v31 = vpack.c.bf16 %v533_v24, %v530_v12  ;;  %v1927_v33 = vadd.f32 %v1926_v25, %v533_v24 }
 0x142   :  { %3004 = vst [vmem:[%s3894_s4 + $0x98] sm:$0xff] %v2764_v22   ;;  %v2062_v32 = vadd.f32 %v2061_v26, %v1999_v16  ;;  %v2000_v34 = vmul.f32 %v533_v24, %v533_v24  ;;  %v2919_v35 = vpack.c.bf16 %v1142_v28, %v1139_v17  ;;  %v2135_v37 = vadd.f32 %v2134_v29, %v1142_v28 }
 0x143   :  { %3035 = vst [vmem:[%s3895_s5 + $0x98] sm:$0xff] %v2924_v27   ;;  %v2270_v36 = vadd.f32 %v2269_v30, %v2207_v21  ;;  %3003 = vst [vmem:[%s3894_s4 + $0x90] sm:$0xff] %v2759_v31   ;;  %v2208_v38 = vmul.f32 %v1142_v28, %v1142_v28  ;;  %v1928_v40 = vadd.f32 %v3182_v6, %v1927_v33 }
 0x144   :  { %v2063_v41 = vadd.f32 %v2062_v32, %v2000_v34  ;;  %3034 = vst [vmem:[%s3895_s5 + $0x90] sm:$0xff] %v2919_v35   ;;  %v2002_v44 = vmul.f32 %v3183_v18, %v3183_v18  ;;  %v2136_v45 = vadd.f32 %v3262_v11, %v2135_v37  ;;  %v2210_v49 = vmul.f32 %v3263_v23, %v3263_v23 }
 0x145   :  { %v3186_v42 = vpop.f32.mrb[40].mxu0  ;;  %v2271_v46 = vadd.f32 %v2270_v36, %v2208_v38  ;;  %v1929_v51 = vadd.f32 %v3183_v18, %v1928_v40 }
 0x146   :  { %v3266_v47 = vpop.f32.mrb[40].mxu1  ;;  %v546_v48 = vpop.f32.mrb[41].mxu0  ;;  %v2064_v50 = vadd.f32 %v2063_v41, %v2001_v39  ;;  %v2137_v56 = vadd.f32 %v3263_v23, %v2136_v45  ;;  %v2005_v11 = vmul.f32 %v3186_v42, %v3186_v42 }
 0x147   :  { %v2003_v52 = vmul.f32 %v546_v48, %v546_v48  ;;  %v1155_v53 = vpop.f32.mrb[41].mxu1  ;;  %v3187_v54 = vpop.f32.mrb[42].mxu0  ;;  %v2272_v55 = vadd.f32 %v2271_v46, %v2209_v43  ;;  %v1930_v61 = vadd.f32 %v1929_v51, %v546_v48  ;;  %v2213_v15 = vmul.f32 %v3266_v47, %v3266_v47 }
 0x148   :  { %v2211_v57 = vmul.f32 %v1155_v53, %v1155_v53  ;;  %v2774_v58 = vpack.c.bf16 %v3187_v54, %v3186_v42  ;;  %v3267_v59 = vpop.f32.mrb[42].mxu1  ;;  %v549_v60 = vpop.f32.mrb[43].mxu0  ;;  %v2065_v62 = vadd.f32 %v2064_v50, %v2002_v44  ;;  %v2138_v1 = vadd.f32 %v2137_v56, %v1155_v53 }
 0x149   :  { %v2934_v63 = vpack.c.bf16 %v3267_v59, %v3266_v47  ;;  %v1158_v0 = vpop.f32.mrb[43].mxu1  ;;  %v2273_v2 = vadd.f32 %v2272_v55, %v2210_v49  ;;  %v2769_v3 = vpack.c.bf16 %v549_v60, %v546_v48  ;;  %v1931_v5 = vadd.f32 %v1930_v61, %v549_v60 }
 0x14a   :  { %3006 = vst [vmem:[%s3894_s4 + $0xa8] sm:$0xff] %v2774_v58   ;;  %v2066_v4 = vadd.f32 %v2065_v62, %v2003_v52  ;;  %v2004_v6 = vmul.f32 %v549_v60, %v549_v60  ;;  %v2929_v7 = vpack.c.bf16 %v1158_v0, %v1155_v53  ;;  %v2139_v9 = vadd.f32 %v2138_v1, %v1158_v0 }
 0x14b   :  { %3037 = vst [vmem:[%s3895_s5 + $0xa8] sm:$0xff] %v2934_v63   ;;  %v2274_v8 = vadd.f32 %v2273_v2, %v2211_v57  ;;  %3005 = vst [vmem:[%s3894_s4 + $0xa0] sm:$0xff] %v2769_v3   ;;  %v2212_v10 = vmul.f32 %v1158_v0, %v1158_v0  ;;  %v1932_v12 = vadd.f32 %v3186_v42, %v1931_v5 }
 0x14c   :  { %v2067_v13 = vadd.f32 %v2066_v4, %v2004_v6  ;;  %3036 = vst [vmem:[%s3895_s5 + $0xa0] sm:$0xff] %v2929_v7   ;;  %v2006_v16 = vmul.f32 %v3187_v54, %v3187_v54  ;;  %v2140_v17 = vadd.f32 %v3266_v47, %v2139_v9  ;;  %v2214_v21 = vmul.f32 %v3267_v59, %v3267_v59 }
 0x14d   :  { %v3190_v14 = vpop.f32.mrb[44].mxu0  ;;  %v2275_v18 = vadd.f32 %v2274_v8, %v2212_v10  ;;  %v1933_v23 = vadd.f32 %v3187_v54, %v1932_v12 }
 0x14e   :  { %v3270_v19 = vpop.f32.mrb[44].mxu1  ;;  %v562_v20 = vpop.f32.mrb[45].mxu0  ;;  %v2068_v22 = vadd.f32 %v2067_v13, %v2005_v11  ;;  %v2141_v28 = vadd.f32 %v3267_v59, %v2140_v17  ;;  %v2009_v47 = vmul.f32 %v3190_v14, %v3190_v14 }
 0x14f   :  { %v2007_v24 = vmul.f32 %v562_v20, %v562_v20  ;;  %v1171_v25 = vpop.f32.mrb[45].mxu1  ;;  %v3191_v26 = vpop.f32.mrb[46].mxu0  ;;  %v2276_v27 = vadd.f32 %v2275_v18, %v2213_v15  ;;  %v1934_v33 = vadd.f32 %v1933_v23, %v562_v20  ;;  %v2217_v51 = vmul.f32 %v3270_v19, %v3270_v19 }
 0x150   :  { %v2215_v29 = vmul.f32 %v1171_v25, %v1171_v25  ;;  %v2784_v30 = vpack.c.bf16 %v3191_v26, %v3190_v14  ;;  %v3271_v31 = vpop.f32.mrb[46].mxu1  ;;  %v565_v32 = vpop.f32.mrb[47].mxu0  ;;  %v2069_v34 = vadd.f32 %v2068_v22, %v2006_v16  ;;  %v2142_v37 = vadd.f32 %v2141_v28, %v1171_v25 }
 0x151   :  { %v2944_v35 = vpack.c.bf16 %v3271_v31, %v3270_v19  ;;  %v1174_v36 = vpop.f32.mrb[47].mxu1  ;;  %v2277_v38 = vadd.f32 %v2276_v27, %v2214_v21  ;;  %v2779_v39 = vpack.c.bf16 %v565_v32, %v562_v20  ;;  %v1935_v41 = vadd.f32 %v1934_v33, %v565_v32 }
 0x152   :  { %3008 = vst [vmem:[%s3894_s4 + $0xb8] sm:$0xff] %v2784_v30   ;;  %v2070_v40 = vadd.f32 %v2069_v34, %v2007_v24  ;;  %v2008_v42 = vmul.f32 %v565_v32, %v565_v32  ;;  %v2939_v43 = vpack.c.bf16 %v1174_v36, %v1171_v25  ;;  %v2143_v45 = vadd.f32 %v2142_v37, %v1174_v36 }
 0x153   :  { %3039 = vst [vmem:[%s3895_s5 + $0xb8] sm:$0xff] %v2944_v35   ;;  %v2278_v44 = vadd.f32 %v2277_v38, %v2215_v29  ;;  %3007 = vst [vmem:[%s3894_s4 + $0xb0] sm:$0xff] %v2779_v39   ;;  %v2216_v46 = vmul.f32 %v1174_v36, %v1174_v36  ;;  %v1936_v48 = vadd.f32 %v3190_v14, %v1935_v41 }
 0x154   :  { %v2071_v49 = vadd.f32 %v2070_v40, %v2008_v42  ;;  %3038 = vst [vmem:[%s3895_s5 + $0xb0] sm:$0xff] %v2939_v43   ;;  %v2010_v52 = vmul.f32 %v3191_v26, %v3191_v26  ;;  %v2144_v53 = vadd.f32 %v3270_v19, %v2143_v45  ;;  %v2218_v57 = vmul.f32 %v3271_v31, %v3271_v31 }
 0x155   :  { %v3194_v50 = vpop.f32.mrb[48].mxu0  ;;  %v2279_v54 = vadd.f32 %v2278_v44, %v2216_v46  ;;  %v1937_v59 = vadd.f32 %v3191_v26, %v1936_v48 }
 0x156   :  { %v3274_v55 = vpop.f32.mrb[48].mxu1  ;;  %v578_v56 = vpop.f32.mrb[49].mxu0  ;;  %v2072_v58 = vadd.f32 %v2071_v49, %v2009_v47  ;;  %v2145_v0 = vadd.f32 %v3271_v31, %v2144_v53  ;;  %v2013_v19 = vmul.f32 %v3194_v50, %v3194_v50 }
 0x157   :  { %v2011_v60 = vmul.f32 %v578_v56, %v578_v56  ;;  %v1187_v61 = vpop.f32.mrb[49].mxu1  ;;  %v3195_v62 = vpop.f32.mrb[50].mxu0  ;;  %v2280_v63 = vadd.f32 %v2279_v54, %v2217_v51  ;;  %v1938_v5 = vadd.f32 %v1937_v59, %v578_v56  ;;  %v2221_v23 = vmul.f32 %v3274_v55, %v3274_v55 }
 0x158   :  { %v2219_v1 = vmul.f32 %v1187_v61, %v1187_v61  ;;  %v2794_v2 = vpack.c.bf16 %v3195_v62, %v3194_v50  ;;  %v3275_v3 = vpop.f32.mrb[50].mxu1  ;;  %v581_v4 = vpop.f32.mrb[51].mxu0  ;;  %v2073_v6 = vadd.f32 %v2072_v58, %v2010_v52  ;;  %v2146_v9 = vadd.f32 %v2145_v0, %v1187_v61 }
 0x159   :  { %v2954_v7 = vpack.c.bf16 %v3275_v3, %v3274_v55  ;;  %v1190_v8 = vpop.f32.mrb[51].mxu1  ;;  %v2281_v10 = vadd.f32 %v2280_v63, %v2218_v57  ;;  %v2789_v11 = vpack.c.bf16 %v581_v4, %v578_v56  ;;  %v1939_v13 = vadd.f32 %v1938_v5, %v581_v4 }
 0x15a   :  { %3010 = vst [vmem:[%s3894_s4 + $0xc8] sm:$0xff] %v2794_v2   ;;  %v2074_v12 = vadd.f32 %v2073_v6, %v2011_v60  ;;  %v2012_v14 = vmul.f32 %v581_v4, %v581_v4  ;;  %v2949_v15 = vpack.c.bf16 %v1190_v8, %v1187_v61  ;;  %v2147_v17 = vadd.f32 %v2146_v9, %v1190_v8 }
 0x15b   :  { %3041 = vst [vmem:[%s3895_s5 + $0xc8] sm:$0xff] %v2954_v7   ;;  %v2282_v16 = vadd.f32 %v2281_v10, %v2219_v1  ;;  %3009 = vst [vmem:[%s3894_s4 + $0xc0] sm:$0xff] %v2789_v11   ;;  %v2220_v18 = vmul.f32 %v1190_v8, %v1190_v8  ;;  %v1940_v20 = vadd.f32 %v3194_v50, %v1939_v13 }
 0x15c   :  { %v2075_v21 = vadd.f32 %v2074_v12, %v2012_v14  ;;  %3040 = vst [vmem:[%s3895_s5 + $0xc0] sm:$0xff] %v2949_v15   ;;  %v2014_v24 = vmul.f32 %v3195_v62, %v3195_v62  ;;  %v2148_v25 = vadd.f32 %v3274_v55, %v2147_v17  ;;  %v2222_v29 = vmul.f32 %v3275_v3, %v3275_v3 }
 0x15d   :  { %v3198_v22 = vpop.f32.mrb[52].mxu0  ;;  %v2283_v26 = vadd.f32 %v2282_v16, %v2220_v18  ;;  %v1941_v31 = vadd.f32 %v3195_v62, %v1940_v20 }
 0x15e   :  { %v3278_v27 = vpop.f32.mrb[52].mxu1  ;;  %v594_v28 = vpop.f32.mrb[53].mxu0  ;;  %v2076_v30 = vadd.f32 %v2075_v21, %v2013_v19  ;;  %v2149_v36 = vadd.f32 %v3275_v3, %v2148_v25  ;;  %v2017_v55 = vmul.f32 %v3198_v22, %v3198_v22 }
 0x15f   :  { %v2015_v32 = vmul.f32 %v594_v28, %v594_v28  ;;  %v1203_v33 = vpop.f32.mrb[53].mxu1  ;;  %v3199_v34 = vpop.f32.mrb[54].mxu0  ;;  %v2284_v35 = vadd.f32 %v2283_v26, %v2221_v23  ;;  %v1942_v41 = vadd.f32 %v1941_v31, %v594_v28  ;;  %v2225_v59 = vmul.f32 %v3278_v27, %v3278_v27 }
 0x160   :  { %v2223_v37 = vmul.f32 %v1203_v33, %v1203_v33  ;;  %v2804_v38 = vpack.c.bf16 %v3199_v34, %v3198_v22  ;;  %v3279_v39 = vpop.f32.mrb[54].mxu1  ;;  %v597_v40 = vpop.f32.mrb[55].mxu0  ;;  %v2077_v42 = vadd.f32 %v2076_v30, %v2014_v24  ;;  %v2150_v45 = vadd.f32 %v2149_v36, %v1203_v33 }
 0x161   :  { %v2964_v43 = vpack.c.bf16 %v3279_v39, %v3278_v27  ;;  %v1206_v44 = vpop.f32.mrb[55].mxu1  ;;  %v2285_v46 = vadd.f32 %v2284_v35, %v2222_v29  ;;  %v2799_v47 = vpack.c.bf16 %v597_v40, %v594_v28  ;;  %v1943_v49 = vadd.f32 %v1942_v41, %v597_v40 }
 0x162   :  { %3012 = vst [vmem:[%s3894_s4 + $0xd8] sm:$0xff] %v2804_v38   ;;  %v2078_v48 = vadd.f32 %v2077_v42, %v2015_v32  ;;  %v2016_v50 = vmul.f32 %v597_v40, %v597_v40  ;;  %v2959_v51 = vpack.c.bf16 %v1206_v44, %v1203_v33  ;;  %v2151_v53 = vadd.f32 %v2150_v45, %v1206_v44 }
 0x163   :  { %3043 = vst [vmem:[%s3895_s5 + $0xd8] sm:$0xff] %v2964_v43   ;;  %v2286_v52 = vadd.f32 %v2285_v46, %v2223_v37  ;;  %3011 = vst [vmem:[%s3894_s4 + $0xd0] sm:$0xff] %v2799_v47   ;;  %v2224_v54 = vmul.f32 %v1206_v44, %v1206_v44  ;;  %v1944_v56 = vadd.f32 %v3198_v22, %v1943_v49 }
 0x164   :  { %v2079_v57 = vadd.f32 %v2078_v48, %v2016_v50  ;;  %3042 = vst [vmem:[%s3895_s5 + $0xd0] sm:$0xff] %v2959_v51   ;;  %v2018_v60 = vmul.f32 %v3199_v34, %v3199_v34  ;;  %v2152_v61 = vadd.f32 %v3278_v27, %v2151_v53  ;;  %v2226_v1 = vmul.f32 %v3279_v39, %v3279_v39 }
 0x165   :  { %v3202_v58 = vpop.f32.mrb[56].mxu0  ;;  %v2287_v62 = vadd.f32 %v2286_v52, %v2224_v54  ;;  %v1945_v3 = vadd.f32 %v3199_v34, %v1944_v56 }
 0x166   :  { %v3282_v63 = vpop.f32.mrb[56].mxu1  ;;  %v610_v0 = vpop.f32.mrb[57].mxu0  ;;  %v2080_v2 = vadd.f32 %v2079_v57, %v2017_v55  ;;  %v2153_v8 = vadd.f32 %v3279_v39, %v2152_v61  ;;  %v2021_v27 = vmul.f32 %v3202_v58, %v3202_v58 }
 0x167   :  { %v2019_v4 = vmul.f32 %v610_v0, %v610_v0  ;;  %v1219_v5 = vpop.f32.mrb[57].mxu1  ;;  %v3203_v6 = vpop.f32.mrb[58].mxu0  ;;  %v2288_v7 = vadd.f32 %v2287_v62, %v2225_v59  ;;  %v1946_v13 = vadd.f32 %v1945_v3, %v610_v0  ;;  %v2229_v31 = vmul.f32 %v3282_v63, %v3282_v63 }
 0x168   :  { %v2227_v9 = vmul.f32 %v1219_v5, %v1219_v5  ;;  %v2814_v10 = vpack.c.bf16 %v3203_v6, %v3202_v58  ;;  %v3283_v11 = vpop.f32.mrb[58].mxu1  ;;  %v613_v12 = vpop.f32.mrb[59].mxu0  ;;  %v2081_v14 = vadd.f32 %v2080_v2, %v2018_v60  ;;  %v2154_v17 = vadd.f32 %v2153_v8, %v1219_v5 }
 0x169   :  { %v2974_v15 = vpack.c.bf16 %v3283_v11, %v3282_v63  ;;  %v1222_v16 = vpop.f32.mrb[59].mxu1  ;;  %v2289_v18 = vadd.f32 %v2288_v7, %v2226_v1  ;;  %v2809_v19 = vpack.c.bf16 %v613_v12, %v610_v0  ;;  %v1947_v21 = vadd.f32 %v1946_v13, %v613_v12 }
 0x16a   :  { %3014 = vst [vmem:[%s3894_s4 + $0xe8] sm:$0xff] %v2814_v10   ;;  %v2082_v20 = vadd.f32 %v2081_v14, %v2019_v4  ;;  %v2020_v22 = vmul.f32 %v613_v12, %v613_v12  ;;  %v2969_v23 = vpack.c.bf16 %v1222_v16, %v1219_v5  ;;  %v2155_v25 = vadd.f32 %v2154_v17, %v1222_v16 }
 0x16b   :  { %3045 = vst [vmem:[%s3895_s5 + $0xe8] sm:$0xff] %v2974_v15   ;;  %v2290_v24 = vadd.f32 %v2289_v18, %v2227_v9  ;;  %3013 = vst [vmem:[%s3894_s4 + $0xe0] sm:$0xff] %v2809_v19   ;;  %v2228_v26 = vmul.f32 %v1222_v16, %v1222_v16  ;;  %v1948_v28 = vadd.f32 %v3202_v58, %v1947_v21 }
 0x16c   :  { %v2083_v29 = vadd.f32 %v2082_v20, %v2020_v22  ;;  %3044 = vst [vmem:[%s3895_s5 + $0xe0] sm:$0xff] %v2969_v23   ;;  %v2022_v32 = vmul.f32 %v3203_v6, %v3203_v6  ;;  %v2156_v33 = vadd.f32 %v3282_v63, %v2155_v25  ;;  %v2230_v37 = vmul.f32 %v3283_v11, %v3283_v11 }
 0x16d   :  { %v3206_v30 = vpop.f32.mrb[60].mxu0  ;;  %v2291_v34 = vadd.f32 %v2290_v24, %v2228_v26  ;;  %v1949_v39 = vadd.f32 %v3203_v6, %v1948_v28 }
 0x16e   :  { %v3286_v35 = vpop.f32.mrb[60].mxu1  ;;  %v626_v36 = vpop.f32.mrb[61].mxu0  ;;  %v2084_v38 = vadd.f32 %v2083_v29, %v2021_v27  ;;  %v2157_v44 = vadd.f32 %v3283_v11, %v2156_v33  ;;  %v2025_v63 = vmul.f32 %v3206_v30, %v3206_v30  ;;  %v1890_v29 = vld [vmem:[%s3892_s6] sm:$0x1] }
 0x16f   :  { %v2023_v40 = vmul.f32 %v626_v36, %v626_v36  ;;  %v1235_v41 = vpop.f32.mrb[61].mxu1  ;;  %v3207_v42 = vpop.f32.mrb[62].mxu0  ;;  %v2292_v43 = vadd.f32 %v2291_v34, %v2229_v31  ;;  %v1950_v49 = vadd.f32 %v1949_v39, %v626_v36  ;;  %v2233_v2 = vmul.f32 %v3286_v35, %v3286_v35  ;;  %v2098_v34 = vld [vmem:[%s3896_s8] sm:$0x1] }
 0x170   :  { %v2231_v45 = vmul.f32 %v1235_v41, %v1235_v41  ;;  %v2824_v46 = vpack.c.bf16 %v3207_v42, %v3206_v30  ;;  %v3287_v47 = vpop.f32.mrb[62].mxu1  ;;  %v629_v48 = vpop.f32.mrb[63].mxu0  ;;  %v2085_v50 = vadd.f32 %v2084_v38, %v2022_v32  ;;  %v2158_v53 = vadd.f32 %v2157_v44, %v1235_v41 }
 0x171   :  { %v2984_v51 = vpack.c.bf16 %v3287_v47, %v3286_v35  ;;  %v1238_v52 = vpop.f32.mrb[63].mxu1  ;;  %v2293_v54 = vadd.f32 %v2292_v43, %v2230_v37  ;;  %v2819_v55 = vpack.c.bf16 %v629_v48, %v626_v36  ;;  %v1951_v57 = vadd.f32 %v1950_v49, %v629_v48 }
 0x172   :  { %3016 = vst [vmem:[%s3894_s4 + $0xf8] sm:$0xff] %v2824_v46   ;;  %v2086_v56 = vadd.f32 %v2085_v50, %v2023_v40  ;;  %v2024_v58 = vmul.f32 %v629_v48, %v629_v48  ;;  %v2979_v59 = vpack.c.bf16 %v1238_v52, %v1235_v41  ;;  %v2159_v61 = vadd.f32 %v2158_v53, %v1238_v52  ;;  %v2170_v40 = vld [vmem:[%s3897_s9] sm:$0x1] }
 0x173   :  { %3047 = vst [vmem:[%s3895_s5 + $0xf8] sm:$0xff] %v2984_v51   ;;  %v2294_v60 = vadd.f32 %v2293_v54, %v2231_v45  ;;  %3015 = vst [vmem:[%s3894_s4 + $0xf0] sm:$0xff] %v2819_v55   ;;  %v2232_v62 = vmul.f32 %v1238_v52, %v1238_v52  ;;  %v1952_v0 = vadd.f32 %v3206_v30, %v1951_v57 }
 0x174   :  { %v2087_v1 = vadd.f32 %v2086_v56, %v2024_v58  ;;  %3046 = vst [vmem:[%s3895_s5 + $0xf0] sm:$0xff] %v2979_v59   ;;  %v2160_v3 = vadd.f32 %v3286_v35, %v2159_v61  ;;  %v2026_v5 = vmul.f32 %v3207_v42, %v3207_v42  ;;  %v2234_v8 = vmul.f32 %v3287_v47, %v3287_v47  ;;  %v1962_v35 = vld [vmem:[%s3893_s7] sm:$0x1] }
 0x175   :  { %v2295_v4 = vadd.f32 %v2294_v60, %v2232_v62  ;;  %v1953_v6 = vadd.f32 %v3207_v42, %v1952_v0 }
 0x176   :  { %v2088_v7 = vadd.f32 %v2087_v1, %v2025_v63  ;;  %v2161_v9 = vadd.f32 %v3287_v47, %v2160_v3 }
 0x177   :  { %v2296_v10 = vadd.f32 %v2295_v4, %v2233_v2  ;;  %v1954_v11 = vrot.slane %v1953_v6, 4 }
 0x178   :  { %v2089_v12 = vadd.f32 %v2088_v7, %v2026_v5  ;;  %v2162_v13 = vrot.slane %v2161_v9, 4 }
 0x179   :  { %v2297_v14 = vadd.f32 %v2296_v10, %v2234_v8  ;;  %v1955_v15 = vadd.f32 %v1954_v11, %v1953_v6 }
 0x17a   :  { %v2090_v16 = vrot.slane %v2089_v12, 4  ;;  %v2163_v17 = vadd.f32 %v2162_v13, %v2161_v9 }
 0x17b   :  { %v2298_v18 = vrot.slane %v2297_v14, 4  ;;  %v1956_v19 = vrot.slane %v1955_v15, 2 }
 0x17c   :  { %v2091_v20 = vadd.f32 %v2090_v16, %v2089_v12  ;;  %v2164_v21 = vrot.slane %v2163_v17, 2 }
 0x17d   :  { %v2299_v22 = vadd.f32 %v2298_v18, %v2297_v14  ;;  %v1957_v23 = vadd.f32 %v1956_v19, %v1955_v15 }
 0x17e   :  { %v2092_v24 = vrot.slane %v2091_v20, 2  ;;  %v2165_v25 = vadd.f32 %v2164_v21, %v2163_v17 }
 0x17f   :  { %v2300_v26 = vrot.slane %v2299_v22, 2  ;;  %v1958_v27 = vrot.slane %v1957_v23, 1 }
 0x180   :  { %v2093_v28 = vadd.f32 %v2092_v24, %v2091_v20  ;;  %v2166_v30 = vrot.slane %v2165_v25, 1 }
 0x181   :  { %v2301_v31 = vadd.f32 %v2300_v26, %v2299_v22  ;;  %v1959_v32 = vadd.f32 %v1958_v27, %v1957_v23 }
 0x182   :  { %v2094_v33 = vrot.slane %v2093_v28, 1  ;;  %v2167_v36 = vadd.f32 %v2166_v30, %v2165_v25 }
 0x183   :  { %v2302_v37 = vrot.slane %v2301_v31, 1  ;;  %v1960_v38 = vadd.f32 %v1959_v32, %v1890_v29 }
 0x184   :  { %v2095_v39 = vadd.f32 %v2094_v33, %v2093_v28  ;;  %v2168_v41 = vadd.f32 %v2167_v36, %v2098_v34 }
 0x185   :  { %v2303_v42 = vadd.f32 %v2302_v37, %v2301_v31  ;;  %1961 = vst [vmem:[%s3892_s6] sm:$0x1] %v1960_v38 }
 0x186   :  { %v2096_v43 = vadd.f32 %v2095_v39, %v1962_v35  ;;  %2169 = vst [vmem:[%s3896_s8] sm:$0x1] %v2168_v41 }
 0x187   :  { %v2304_v44 = vadd.f32 %v2303_v42, %v2170_v40 }
 0x188   :  { %2097 = vst [vmem:[%s3893_s7] sm:$0x1] %v2096_v43 }
 0x189   :  { %2305 = vst [vmem:[%s3897_s9] sm:$0x1] %v2304_v44 }

</bundles_post_ra>
